<compile_context>
chip_gen: v7x
topology: tpu7x:2x2x1
jax: 0.10.0
libtpu: 0.0.40
codegen_flags: <defaults>
</compile_context>

<pallas_src>
import functools

import jax
import jax.numpy as jnp
from jax.experimental import pallas as pl
from jax.experimental.pallas import tpu as pltpu

# ----------------------------- configuration -------------------------------
C_IN = 4            # image channels
IMG_H = IMG_W = 16  # spatial
CNN_CONV_CH = 16    # synthetic backbone conv channels
CNN_OUT = 128       # params['cnn']['output_size']  (resnet8-like: 1*128*1)
CAT_IN = 8          # params['cat']['input_size']
GRU_HIDDEN = 32     # params['gru']['hidden_size']
GRU_LAYERS = 1      # params['gru']['num_layers']
FC_WIDTH = 32       # params['fc']['width']
FC_LAYERS = 2       # params['fc']['num_layers']
HEAD_OUT = 4        # params['head']['output_size']
GRU_IN = CNN_OUT + CAT_IN                   # CAT output size (136)
GATE_W = 3 * GRU_HIDDEN                     # 96  (r|z|n concatenated)
GATE_PAD = ((GATE_W + 127) // 128) * 128    # 128 (lane-dense padding)


# ----------------------------- Pallas kernel -------------------------------
def make_fused_kernel(batch, seq_len, hidden, n_fc):
    """Whole forward in one kernel body (single grid step)."""

    def kernel(patch_ref, wc_ref, bc_ref, pool_ref, wpg_ref, bg_ref,
               cat_ref, wic_ref, h0_ref, wh_ref, bh_ref, *rest):
        fc_refs = rest[:2 * n_fc]
        whead_ref = rest[2 * n_fc]
        bhead_ref = rest[2 * n_fc + 1]
        y_ref = rest[2 * n_fc + 2]
        hT_ref = rest[2 * n_fc + 3]

        # --- CNN backbone: conv3x3-as-one-matmul (bf16 operands, f32 acc) + ReLU
        conv = jnp.dot(patch_ref[...], wc_ref[...],
                       preferred_element_type=jnp.float32) + bc_ref[...]
        conv = jnp.maximum(conv, 0.0)                         # (S*B*HW, K)

        # --- per-frame global average pool as an MXU segment-sum matmul
        #     pool_ref is block-diagonal (S*B, S*B*HW) scaled by 1/HW.
        pooled = jnp.dot(pool_ref[...], conv,
                         preferred_element_type=jnp.float32)  # (S*B, K)

        # --- hoisted GRU input-side gate projection, TIME-MAJOR rows (t*B + b)
        #     gi = pooled @ (Wp @ Wi_img) + cat @ Wi_cat + (bp @ Wi_img + bi)
        #     (lane-padded 96->128; padded lanes never read below)
        gi = (jnp.dot(pooled, wpg_ref[...], preferred_element_type=jnp.float32)
              + jnp.dot(cat_ref[...], wic_ref[...],
                        preferred_element_type=jnp.float32)
              + bg_ref[...])                                  # (S*B, 128)

        # --- GRU recurrence, fully unrolled; h carried in registers
        Hd = hidden
        wh = wh_ref[...]                                      # (H, 128)
        bh = bh_ref[...]                                      # (1, 128)
        h = h0_ref[...]                                       # (B, H)
        for t in range(seq_len):
            gi_t = gi[t * batch:(t + 1) * batch, :]           # static 2-row slice
            gh = jnp.dot(h, wh, preferred_element_type=jnp.float32) + bh
            r = jax.nn.sigmoid(gi_t[:, 0:Hd] + gh[:, 0:Hd])
            z = jax.nn.sigmoid(gi_t[:, Hd:2 * Hd] + gh[:, Hd:2 * Hd])
            n = jnp.tanh(gi_t[:, 2 * Hd:3 * Hd] + r * gh[:, 2 * Hd:3 * Hd])
            h = (1.0 - z) * n + z * h
        hT_ref[...] = h                                       # h_n (1 layer)

        # --- FC (ReLU -> Dropout(id) -> Linear per layer) + HEAD (ReLU -> Linear)
        y = h                                                 # x = out[-1]
        for i in range(n_fc):
            w_ref, b_ref = fc_refs[2 * i], fc_refs[2 * i + 1]
            y = jnp.dot(jnp.maximum(y, 0.0), w_ref[...],
                        preferred_element_type=jnp.float32) + b_ref[...]
        y_ref[...] = (jnp.dot(jnp.maximum(y, 0.0), whead_ref[...],
                              preferred_element_type=jnp.float32)
                      + bhead_ref[...])

    return kernel


# ----------------------------- wrappers -------------------------------------
def im2col_3x3(x):
    """x: (N, C, H, W), pad=1, stride=1 -> (N, H*W, C*9) in x's dtype."""
    N, C, H, W = x.shape
    xp = jnp.pad(x, ((0, 0), (0, 0), (1, 1), (1, 1)))
    cols = []
    for dy in range(3):
        for dx in range(3):
            cols.append(xp[:, :, dy:dy + H, dx:dx + W])
    patches = jnp.stack(cols, axis=2)                 # (N, C, 9, H, W)
    patches = patches.transpose(0, 3, 4, 1, 2)        # (N, H, W, C, 9)
    return patches.reshape(N, H * W, C * 9)


def _full_spec(a):
    # Block == full array (exempt from the (8,128) divisibility rule).
    nd = a.ndim
    return pl.BlockSpec(a.shape, lambda i, _nd=nd: (0,) * _nd)


def forgetful_ann_forward(fused, x_img, x_cat, h0):
    """Returns (head_output (B, HEAD_OUT), h_n (GRU_LAYERS, B, GRU_HIDDEN))."""
    assert GRU_LAYERS == 1  # TODO(synk): multi-layer GRU stacking not implemented
    B, S, C, H, W = x_img.shape
    HW = H * W

    # Layout plumbing (time-major frame order: n = t*B + b), bf16 patches.
    frames = (x_img.transpose(1, 0, 2, 3, 4)
                    .reshape(S * B, C, H, W)
                    .astype(jnp.bfloat16))
    patches = im2col_3x3(frames).reshape(S * B * HW, C * 9)      # (S*B*HW, 36) bf16
    cat_flat = x_cat.transpose(1, 0, 2).reshape(S * B, CAT_IN)   # (S*B, 8) f32

    n_fc = len(fused["fc"])
    kernel = make_fused_kernel(B, S, GRU_HIDDEN, n_fc)

    args = [patches, fused["Wc"], fused["bc"], fused["pool"],
            fused["W_pool_gate"], fused["b_gate"],
            cat_flat, fused["Wi_cat"], h0[0],
            fused["Wh"], fused["bh"]]
    for (w, b) in fused["fc"]:
        args += [w, b]
    args += [fused["W_head"], fused["b_head"]]

    in_specs = [_full_spec(a) for a in args]
    out_specs = [
        pl.BlockSpec((B, HEAD_OUT), lambda i: (0, 0)),
        pl.BlockSpec((B, GRU_HIDDEN), lambda i: (0, 0)),
    ]

    y, hT = pl.pallas_call(
        kernel,
        grid=(1,),
        in_specs=in_specs,
        out_specs=out_specs,
        out_shape=(
            jax.ShapeDtypeStruct((B, HEAD_OUT), jnp.float32),
            jax.ShapeDtypeStruct((B, GRU_HIDDEN), jnp.float32),
        ),
        compiler_params=pltpu.CompilerParams(dimension_semantics=("arbitrary",)),
    )(*args)

    h_n = hT[jnp.newaxis]                                        # (1, B, H) == out[-1]
    return y, h_n


# ----------------------------- parameter init -------------------------------
def init_params(key):
    def nrm(k, shape, scale=0.05):
        return scale * jax.random.normal(k, shape, jnp.float32)

    def pad_cols(w, pad_to):
        return jnp.pad(w, ((0, 0), (0, pad_to - w.shape[1])))

    keys = iter(jax.random.split(key, 64))
    params = {
        "cnn": {
            "Wc": nrm(next(keys), (C_IN * 9, CNN_CONV_CH)),
            "bc": nrm(next(keys), (1, CNN_CONV_CH)),
            "Wp": nrm(next(keys), (CNN_CONV_CH, CNN_OUT)),
            "bp": nrm(next(keys), (1, CNN_OUT)),
        },
        # Single GRU layer; gate matrices concatenated [r|z|n] along the output
        # dim and zero-padded 96->128 lanes.  The input weight is split into
        # image-feature rows and cat rows so the (S,B,136) concat never exists.
        "gru_in": {
            "Wi_img": pad_cols(nrm(next(keys), (CNN_OUT, GATE_W)), GATE_PAD),
            "Wi_cat": pad_cols(nrm(next(keys), (CAT_IN, GATE_W)), GATE_PAD),
            "bi": pad_cols(nrm(next(keys), (1, GATE_W)), GATE_PAD),
        },
        "gru_rec": {
            "Wh": pad_cols(nrm(next(keys), (GRU_HIDDEN, GATE_W)), GATE_PAD),
            "bh": pad_cols(nrm(next(keys), (1, GATE_W)), GATE_PAD),
        },
        "fc": [],
    }
    fc_in = GRU_HIDDEN
    for _ in range(FC_LAYERS):
        params["fc"].append((nrm(next(keys), (fc_in, FC_WIDTH)),
                             nrm(next(keys), (1, FC_WIDTH))))
        fc_in = FC_WIDTH
    params["head"] = (nrm(next(keys), (FC_WIDTH, HEAD_OUT)),
                      nrm(next(keys), (1, HEAD_OUT)))
    return params


def prepare_fused_params(params, batch, seq_len, img_h, img_w):
    """One-time (outside jit) weight folding & pooling-matrix construction."""
    hw = img_h * img_w
    n = seq_len * batch
    Wp = params["cnn"]["Wp"]
    bp = params["cnn"]["bp"]
    Wi_img = params["gru_in"]["Wi_img"]
    # Block-diagonal per-frame mean matrix (MXU segment-sum), (n, n*hw).
    pool = jnp.kron(jnp.eye(n, dtype=jnp.float32),
                    jnp.ones((1, hw), jnp.float32)) * (1.0 / float(hw))
    return {
        "Wc": params["cnn"]["Wc"].astype(jnp.bfloat16),
        "bc": params["cnn"]["bc"],
        "pool": pool,
        # CNN projection folded into the GRU input-gate weights:
        "W_pool_gate": jnp.dot(Wp, Wi_img),                       # (K, 128)
        "b_gate": jnp.dot(bp, Wi_img) + params["gru_in"]["bi"],   # (1, 128)
        "Wi_cat": params["gru_in"]["Wi_cat"],
        "Wh": params["gru_rec"]["Wh"],
        "bh": params["gru_rec"]["bh"],
        "fc": params["fc"],
        "W_head": params["head"][0],
        "b_head": params["head"][1],
    }


# ----------------------------------- main ----------------------------------
if __name__ == "__main__":
    B, S = 2, 8
    key = jax.random.PRNGKey(0)
    k_img, k_cat = jax.random.split(key, 2)

    x_img = jax.random.normal(k_img, (B, S, C_IN, IMG_H, IMG_W), jnp.float32)
    x_cat = jax.random.normal(k_cat, (B, S, CAT_IN), jnp.float32)
    # matches getZeroInitializedHiddenState
    h0 = jnp.zeros((GRU_LAYERS, B, GRU_HIDDEN), jnp.float32)

    params = init_params(jax.random.PRNGKey(1))
    fused = prepare_fused_params(params, B, S, IMG_H, IMG_W)

    fwd = jax.jit(functools.partial(forgetful_ann_forward, fused))
    y, h_n = fwd(x_img, x_cat, h0)
    jax.block_until_ready((y, h_n))

    assert y.shape == (B, HEAD_OUT), y.shape
    assert h_n.shape == (GRU_LAYERS, B, GRU_HIDDEN), h_n.shape
    assert bool(jnp.all(jnp.isfinite(y))) and bool(jnp.all(jnp.isfinite(h_n)))
    print("KERNEL_OK")
</pallas_src>

<mosaic_0001>
module attributes {stable_mosaic.version = 11 : i64} {
  func.func @kernel(%arg0: i32, %arg1: memref<4096x36xbf16, #tpu.memory_space<vmem>>, %arg2: memref<36x16xbf16, #tpu.memory_space<vmem>>, %arg3: memref<1x16xf32, #tpu.memory_space<vmem>>, %arg4: memref<16x4096xf32, #tpu.memory_space<vmem>>, %arg5: memref<16x128xf32, #tpu.memory_space<vmem>>, %arg6: memref<1x128xf32, #tpu.memory_space<vmem>>, %arg7: memref<16x8xf32, #tpu.memory_space<vmem>>, %arg8: memref<8x128xf32, #tpu.memory_space<vmem>>, %arg9: memref<2x32xf32, #tpu.memory_space<vmem>>, %arg10: memref<32x128xf32, #tpu.memory_space<vmem>>, %arg11: memref<1x128xf32, #tpu.memory_space<vmem>>, %arg12: memref<32x32xf32, #tpu.memory_space<vmem>>, %arg13: memref<1x32xf32, #tpu.memory_space<vmem>>, %arg14: memref<32x32xf32, #tpu.memory_space<vmem>>, %arg15: memref<1x32xf32, #tpu.memory_space<vmem>>, %arg16: memref<32x4xf32, #tpu.memory_space<vmem>>, %arg17: memref<1x4xf32, #tpu.memory_space<vmem>>, %arg18: memref<2x4xf32, #tpu.memory_space<vmem>>, %arg19: memref<2x32xf32, #tpu.memory_space<vmem>>) attributes {dimension_semantics = [#tpu.dimension_semantics<arbitrary>], iteration_bounds = array<i64: 1>, scalar_prefetch = 0 : i64, scratch_operands = 0 : i64, tpu.core_type = #tpu.core_type<tc>, window_params = [{pipeline_mode = #tpu.pipeline_mode<synchronous>, transform_indices = @transform_0, window_bounds = array<i64: 4096, 36>}, {pipeline_mode = #tpu.pipeline_mode<synchronous>, transform_indices = @transform_1, window_bounds = array<i64: 36, 16>}, {pipeline_mode = #tpu.pipeline_mode<synchronous>, transform_indices = @transform_2, window_bounds = array<i64: 1, 16>}, {pipeline_mode = #tpu.pipeline_mode<synchronous>, transform_indices = @transform_3, window_bounds = array<i64: 16, 4096>}, {pipeline_mode = #tpu.pipeline_mode<synchronous>, transform_indices = @transform_4, window_bounds = array<i64: 16, 128>}, {pipeline_mode = #tpu.pipeline_mode<synchronous>, transform_indices = @transform_5, window_bounds = array<i64: 1, 128>}, {pipeline_mode = #tpu.pipeline_mode<synchronous>, transform_indices = @transform_6, window_bounds = array<i64: 16, 8>}, {pipeline_mode = #tpu.pipeline_mode<synchronous>, transform_indices = @transform_7, window_bounds = array<i64: 8, 128>}, {pipeline_mode = #tpu.pipeline_mode<synchronous>, transform_indices = @transform_8, window_bounds = array<i64: 2, 32>}, {pipeline_mode = #tpu.pipeline_mode<synchronous>, transform_indices = @transform_9, window_bounds = array<i64: 32, 128>}, {pipeline_mode = #tpu.pipeline_mode<synchronous>, transform_indices = @transform_10, window_bounds = array<i64: 1, 128>}, {pipeline_mode = #tpu.pipeline_mode<synchronous>, transform_indices = @transform_11, window_bounds = array<i64: 32, 32>}, {pipeline_mode = #tpu.pipeline_mode<synchronous>, transform_indices = @transform_12, window_bounds = array<i64: 1, 32>}, {pipeline_mode = #tpu.pipeline_mode<synchronous>, transform_indices = @transform_13, window_bounds = array<i64: 32, 32>}, {pipeline_mode = #tpu.pipeline_mode<synchronous>, transform_indices = @transform_14, window_bounds = array<i64: 1, 32>}, {pipeline_mode = #tpu.pipeline_mode<synchronous>, transform_indices = @transform_15, window_bounds = array<i64: 32, 4>}, {pipeline_mode = #tpu.pipeline_mode<synchronous>, transform_indices = @transform_16, window_bounds = array<i64: 1, 4>}, {pipeline_mode = #tpu.pipeline_mode<synchronous>, transform_indices = @transform_17, window_bounds = array<i64: 2, 4>}, {pipeline_mode = #tpu.pipeline_mode<synchronous>, transform_indices = @transform_18, window_bounds = array<i64: 2, 32>}]} {
    %c0 = arith.constant 0 : index
    %c0_0 = arith.constant 0 : index
    %0 = vector.load %arg1[%c0, %c0_0] : memref<4096x36xbf16, #tpu.memory_space<vmem>>, vector<4096x36xbf16>
    %c0_1 = arith.constant 0 : index
    %c0_2 = arith.constant 0 : index
    %1 = vector.load %arg2[%c0_1, %c0_2] : memref<36x16xbf16, #tpu.memory_space<vmem>>, vector<36x16xbf16>
    %cst = arith.constant dense<0.000000e+00> : vector<4096x16xf32>
    %2 = tpu.matmul %0, %1, %cst {dimension_numbers = #tpu.dot_dimension_numbers<[1], [0], [0], [1], [0, 0, 1, 1], [], []>} : vector<4096x36xbf16>, vector<36x16xbf16>, vector<4096x16xf32> -> vector<4096x16xf32>
    %c0_3 = arith.constant 0 : index
    %c0_4 = arith.constant 0 : index
    %3 = vector.load %arg3[%c0_3, %c0_4] : memref<1x16xf32, #tpu.memory_space<vmem>>, vector<1x16xf32>
    %4 = vector.broadcast %3 : vector<1x16xf32> to vector<4096x16xf32>
    %5 = arith.addf %2, %4 : vector<4096x16xf32>
    %cst_5 = arith.constant 0.000000e+00 : f32
    %6 = vector.broadcast %cst_5 : f32 to vector<4096x16xf32>
    %7 = arith.maximumf %5, %6 : vector<4096x16xf32>
    %c0_6 = arith.constant 0 : index
    %c0_7 = arith.constant 0 : index
    %8 = vector.load %arg4[%c0_6, %c0_7] : memref<16x4096xf32, #tpu.memory_space<vmem>>, vector<16x4096xf32>
    %cst_8 = arith.constant dense<0.000000e+00> : vector<16x16xf32>
    %9 = tpu.matmul %8, %7, %cst_8 {dimension_numbers = #tpu.dot_dimension_numbers<[1], [0], [0], [1], [0, 0, 1, 1], [], []>} : vector<16x4096xf32>, vector<4096x16xf32>, vector<16x16xf32> -> vector<16x16xf32>
    %c0_9 = arith.constant 0 : index
    %c0_10 = arith.constant 0 : index
    %10 = vector.load %arg5[%c0_9, %c0_10] : memref<16x128xf32, #tpu.memory_space<vmem>>, vector<16x128xf32>
    %cst_11 = arith.constant dense<0.000000e+00> : vector<16x128xf32>
    %11 = tpu.matmul %9, %10, %cst_11 {dimension_numbers = #tpu.dot_dimension_numbers<[1], [0], [0], [1], [0, 0, 1, 1], [], []>} : vector<16x16xf32>, vector<16x128xf32>, vector<16x128xf32> -> vector<16x128xf32>
    %c0_12 = arith.constant 0 : index
    %c0_13 = arith.constant 0 : index
    %12 = vector.load %arg7[%c0_12, %c0_13] : memref<16x8xf32, #tpu.memory_space<vmem>>, vector<16x8xf32>
    %c0_14 = arith.constant 0 : index
    %c0_15 = arith.constant 0 : index
    %13 = vector.load %arg8[%c0_14, %c0_15] : memref<8x128xf32, #tpu.memory_space<vmem>>, vector<8x128xf32>
    %cst_16 = arith.constant dense<0.000000e+00> : vector<16x128xf32>
    %14 = tpu.matmul %12, %13, %cst_16 {dimension_numbers = #tpu.dot_dimension_numbers<[1], [0], [0], [1], [0, 0, 1, 1], [], []>} : vector<16x8xf32>, vector<8x128xf32>, vector<16x128xf32> -> vector<16x128xf32>
    %15 = arith.addf %11, %14 : vector<16x128xf32>
    %c0_17 = arith.constant 0 : index
    %c0_18 = arith.constant 0 : index
    %16 = vector.load %arg6[%c0_17, %c0_18] : memref<1x128xf32, #tpu.memory_space<vmem>>, vector<1x128xf32>
    %17 = vector.broadcast %16 : vector<1x128xf32> to vector<16x128xf32>
    %18 = arith.addf %15, %17 : vector<16x128xf32>
    %c0_19 = arith.constant 0 : index
    %c0_20 = arith.constant 0 : index
    %19 = vector.load %arg10[%c0_19, %c0_20] : memref<32x128xf32, #tpu.memory_space<vmem>>, vector<32x128xf32>
    %c0_21 = arith.constant 0 : index
    %c0_22 = arith.constant 0 : index
    %20 = vector.load %arg11[%c0_21, %c0_22] : memref<1x128xf32, #tpu.memory_space<vmem>>, vector<1x128xf32>
    %c0_23 = arith.constant 0 : index
    %c0_24 = arith.constant 0 : index
    %21 = vector.load %arg9[%c0_23, %c0_24] : memref<2x32xf32, #tpu.memory_space<vmem>>, vector<2x32xf32>
    %22 = vector.extract_strided_slice %18 {offsets = [0, 0], sizes = [2, 128], strides = [1, 1]} : vector<16x128xf32> to vector<2x128xf32>
    %cst_25 = arith.constant dense<0.000000e+00> : vector<2x128xf32>
    %23 = tpu.matmul %21, %19, %cst_25 {dimension_numbers = #tpu.dot_dimension_numbers<[1], [0], [0], [1], [0, 0, 1, 1], [], []>} : vector<2x32xf32>, vector<32x128xf32>, vector<2x128xf32> -> vector<2x128xf32>
    %24 = vector.broadcast %20 : vector<1x128xf32> to vector<2x128xf32>
    %25 = arith.addf %23, %24 : vector<2x128xf32>
    %26 = vector.extract_strided_slice %22 {offsets = [0, 0], sizes = [2, 32], strides = [1, 1]} : vector<2x128xf32> to vector<2x32xf32>
    %27 = vector.extract_strided_slice %25 {offsets = [0, 0], sizes = [2, 32], strides = [1, 1]} : vector<2x128xf32> to vector<2x32xf32>
    %28 = arith.addf %26, %27 : vector<2x32xf32>
    %29 = arith.negf %28 : vector<2x32xf32>
    %30 = math.exp %29 : vector<2x32xf32>
    %cst_26 = arith.constant 1.000000e+00 : f32
    %31 = vector.broadcast %cst_26 : f32 to vector<2x32xf32>
    %32 = arith.addf %31, %30 : vector<2x32xf32>
    %33 = arith.divf %31, %32 : vector<2x32xf32>
    %34 = vector.extract_strided_slice %22 {offsets = [0, 32], sizes = [2, 32], strides = [1, 1]} : vector<2x128xf32> to vector<2x32xf32>
    %35 = vector.extract_strided_slice %25 {offsets = [0, 32], sizes = [2, 32], strides = [1, 1]} : vector<2x128xf32> to vector<2x32xf32>
    %36 = arith.addf %34, %35 : vector<2x32xf32>
    %37 = arith.negf %36 : vector<2x32xf32>
    %38 = math.exp %37 : vector<2x32xf32>
    %cst_27 = arith.constant 1.000000e+00 : f32
    %39 = vector.broadcast %cst_27 : f32 to vector<2x32xf32>
    %40 = arith.addf %39, %38 : vector<2x32xf32>
    %41 = arith.divf %39, %40 : vector<2x32xf32>
    %42 = vector.extract_strided_slice %22 {offsets = [0, 64], sizes = [2, 32], strides = [1, 1]} : vector<2x128xf32> to vector<2x32xf32>
    %43 = vector.extract_strided_slice %25 {offsets = [0, 64], sizes = [2, 32], strides = [1, 1]} : vector<2x128xf32> to vector<2x32xf32>
    %44 = arith.mulf %33, %43 : vector<2x32xf32>
    %45 = arith.addf %42, %44 : vector<2x32xf32>
    %46 = math.tanh %45 : vector<2x32xf32>
    %cst_28 = arith.constant 1.000000e+00 : f32
    %47 = vector.broadcast %cst_28 : f32 to vector<2x32xf32>
    %48 = arith.subf %47, %41 : vector<2x32xf32>
    %49 = arith.mulf %48, %46 : vector<2x32xf32>
    %50 = arith.mulf %41, %21 : vector<2x32xf32>
    %51 = arith.addf %49, %50 : vector<2x32xf32>
    %52 = vector.extract_strided_slice %18 {offsets = [2, 0], sizes = [2, 128], strides = [1, 1]} : vector<16x128xf32> to vector<2x128xf32>
    %cst_29 = arith.constant dense<0.000000e+00> : vector<2x128xf32>
    %53 = tpu.matmul %51, %19, %cst_29 {dimension_numbers = #tpu.dot_dimension_numbers<[1], [0], [0], [1], [0, 0, 1, 1], [], []>} : vector<2x32xf32>, vector<32x128xf32>, vector<2x128xf32> -> vector<2x128xf32>
    %54 = vector.broadcast %20 : vector<1x128xf32> to vector<2x128xf32>
    %55 = arith.addf %53, %54 : vector<2x128xf32>
    %56 = vector.extract_strided_slice %52 {offsets = [0, 0], sizes = [2, 32], strides = [1, 1]} : vector<2x128xf32> to vector<2x32xf32>
    %57 = vector.extract_strided_slice %55 {offsets = [0, 0], sizes = [2, 32], strides = [1, 1]} : vector<2x128xf32> to vector<2x32xf32>
    %58 = arith.addf %56, %57 : vector<2x32xf32>
    %59 = arith.negf %58 : vector<2x32xf32>
    %60 = math.exp %59 : vector<2x32xf32>
    %cst_30 = arith.constant 1.000000e+00 : f32
    %61 = vector.broadcast %cst_30 : f32 to vector<2x32xf32>
    %62 = arith.addf %61, %60 : vector<2x32xf32>
    %63 = arith.divf %61, %62 : vector<2x32xf32>
    %64 = vector.extract_strided_slice %52 {offsets = [0, 32], sizes = [2, 32], strides = [1, 1]} : vector<2x128xf32> to vector<2x32xf32>
    %65 = vector.extract_strided_slice %55 {offsets = [0, 32], sizes = [2, 32], strides = [1, 1]} : vector<2x128xf32> to vector<2x32xf32>
    %66 = arith.addf %64, %65 : vector<2x32xf32>
    %67 = arith.negf %66 : vector<2x32xf32>
    %68 = math.exp %67 : vector<2x32xf32>
    %cst_31 = arith.constant 1.000000e+00 : f32
    %69 = vector.broadcast %cst_31 : f32 to vector<2x32xf32>
    %70 = arith.addf %69, %68 : vector<2x32xf32>
    %71 = arith.divf %69, %70 : vector<2x32xf32>
    %72 = vector.extract_strided_slice %52 {offsets = [0, 64], sizes = [2, 32], strides = [1, 1]} : vector<2x128xf32> to vector<2x32xf32>
    %73 = vector.extract_strided_slice %55 {offsets = [0, 64], sizes = [2, 32], strides = [1, 1]} : vector<2x128xf32> to vector<2x32xf32>
    %74 = arith.mulf %63, %73 : vector<2x32xf32>
    %75 = arith.addf %72, %74 : vector<2x32xf32>
    %76 = math.tanh %75 : vector<2x32xf32>
    %cst_32 = arith.constant 1.000000e+00 : f32
    %77 = vector.broadcast %cst_32 : f32 to vector<2x32xf32>
    %78 = arith.subf %77, %71 : vector<2x32xf32>
    %79 = arith.mulf %78, %76 : vector<2x32xf32>
    %80 = arith.mulf %71, %51 : vector<2x32xf32>
    %81 = arith.addf %79, %80 : vector<2x32xf32>
    %82 = vector.extract_strided_slice %18 {offsets = [4, 0], sizes = [2, 128], strides = [1, 1]} : vector<16x128xf32> to vector<2x128xf32>
    %cst_33 = arith.constant dense<0.000000e+00> : vector<2x128xf32>
    %83 = tpu.matmul %81, %19, %cst_33 {dimension_numbers = #tpu.dot_dimension_numbers<[1], [0], [0], [1], [0, 0, 1, 1], [], []>} : vector<2x32xf32>, vector<32x128xf32>, vector<2x128xf32> -> vector<2x128xf32>
    %84 = vector.broadcast %20 : vector<1x128xf32> to vector<2x128xf32>
    %85 = arith.addf %83, %84 : vector<2x128xf32>
    %86 = vector.extract_strided_slice %82 {offsets = [0, 0], sizes = [2, 32], strides = [1, 1]} : vector<2x128xf32> to vector<2x32xf32>
    %87 = vector.extract_strided_slice %85 {offsets = [0, 0], sizes = [2, 32], strides = [1, 1]} : vector<2x128xf32> to vector<2x32xf32>
    %88 = arith.addf %86, %87 : vector<2x32xf32>
    %89 = arith.negf %88 : vector<2x32xf32>
    %90 = math.exp %89 : vector<2x32xf32>
    %cst_34 = arith.constant 1.000000e+00 : f32
    %91 = vector.broadcast %cst_34 : f32 to vector<2x32xf32>
    %92 = arith.addf %91, %90 : vector<2x32xf32>
    %93 = arith.divf %91, %92 : vector<2x32xf32>
    %94 = vector.extract_strided_slice %82 {offsets = [0, 32], sizes = [2, 32], strides = [1, 1]} : vector<2x128xf32> to vector<2x32xf32>
    %95 = vector.extract_strided_slice %85 {offsets = [0, 32], sizes = [2, 32], strides = [1, 1]} : vector<2x128xf32> to vector<2x32xf32>
    %96 = arith.addf %94, %95 : vector<2x32xf32>
    %97 = arith.negf %96 : vector<2x32xf32>
    %98 = math.exp %97 : vector<2x32xf32>
    %cst_35 = arith.constant 1.000000e+00 : f32
    %99 = vector.broadcast %cst_35 : f32 to vector<2x32xf32>
    %100 = arith.addf %99, %98 : vector<2x32xf32>
    %101 = arith.divf %99, %100 : vector<2x32xf32>
    %102 = vector.extract_strided_slice %82 {offsets = [0, 64], sizes = [2, 32], strides = [1, 1]} : vector<2x128xf32> to vector<2x32xf32>
    %103 = vector.extract_strided_slice %85 {offsets = [0, 64], sizes = [2, 32], strides = [1, 1]} : vector<2x128xf32> to vector<2x32xf32>
    %104 = arith.mulf %93, %103 : vector<2x32xf32>
    %105 = arith.addf %102, %104 : vector<2x32xf32>
    %106 = math.tanh %105 : vector<2x32xf32>
    %cst_36 = arith.constant 1.000000e+00 : f32
    %107 = vector.broadcast %cst_36 : f32 to vector<2x32xf32>
    %108 = arith.subf %107, %101 : vector<2x32xf32>
    %109 = arith.mulf %108, %106 : vector<2x32xf32>
    %110 = arith.mulf %101, %81 : vector<2x32xf32>
    %111 = arith.addf %109, %110 : vector<2x32xf32>
    %112 = vector.extract_strided_slice %18 {offsets = [6, 0], sizes = [2, 128], strides = [1, 1]} : vector<16x128xf32> to vector<2x128xf32>
    %cst_37 = arith.constant dense<0.000000e+00> : vector<2x128xf32>
    %113 = tpu.matmul %111, %19, %cst_37 {dimension_numbers = #tpu.dot_dimension_numbers<[1], [0], [0], [1], [0, 0, 1, 1], [], []>} : vector<2x32xf32>, vector<32x128xf32>, vector<2x128xf32> -> vector<2x128xf32>
    %114 = vector.broadcast %20 : vector<1x128xf32> to vector<2x128xf32>
    %115 = arith.addf %113, %114 : vector<2x128xf32>
    %116 = vector.extract_strided_slice %112 {offsets = [0, 0], sizes = [2, 32], strides = [1, 1]} : vector<2x128xf32> to vector<2x32xf32>
    %117 = vector.extract_strided_slice %115 {offsets = [0, 0], sizes = [2, 32], strides = [1, 1]} : vector<2x128xf32> to vector<2x32xf32>
    %118 = arith.addf %116, %117 : vector<2x32xf32>
    %119 = arith.negf %118 : vector<2x32xf32>
    %120 = math.exp %119 : vector<2x32xf32>
    %cst_38 = arith.constant 1.000000e+00 : f32
    %121 = vector.broadcast %cst_38 : f32 to vector<2x32xf32>
    %122 = arith.addf %121, %120 : vector<2x32xf32>
    %123 = arith.divf %121, %122 : vector<2x32xf32>
    %124 = vector.extract_strided_slice %112 {offsets = [0, 32], sizes = [2, 32], strides = [1, 1]} : vector<2x128xf32> to vector<2x32xf32>
    %125 = vector.extract_strided_slice %115 {offsets = [0, 32], sizes = [2, 32], strides = [1, 1]} : vector<2x128xf32> to vector<2x32xf32>
    %126 = arith.addf %124, %125 : vector<2x32xf32>
    %127 = arith.negf %126 : vector<2x32xf32>
    %128 = math.exp %127 : vector<2x32xf32>
    %cst_39 = arith.constant 1.000000e+00 : f32
    %129 = vector.broadcast %cst_39 : f32 to vector<2x32xf32>
    %130 = arith.addf %129, %128 : vector<2x32xf32>
    %131 = arith.divf %129, %130 : vector<2x32xf32>
    %132 = vector.extract_strided_slice %112 {offsets = [0, 64], sizes = [2, 32], strides = [1, 1]} : vector<2x128xf32> to vector<2x32xf32>
    %133 = vector.extract_strided_slice %115 {offsets = [0, 64], sizes = [2, 32], strides = [1, 1]} : vector<2x128xf32> to vector<2x32xf32>
    %134 = arith.mulf %123, %133 : vector<2x32xf32>
    %135 = arith.addf %132, %134 : vector<2x32xf32>
    %136 = math.tanh %135 : vector<2x32xf32>
    %cst_40 = arith.constant 1.000000e+00 : f32
    %137 = vector.broadcast %cst_40 : f32 to vector<2x32xf32>
    %138 = arith.subf %137, %131 : vector<2x32xf32>
    %139 = arith.mulf %138, %136 : vector<2x32xf32>
    %140 = arith.mulf %131, %111 : vector<2x32xf32>
    %141 = arith.addf %139, %140 : vector<2x32xf32>
    %142 = vector.extract_strided_slice %18 {offsets = [8, 0], sizes = [2, 128], strides = [1, 1]} : vector<16x128xf32> to vector<2x128xf32>
    %cst_41 = arith.constant dense<0.000000e+00> : vector<2x128xf32>
    %143 = tpu.matmul %141, %19, %cst_41 {dimension_numbers = #tpu.dot_dimension_numbers<[1], [0], [0], [1], [0, 0, 1, 1], [], []>} : vector<2x32xf32>, vector<32x128xf32>, vector<2x128xf32> -> vector<2x128xf32>
    %144 = vector.broadcast %20 : vector<1x128xf32> to vector<2x128xf32>
    %145 = arith.addf %143, %144 : vector<2x128xf32>
    %146 = vector.extract_strided_slice %142 {offsets = [0, 0], sizes = [2, 32], strides = [1, 1]} : vector<2x128xf32> to vector<2x32xf32>
    %147 = vector.extract_strided_slice %145 {offsets = [0, 0], sizes = [2, 32], strides = [1, 1]} : vector<2x128xf32> to vector<2x32xf32>
    %148 = arith.addf %146, %147 : vector<2x32xf32>
    %149 = arith.negf %148 : vector<2x32xf32>
    %150 = math.exp %149 : vector<2x32xf32>
    %cst_42 = arith.constant 1.000000e+00 : f32
    %151 = vector.broadcast %cst_42 : f32 to vector<2x32xf32>
    %152 = arith.addf %151, %150 : vector<2x32xf32>
    %153 = arith.divf %151, %152 : vector<2x32xf32>
    %154 = vector.extract_strided_slice %142 {offsets = [0, 32], sizes = [2, 32], strides = [1, 1]} : vector<2x128xf32> to vector<2x32xf32>
    %155 = vector.extract_strided_slice %145 {offsets = [0, 32], sizes = [2, 32], strides = [1, 1]} : vector<2x128xf32> to vector<2x32xf32>
    %156 = arith.addf %154, %155 : vector<2x32xf32>
    %157 = arith.negf %156 : vector<2x32xf32>
    %158 = math.exp %157 : vector<2x32xf32>
    %cst_43 = arith.constant 1.000000e+00 : f32
    %159 = vector.broadcast %cst_43 : f32 to vector<2x32xf32>
    %160 = arith.addf %159, %158 : vector<2x32xf32>
    %161 = arith.divf %159, %160 : vector<2x32xf32>
    %162 = vector.extract_strided_slice %142 {offsets = [0, 64], sizes = [2, 32], strides = [1, 1]} : vector<2x128xf32> to vector<2x32xf32>
    %163 = vector.extract_strided_slice %145 {offsets = [0, 64], sizes = [2, 32], strides = [1, 1]} : vector<2x128xf32> to vector<2x32xf32>
    %164 = arith.mulf %153, %163 : vector<2x32xf32>
    %165 = arith.addf %162, %164 : vector<2x32xf32>
    %166 = math.tanh %165 : vector<2x32xf32>
    %cst_44 = arith.constant 1.000000e+00 : f32
    %167 = vector.broadcast %cst_44 : f32 to vector<2x32xf32>
    %168 = arith.subf %167, %161 : vector<2x32xf32>
    %169 = arith.mulf %168, %166 : vector<2x32xf32>
    %170 = arith.mulf %161, %141 : vector<2x32xf32>
    %171 = arith.addf %169, %170 : vector<2x32xf32>
    %172 = vector.extract_strided_slice %18 {offsets = [10, 0], sizes = [2, 128], strides = [1, 1]} : vector<16x128xf32> to vector<2x128xf32>
    %cst_45 = arith.constant dense<0.000000e+00> : vector<2x128xf32>
    %173 = tpu.matmul %171, %19, %cst_45 {dimension_numbers = #tpu.dot_dimension_numbers<[1], [0], [0], [1], [0, 0, 1, 1], [], []>} : vector<2x32xf32>, vector<32x128xf32>, vector<2x128xf32> -> vector<2x128xf32>
    %174 = vector.broadcast %20 : vector<1x128xf32> to vector<2x128xf32>
    %175 = arith.addf %173, %174 : vector<2x128xf32>
    %176 = vector.extract_strided_slice %172 {offsets = [0, 0], sizes = [2, 32], strides = [1, 1]} : vector<2x128xf32> to vector<2x32xf32>
    %177 = vector.extract_strided_slice %175 {offsets = [0, 0], sizes = [2, 32], strides = [1, 1]} : vector<2x128xf32> to vector<2x32xf32>
    %178 = arith.addf %176, %177 : vector<2x32xf32>
    %179 = arith.negf %178 : vector<2x32xf32>
    %180 = math.exp %179 : vector<2x32xf32>
    %cst_46 = arith.constant 1.000000e+00 : f32
    %181 = vector.broadcast %cst_46 : f32 to vector<2x32xf32>
    %182 = arith.addf %181, %180 : vector<2x32xf32>
    %183 = arith.divf %181, %182 : vector<2x32xf32>
    %184 = vector.extract_strided_slice %172 {offsets = [0, 32], sizes = [2, 32], strides = [1, 1]} : vector<2x128xf32> to vector<2x32xf32>
    %185 = vector.extract_strided_slice %175 {offsets = [0, 32], sizes = [2, 32], strides = [1, 1]} : vector<2x128xf32> to vector<2x32xf32>
    %186 = arith.addf %184, %185 : vector<2x32xf32>
    %187 = arith.negf %186 : vector<2x32xf32>
    %188 = math.exp %187 : vector<2x32xf32>
    %cst_47 = arith.constant 1.000000e+00 : f32
    %189 = vector.broadcast %cst_47 : f32 to vector<2x32xf32>
    %190 = arith.addf %189, %188 : vector<2x32xf32>
    %191 = arith.divf %189, %190 : vector<2x32xf32>
    %192 = vector.extract_strided_slice %172 {offsets = [0, 64], sizes = [2, 32], strides = [1, 1]} : vector<2x128xf32> to vector<2x32xf32>
    %193 = vector.extract_strided_slice %175 {offsets = [0, 64], sizes = [2, 32], strides = [1, 1]} : vector<2x128xf32> to vector<2x32xf32>
    %194 = arith.mulf %183, %193 : vector<2x32xf32>
    %195 = arith.addf %192, %194 : vector<2x32xf32>
    %196 = math.tanh %195 : vector<2x32xf32>
    %cst_48 = arith.constant 1.000000e+00 : f32
    %197 = vector.broadcast %cst_48 : f32 to vector<2x32xf32>
    %198 = arith.subf %197, %191 : vector<2x32xf32>
    %199 = arith.mulf %198, %196 : vector<2x32xf32>
    %200 = arith.mulf %191, %171 : vector<2x32xf32>
    %201 = arith.addf %199, %200 : vector<2x32xf32>
    %202 = vector.extract_strided_slice %18 {offsets = [12, 0], sizes = [2, 128], strides = [1, 1]} : vector<16x128xf32> to vector<2x128xf32>
    %cst_49 = arith.constant dense<0.000000e+00> : vector<2x128xf32>
    %203 = tpu.matmul %201, %19, %cst_49 {dimension_numbers = #tpu.dot_dimension_numbers<[1], [0], [0], [1], [0, 0, 1, 1], [], []>} : vector<2x32xf32>, vector<32x128xf32>, vector<2x128xf32> -> vector<2x128xf32>
    %204 = vector.broadcast %20 : vector<1x128xf32> to vector<2x128xf32>
    %205 = arith.addf %203, %204 : vector<2x128xf32>
    %206 = vector.extract_strided_slice %202 {offsets = [0, 0], sizes = [2, 32], strides = [1, 1]} : vector<2x128xf32> to vector<2x32xf32>
    %207 = vector.extract_strided_slice %205 {offsets = [0, 0], sizes = [2, 32], strides = [1, 1]} : vector<2x128xf32> to vector<2x32xf32>
    %208 = arith.addf %206, %207 : vector<2x32xf32>
    %209 = arith.negf %208 : vector<2x32xf32>
    %210 = math.exp %209 : vector<2x32xf32>
    %cst_50 = arith.constant 1.000000e+00 : f32
    %211 = vector.broadcast %cst_50 : f32 to vector<2x32xf32>
    %212 = arith.addf %211, %210 : vector<2x32xf32>
    %213 = arith.divf %211, %212 : vector<2x32xf32>
    %214 = vector.extract_strided_slice %202 {offsets = [0, 32], sizes = [2, 32], strides = [1, 1]} : vector<2x128xf32> to vector<2x32xf32>
    %215 = vector.extract_strided_slice %205 {offsets = [0, 32], sizes = [2, 32], strides = [1, 1]} : vector<2x128xf32> to vector<2x32xf32>
    %216 = arith.addf %214, %215 : vector<2x32xf32>
    %217 = arith.negf %216 : vector<2x32xf32>
    %218 = math.exp %217 : vector<2x32xf32>
    %cst_51 = arith.constant 1.000000e+00 : f32
    %219 = vector.broadcast %cst_51 : f32 to vector<2x32xf32>
    %220 = arith.addf %219, %218 : vector<2x32xf32>
    %221 = arith.divf %219, %220 : vector<2x32xf32>
    %222 = vector.extract_strided_slice %202 {offsets = [0, 64], sizes = [2, 32], strides = [1, 1]} : vector<2x128xf32> to vector<2x32xf32>
    %223 = vector.extract_strided_slice %205 {offsets = [0, 64], sizes = [2, 32], strides = [1, 1]} : vector<2x128xf32> to vector<2x32xf32>
    %224 = arith.mulf %213, %223 : vector<2x32xf32>
    %225 = arith.addf %222, %224 : vector<2x32xf32>
    %226 = math.tanh %225 : vector<2x32xf32>
    %cst_52 = arith.constant 1.000000e+00 : f32
    %227 = vector.broadcast %cst_52 : f32 to vector<2x32xf32>
    %228 = arith.subf %227, %221 : vector<2x32xf32>
    %229 = arith.mulf %228, %226 : vector<2x32xf32>
    %230 = arith.mulf %221, %201 : vector<2x32xf32>
    %231 = arith.addf %229, %230 : vector<2x32xf32>
    %232 = vector.extract_strided_slice %18 {offsets = [14, 0], sizes = [2, 128], strides = [1, 1]} : vector<16x128xf32> to vector<2x128xf32>
    %cst_53 = arith.constant dense<0.000000e+00> : vector<2x128xf32>
    %233 = tpu.matmul %231, %19, %cst_53 {dimension_numbers = #tpu.dot_dimension_numbers<[1], [0], [0], [1], [0, 0, 1, 1], [], []>} : vector<2x32xf32>, vector<32x128xf32>, vector<2x128xf32> -> vector<2x128xf32>
    %234 = vector.broadcast %20 : vector<1x128xf32> to vector<2x128xf32>
    %235 = arith.addf %233, %234 : vector<2x128xf32>
    %236 = vector.extract_strided_slice %232 {offsets = [0, 0], sizes = [2, 32], strides = [1, 1]} : vector<2x128xf32> to vector<2x32xf32>
    %237 = vector.extract_strided_slice %235 {offsets = [0, 0], sizes = [2, 32], strides = [1, 1]} : vector<2x128xf32> to vector<2x32xf32>
    %238 = arith.addf %236, %237 : vector<2x32xf32>
    %239 = arith.negf %238 : vector<2x32xf32>
    %240 = math.exp %239 : vector<2x32xf32>
    %cst_54 = arith.constant 1.000000e+00 : f32
    %241 = vector.broadcast %cst_54 : f32 to vector<2x32xf32>
    %242 = arith.addf %241, %240 : vector<2x32xf32>
    %243 = arith.divf %241, %242 : vector<2x32xf32>
    %244 = vector.extract_strided_slice %232 {offsets = [0, 32], sizes = [2, 32], strides = [1, 1]} : vector<2x128xf32> to vector<2x32xf32>
    %245 = vector.extract_strided_slice %235 {offsets = [0, 32], sizes = [2, 32], strides = [1, 1]} : vector<2x128xf32> to vector<2x32xf32>
    %246 = arith.addf %244, %245 : vector<2x32xf32>
    %247 = arith.negf %246 : vector<2x32xf32>
    %248 = math.exp %247 : vector<2x32xf32>
    %cst_55 = arith.constant 1.000000e+00 : f32
    %249 = vector.broadcast %cst_55 : f32 to vector<2x32xf32>
    %250 = arith.addf %249, %248 : vector<2x32xf32>
    %251 = arith.divf %249, %250 : vector<2x32xf32>
    %252 = vector.extract_strided_slice %232 {offsets = [0, 64], sizes = [2, 32], strides = [1, 1]} : vector<2x128xf32> to vector<2x32xf32>
    %253 = vector.extract_strided_slice %235 {offsets = [0, 64], sizes = [2, 32], strides = [1, 1]} : vector<2x128xf32> to vector<2x32xf32>
    %254 = arith.mulf %243, %253 : vector<2x32xf32>
    %255 = arith.addf %252, %254 : vector<2x32xf32>
    %256 = math.tanh %255 : vector<2x32xf32>
    %cst_56 = arith.constant 1.000000e+00 : f32
    %257 = vector.broadcast %cst_56 : f32 to vector<2x32xf32>
    %258 = arith.subf %257, %251 : vector<2x32xf32>
    %259 = arith.mulf %258, %256 : vector<2x32xf32>
    %260 = arith.mulf %251, %231 : vector<2x32xf32>
    %261 = arith.addf %259, %260 : vector<2x32xf32>
    %c0_57 = arith.constant 0 : index
    %c0_58 = arith.constant 0 : index
    %262 = vector.load %arg19[%c0_57, %c0_58] : memref<2x32xf32, #tpu.memory_space<vmem>>, vector<2x32xf32>
    tpu.vector_store %arg19[%c0_57, %c0_58], %261 {strides = array<i32>} : memref<2x32xf32, #tpu.memory_space<vmem>>, vector<2x32xf32>,
    %cst_59 = arith.constant 0.000000e+00 : f32
    %263 = vector.broadcast %cst_59 : f32 to vector<2x32xf32>
    %264 = arith.maximumf %261, %263 : vector<2x32xf32>
    %c0_60 = arith.constant 0 : index
    %c0_61 = arith.constant 0 : index
    %265 = vector.load %arg12[%c0_60, %c0_61] : memref<32x32xf32, #tpu.memory_space<vmem>>, vector<32x32xf32>
    %cst_62 = arith.constant dense<0.000000e+00> : vector<2x32xf32>
    %266 = tpu.matmul %264, %265, %cst_62 {dimension_numbers = #tpu.dot_dimension_numbers<[1], [0], [0], [1], [0, 0, 1, 1], [], []>} : vector<2x32xf32>, vector<32x32xf32>, vector<2x32xf32> -> vector<2x32xf32>
    %c0_63 = arith.constant 0 : index
    %c0_64 = arith.constant 0 : index
    %267 = vector.load %arg13[%c0_63, %c0_64] : memref<1x32xf32, #tpu.memory_space<vmem>>, vector<1x32xf32>
    %268 = vector.broadcast %267 : vector<1x32xf32> to vector<2x32xf32>
    %269 = arith.addf %266, %268 : vector<2x32xf32>
    %cst_65 = arith.constant 0.000000e+00 : f32
    %270 = vector.broadcast %cst_65 : f32 to vector<2x32xf32>
    %271 = arith.maximumf %269, %270 : vector<2x32xf32>
    %c0_66 = arith.constant 0 : index
    %c0_67 = arith.constant 0 : index
    %272 = vector.load %arg14[%c0_66, %c0_67] : memref<32x32xf32, #tpu.memory_space<vmem>>, vector<32x32xf32>
    %cst_68 = arith.constant dense<0.000000e+00> : vector<2x32xf32>
    %273 = tpu.matmul %271, %272, %cst_68 {dimension_numbers = #tpu.dot_dimension_numbers<[1], [0], [0], [1], [0, 0, 1, 1], [], []>} : vector<2x32xf32>, vector<32x32xf32>, vector<2x32xf32> -> vector<2x32xf32>
    %c0_69 = arith.constant 0 : index
    %c0_70 = arith.constant 0 : index
    %274 = vector.load %arg15[%c0_69, %c0_70] : memref<1x32xf32, #tpu.memory_space<vmem>>, vector<1x32xf32>
    %275 = vector.broadcast %274 : vector<1x32xf32> to vector<2x32xf32>
    %276 = arith.addf %273, %275 : vector<2x32xf32>
    %cst_71 = arith.constant 0.000000e+00 : f32
    %277 = vector.broadcast %cst_71 : f32 to vector<2x32xf32>
    %278 = arith.maximumf %276, %277 : vector<2x32xf32>
    %c0_72 = arith.constant 0 : index
    %c0_73 = arith.constant 0 : index
    %279 = vector.load %arg16[%c0_72, %c0_73] : memref<32x4xf32, #tpu.memory_space<vmem>>, vector<32x4xf32>
    %cst_74 = arith.constant dense<0.000000e+00> : vector<2x4xf32>
    %280 = tpu.matmul %278, %279, %cst_74 {dimension_numbers = #tpu.dot_dimension_numbers<[1], [0], [0], [1], [0, 0, 1, 1], [], []>} : vector<2x32xf32>, vector<32x4xf32>, vector<2x4xf32> -> vector<2x4xf32>
    %c0_75 = arith.constant 0 : index
    %c0_76 = arith.constant 0 : index
    %281 = vector.load %arg17[%c0_75, %c0_76] : memref<1x4xf32, #tpu.memory_space<vmem>>, vector<1x4xf32>
    %282 = vector.broadcast %281 : vector<1x4xf32> to vector<2x4xf32>
    %283 = arith.addf %280, %282 : vector<2x4xf32>
    %c0_77 = arith.constant 0 : index
    %c0_78 = arith.constant 0 : index
    %284 = vector.load %arg18[%c0_77, %c0_78] : memref<2x4xf32, #tpu.memory_space<vmem>>, vector<2x4xf32>
    tpu.vector_store %arg18[%c0_77, %c0_78], %283 {strides = array<i32>} : memref<2x4xf32, #tpu.memory_space<vmem>>, vector<2x4xf32>,
    return
  }
  func.func @transform_0(%arg0: i32) -> (i32, i32) {
    %c0_i32 = arith.constant 0 : i32
    %c0_i32_0 = arith.constant 0 : i32
    %c0_i32_1 = arith.constant 0 : i32
    return %c0_i32, %c0_i32_0 : i32, i32
  }
  func.func @transform_1(%arg0: i32) -> (i32, i32) {
    %c0_i32 = arith.constant 0 : i32
    %c0_i32_0 = arith.constant 0 : i32
    %c0_i32_1 = arith.constant 0 : i32
    return %c0_i32, %c0_i32_0 : i32, i32
  }
  func.func @transform_2(%arg0: i32) -> (i32, i32) {
    %c0_i32 = arith.constant 0 : i32
    %c0_i32_0 = arith.constant 0 : i32
    %c0_i32_1 = arith.constant 0 : i32
    return %c0_i32, %c0_i32_0 : i32, i32
  }
  func.func @transform_3(%arg0: i32) -> (i32, i32) {
    %c0_i32 = arith.constant 0 : i32
    %c0_i32_0 = arith.constant 0 : i32
    %c0_i32_1 = arith.constant 0 : i32
    return %c0_i32, %c0_i32_0 : i32, i32
  }
  func.func @transform_4(%arg0: i32) -> (i32, i32) {
    %c0_i32 = arith.constant 0 : i32
    %c0_i32_0 = arith.constant 0 : i32
    %c0_i32_1 = arith.constant 0 : i32
    return %c0_i32, %c0_i32_0 : i32, i32
  }
  func.func @transform_5(%arg0: i32) -> (i32, i32) {
    %c0_i32 = arith.constant 0 : i32
    %c0_i32_0 = arith.constant 0 : i32
    %c0_i32_1 = arith.constant 0 : i32
    return %c0_i32, %c0_i32_0 : i32, i32
  }
  func.func @transform_6(%arg0: i32) -> (i32, i32) {
    %c0_i32 = arith.constant 0 : i32
    %c0_i32_0 = arith.constant 0 : i32
    %c0_i32_1 = arith.constant 0 : i32
    return %c0_i32, %c0_i32_0 : i32, i32
  }
  func.func @transform_7(%arg0: i32) -> (i32, i32) {
    %c0_i32 = arith.constant 0 : i32
    %c0_i32_0 = arith.constant 0 : i32
    %c0_i32_1 = arith.constant 0 : i32
    return %c0_i32, %c0_i32_0 : i32, i32
  }
  func.func @transform_8(%arg0: i32) -> (i32, i32) {
    %c0_i32 = arith.constant 0 : i32
    %c0_i32_0 = arith.constant 0 : i32
    %c0_i32_1 = arith.constant 0 : i32
    return %c0_i32, %c0_i32_0 : i32, i32
  }
  func.func @transform_9(%arg0: i32) -> (i32, i32) {
    %c0_i32 = arith.constant 0 : i32
    %c0_i32_0 = arith.constant 0 : i32
    %c0_i32_1 = arith.constant 0 : i32
    return %c0_i32, %c0_i32_0 : i32, i32
  }
  func.func @transform_10(%arg0: i32) -> (i32, i32) {
    %c0_i32 = arith.constant 0 : i32
    %c0_i32_0 = arith.constant 0 : i32
    %c0_i32_1 = arith.constant 0 : i32
    return %c0_i32, %c0_i32_0 : i32, i32
  }
  func.func @transform_11(%arg0: i32) -> (i32, i32) {
    %c0_i32 = arith.constant 0 : i32
    %c0_i32_0 = arith.constant 0 : i32
    %c0_i32_1 = arith.constant 0 : i32
    return %c0_i32, %c0_i32_0 : i32, i32
  }
  func.func @transform_12(%arg0: i32) -> (i32, i32) {
    %c0_i32 = arith.constant 0 : i32
    %c0_i32_0 = arith.constant 0 : i32
    %c0_i32_1 = arith.constant 0 : i32
    return %c0_i32, %c0_i32_0 : i32, i32
  }
  func.func @transform_13(%arg0: i32) -> (i32, i32) {
    %c0_i32 = arith.constant 0 : i32
    %c0_i32_0 = arith.constant 0 : i32
    %c0_i32_1 = arith.constant 0 : i32
    return %c0_i32, %c0_i32_0 : i32, i32
  }
  func.func @transform_14(%arg0: i32) -> (i32, i32) {
    %c0_i32 = arith.constant 0 : i32
    %c0_i32_0 = arith.constant 0 : i32
    %c0_i32_1 = arith.constant 0 : i32
    return %c0_i32, %c0_i32_0 : i32, i32
  }
  func.func @transform_15(%arg0: i32) -> (i32, i32) {
    %c0_i32 = arith.constant 0 : i32
    %c0_i32_0 = arith.constant 0 : i32
    %c0_i32_1 = arith.constant 0 : i32
    return %c0_i32, %c0_i32_0 : i32, i32
  }
  func.func @transform_16(%arg0: i32) -> (i32, i32) {
    %c0_i32 = arith.constant 0 : i32
    %c0_i32_0 = arith.constant 0 : i32
    %c0_i32_1 = arith.constant 0 : i32
    return %c0_i32, %c0_i32_0 : i32, i32
  }
  func.func @transform_17(%arg0: i32) -> (i32, i32) {
    %c0_i32 = arith.constant 0 : i32
    %c0_i32_0 = arith.constant 0 : i32
    %c0_i32_1 = arith.constant 0 : i32
    return %c0_i32, %c0_i32_0 : i32, i32
  }
  func.func @transform_18(%arg0: i32) -> (i32, i32) {
    %c0_i32 = arith.constant 0 : i32
    %c0_i32_0 = arith.constant 0 : i32
    %c0_i32_1 = arith.constant 0 : i32
    return %c0_i32, %c0_i32_0 : i32, i32
  }
}

</mosaic_0001>

<bundles_post_ra>
// kernel: forgetful_ann_forward.1
= control target key start
LH: loop header
LB: loop body
LE: loop exit
PB: predicated region body
PF: predicated region fallthrough
CT: control target
= control target key end

     0   :  { %s13505_s0 = inlined_call_operand.vmem [shape: bf16[4096,36], index: 0, kind: input, shape index: {}]   ;;  %s13506_s1 = inlined_call_operand.vmem [shape: bf16[36,16], index: 1, kind: input, shape index: {}]   ;;  %s13507_s2 = inlined_call_operand.vmem [shape: f32[1,16], index: 2, kind: input, shape index: {}]   ;;  %s13508_s3 = inlined_call_operand.vmem [shape: f32[16,4096], index: 3, kind: input, shape index: {}]   ;;  %s13509_s4 = inlined_call_operand.vmem [shape: f32[16,128], index: 4, kind: input, shape index: {}]   ;;  %s13510_s5 = inlined_call_operand.vmem [shape: f32[1,128], index: 5, kind: input, shape index: {}]   ;;  %s13511_s6 = inlined_call_operand.vmem [shape: f32[16,8], index: 6, kind: input, shape index: {}]   ;;  %s13512_s7 = inlined_call_operand.vmem [shape: f32[8,128], index: 7, kind: input, shape index: {}]   ;;  %s13513_s8 = inlined_call_operand.vmem [shape: f32[2,32], index: 8, kind: input, shape index: {}]   ;;  %s13514_s9 = inlined_call_operand.vmem [shape: f32[32,128], index: 9, kind: input, shape index: {}]   ;;  %s13515_s10 = inlined_call_operand.vmem [shape: f32[1,128], index: 10, kind: input, shape index: {}]   ;;  %s13516_s11 = inlined_call_operand.vmem [shape: f32[32,32], index: 11, kind: input, shape index: {}]   ;;  %s13517_s12 = inlined_call_operand.vmem [shape: f32[1,32], index: 12, kind: input, shape index: {}]   ;;  %s13518_s13 = inlined_call_operand.vmem [shape: f32[32,32], index: 13, kind: input, shape index: {}]   ;;  %s13519_s14 = inlined_call_operand.vmem [shape: f32[1,32], index: 14, kind: input, shape index: {}]   ;;  %s13520_s15 = inlined_call_operand.vmem [shape: f32[32,4], index: 15, kind: input, shape index: {}]   ;;  %s13521_s16 = inlined_call_operand.vmem [shape: f32[1,4], index: 16, kind: input, shape index: {}]   ;;  %s13522_s17 = inlined_call_operand.hbm [shape: f32[2,4], index: 17, kind: output, shape index: {0}]   ;;  %s13523_s18 = inlined_call_operand.hbm [shape: f32[2,32], index: 18, kind: output, shape index: {1}]  }
   0x1   :  { %13527 = sst [smem:[#allocation33_spill]] %s13505_s0 }
   0x2   :  { %13528 = sst [smem:[#allocation34_spill]] %s13506_s1 }
   0x3   :  { %13529 = sst [smem:[#allocation35_spill]] %s13507_s2 }
   0x4   :  { %24 = vsyncpa [#allocation3], 0  ;;  %s13530_s29 = sld [smem:[#allocation34_spill]]  ;;  %vm1880_vm0 = vcmask 293888   ;;  %s13531_s22 = sld [smem:[#allocation33_spill]]  ;;  %vm2649_vm1 = vcmask 1041408  }
   0xa   :  { %v10558_v0 = vld [vmem:[%s13530_s29] sm:$0xff]   ;;  %v10559_v1 = vld [vmem:[%s13530_s29 + $0x8] sm:$0xff]   ;;  %v10560_v2 = vld [vmem:[%s13530_s29 + $0x10] ss:$0 sps:$4 sm:$0x33]  }
   0xb   :  { %9307 = vmatprep.subr.bf16.mxu0 %v10558_v0  ;;  %v10561_v3 = vld [vmem:[%s13531_s22] sm:$0xff]   ;;  %10540 = vmatprep.subr.bf16.mxu1 %v10558_v0  ;;  %v2651_v4 = vsel %vm2649_vm1, %v10560_v2, 0  ;;  %v10562_v5 = vld [vmem:[%s13531_s22 + $0x8] sm:$0xff]   ;;  %v10563_v6 = vld [vmem:[%s13531_s22 + $0x10] sm:$0xff]  }
   0xc   :  { %9308 = vmatpush3.bf16.msra.mxu0 %v10558_v0  ;;  %10543 = vmatpush3.bf16.msra.mxu1 %v10558_v0  ;;  %v10564_v7 = vld [vmem:[%s13531_s22 + $0x18] sm:$0xff]   ;;  %v10565_v8 = vld [vmem:[%s13531_s22 + $0x20] sm:$0xff]   ;;  %v10566_v9 = vld [vmem:[%s13531_s22 + $0x28] sm:$0xff]  }
   0xd   :  { %9309 = vmatprep.subr.bf16.mxu0 %v10559_v1  ;;  %9313 = vmatprep.mubr.msk.bf16.mxu0 %vm1880_vm0, %v10561_v3  ;;  %v10567_v10 = vld [vmem:[%s13531_s22 + $0x30] sm:$0xff]   ;;  %v10588_v12 = vld [vmem:[%s13531_s22 + $0x658] sm:$0xff]   ;;  %v10591_v13 = vld [vmem:[%s13531_s22 + $0x660] sm:$0xff]  }
   0xe   :  { %10541 = vmatprep.subr.bf16.mxu1 %v10559_v1  ;;  %v10587_v11 = vld [vmem:[%s13531_s22 + $0x650] sm:$0xff]   ;;  %v10568_v14 = vld [vmem:[%s13531_s22 + $0x38] sm:$0xff]   ;;  %v10569_v15 = vld [vmem:[%s13531_s22 + $0x40] sm:$0xff]  }
   0xf   :  { %9717 = vmatprep.mubr.msk.bf16.mxu1 %vm1880_vm0, %v10587_v11  ;;  %v10592_v16 = vld [vmem:[%s13531_s22 + $0x668] sm:$0xff]   ;;  %v10595_v17 = vld [vmem:[%s13531_s22 + $0x670] sm:$0xff]   ;;  %v10596_v20 = vld [vmem:[%s13531_s22 + $0x678] sm:$0xff]  }
  0x10   :  { %9310 = vmatpush3.bf16.msra.mxu0 %v10559_v1  ;;  %10544 = vmatpush3.bf16.msra.mxu1 %v10559_v1  ;;  %v10570_v18 = vld [vmem:[%s13531_s22 + $0x48] sm:$0xff]   ;;  %v10571_v19 = vld [vmem:[%s13531_s22 + $0x50] sm:$0xff]   ;;  %v10599_v21 = vld [vmem:[%s13531_s22 + $0x680] sm:$0xff]  }
  0x11   :  { %10548 = vmatprep.subr.msk.bf16.mxu0 %vm2649_vm1, %v10560_v2  ;;  %10549 = vmatprep.subr.msk.bf16.mxu1 %vm2649_vm1, %v10560_v2  ;;  %v10572_v22 = vld [vmem:[%s13531_s22 + $0x58] sm:$0xff]   ;;  %v10573_v23 = vld [vmem:[%s13531_s22 + $0x60] sm:$0xff]   ;;  %v10600_v24 = vld [vmem:[%s13531_s22 + $0x688] sm:$0xff]  }
  0x12   :  { %v10603_v25 = vld [vmem:[%s13531_s22 + $0x690] sm:$0xff]   ;;  %v10574_v26 = vld [vmem:[%s13531_s22 + $0x68] sm:$0xff]   ;;  %v10604_v28 = vld [vmem:[%s13531_s22 + $0x698] sm:$0xff]  }
  0x13   :  { %v10575_v27 = vld [vmem:[%s13531_s22 + $0x70] sm:$0xff]   ;;  %v10607_v29 = vld [vmem:[%s13531_s22 + $0x6a0] sm:$0xff]   ;;  %v10576_v30 = vld [vmem:[%s13531_s22 + $0x78] sm:$0xff]  }
  0x14   :  { %9312 = vmatpush3.bf16.msra.mxu0 %v2651_v4  ;;  %10545 = vmatpush3.bf16.msra.mxu1 %v2651_v4  ;;  %v10577_v31 = vld [vmem:[%s13531_s22 + $0x80] sm:$0xff]   ;;  %v10608_v32 = vld [vmem:[%s13531_s22 + $0x6a8] sm:$0xff]   ;;  %v10611_v33 = vld [vmem:[%s13531_s22 + $0x6b0] sm:$0xff]  }
  0x15   :  { %v10578_v34 = vld [vmem:[%s13531_s22 + $0x88] sm:$0xff]   ;;  %v10579_v35 = vld [vmem:[%s13531_s22 + $0x90] sm:$0xff]   ;;  %v10612_v36 = vld [vmem:[%s13531_s22 + $0x6b8] sm:$0xff]  }
  0x16   :  { %v10615_v37 = vld [vmem:[%s13531_s22 + $0x6c0] sm:$0xff]   ;;  %v10580_v38 = vld [vmem:[%s13531_s22 + $0x98] sm:$0xff]   ;;  %v10616_v40 = vld [vmem:[%s13531_s22 + $0x6c8] sm:$0xff]  }
  0x17   :  { %9314 = vmatmul.mubr.msk.bf16.vlgmr.msra.gmra.mrb[0].mxu0 %vm1880_vm0, %v10562_v5  ;;  %9718 = vmatmul.mubr.msk.bf16.vlgmr.msra.gmra.mrb[0].mxu1 %vm1880_vm0, %v10588_v12  ;;  %v10581_v39 = vld [vmem:[%s13531_s22 + $0xa0] sm:$0xff]   ;;  %v10619_v41 = vld [vmem:[%s13531_s22 + $0x6d0] sm:$0xff]   ;;  %v10582_v42 = vld [vmem:[%s13531_s22 + $0xa8] sm:$0xff]  }
  0x18   :  { %9317 = vmatprep.mubr.msk.bf16.mxu0 %vm1880_vm0, %v10563_v6  ;;  %9721 = vmatprep.mubr.msk.bf16.mxu1 %vm1880_vm0, %v10591_v13  ;;  %v10583_v43 = vld [vmem:[%s13531_s22 + $0xb0] sm:$0xff]   ;;  %v10620_v44 = vld [vmem:[%s13531_s22 + $0x6d8] sm:$0xff]   ;;  %v10623_v45 = vld [vmem:[%s13531_s22 + $0x6e0] sm:$0xff]  }
  0x19   :  { %v10584_v46 = vld [vmem:[%s13531_s22 + $0xb8] sm:$0xff]   ;;  %v10585_v47 = vld [vmem:[%s13531_s22 + $0xc0] sm:$0xff]   ;;  %v10624_v48 = vld [vmem:[%s13531_s22 + $0x6e8] sm:$0xff]  }
  0x1a   :  { %v10627_v49 = vld [vmem:[%s13531_s22 + $0x6f0] sm:$0xff]   ;;  %v10586_v50 = vld [vmem:[%s13531_s22 + $0xc8] sm:$0xff]   ;;  %v10628_v52 = vld [vmem:[%s13531_s22 + $0x6f8] sm:$0xff]  }
  0x1b   :  { %v10589_v51 = vld [vmem:[%s13531_s22 + $0xd0] sm:$0xff]   ;;  %v10631_v53 = vld [vmem:[%s13531_s22 + $0x700] sm:$0xff]   ;;  %v10590_v54 = vld [vmem:[%s13531_s22 + $0xd8] sm:$0xff]  }
  0x1c   :  { %v10593_v55 = vld [vmem:[%s13531_s22 + $0xe0] sm:$0xff]   ;;  %v10632_v56 = vld [vmem:[%s13531_s22 + $0x708] sm:$0xff]   ;;  %v10635_v57 = vld [vmem:[%s13531_s22 + $0x710] sm:$0xff]  }
  0x1d   :  { %v10594_v58 = vld [vmem:[%s13531_s22 + $0xe8] sm:$0xff]   ;;  %v10597_v59 = vld [vmem:[%s13531_s22 + $0xf0] sm:$0xff]   ;;  %v10636_v60 = vld [vmem:[%s13531_s22 + $0x718] sm:$0xff]  }
  0x1e   :  { %v10639_v61 = vld [vmem:[%s13531_s22 + $0x720] sm:$0xff]   ;;  %v10598_v62 = vld [vmem:[%s13531_s22 + $0xf8] sm:$0xff]   ;;  %v10640_v0 = vld [vmem:[%s13531_s22 + $0x728] sm:$0xff]  }
  0x1f   :  { %9318 = vmatmul.mubr.msk.bf16.gmra.mrb[4].mxu0 %vm1880_vm0, %v10564_v7  ;;  %9722 = vmatmul.mubr.msk.bf16.gmra.mrb[4].mxu1 %vm1880_vm0, %v10592_v16  ;;  %v10601_v63 = vld [vmem:[%s13531_s22 + $0x100] sm:$0xff]   ;;  %v10643_v1 = vld [vmem:[%s13531_s22 + $0x730] sm:$0xff]   ;;  %v10602_v2 = vld [vmem:[%s13531_s22 + $0x108] sm:$0xff]  }
  0x20   :  { %9321 = vmatprep.mubr.msk.bf16.mxu0 %vm1880_vm0, %v10565_v8  ;;  %9725 = vmatprep.mubr.msk.bf16.mxu1 %vm1880_vm0, %v10595_v17  ;;  %v10605_v3 = vld [vmem:[%s13531_s22 + $0x110] sm:$0xff]   ;;  %v10644_v4 = vld [vmem:[%s13531_s22 + $0x738] sm:$0xff]   ;;  %v10647_v5 = vld [vmem:[%s13531_s22 + $0x740] sm:$0xff]  }
  0x21   :  { %v10606_v6 = vld [vmem:[%s13531_s22 + $0x118] sm:$0xff]   ;;  %v10609_v7 = vld [vmem:[%s13531_s22 + $0x120] sm:$0xff]   ;;  %v10648_v8 = vld [vmem:[%s13531_s22 + $0x748] sm:$0xff]  }
  0x22   :  { %v10613_v11 = vld [vmem:[%s13531_s22 + $0x130] sm:$0xff]   ;;  %v10652_v12 = vld [vmem:[%s13531_s22 + $0x758] sm:$0xff]   ;;  %v10655_v13 = vld [vmem:[%s13531_s22 + $0x760] sm:$0xff]  }
  0x23   :  { %v10656_v16 = vld [vmem:[%s13531_s22 + $0x768] sm:$0xff]   ;;  %v10659_v17 = vld [vmem:[%s13531_s22 + $0x770] sm:$0xff]  }
  0x27   :  { %9322 = vmatmul.mubr.msk.bf16.gmra.mrb[8].mxu0 %vm1880_vm0, %v10566_v9  ;;  %9726 = vmatmul.mubr.msk.bf16.gmra.mrb[8].mxu1 %vm1880_vm0, %v10596_v20  ;;  %v10651_v9 = vld [vmem:[%s13531_s22 + $0x750] sm:$0xff]   ;;  %v10660_v20 = vld [vmem:[%s13531_s22 + $0x778] sm:$0xff]  }
  0x28   :  { %9325 = vmatprep.mubr.msk.bf16.mxu0 %vm1880_vm0, %v10567_v10  ;;  %9729 = vmatprep.mubr.msk.bf16.mxu1 %vm1880_vm0, %v10599_v21  ;;  %v10610_v10 = vld [vmem:[%s13531_s22 + $0x128] sm:$0xff]   ;;  %v10663_v21 = vld [vmem:[%s13531_s22 + $0x780] sm:$0xff]  }
  0x2f   :  { %9326 = vmatmul.mubr.msk.bf16.gmra.mrb[12].mxu0 %vm1880_vm0, %v10568_v14  ;;  %9730 = vmatmul.mubr.msk.bf16.gmra.mrb[12].mxu1 %vm1880_vm0, %v10600_v24  ;;  %v10614_v14 = vld [vmem:[%s13531_s22 + $0x138] sm:$0xff]   ;;  %v10664_v24 = vld [vmem:[%s13531_s22 + $0x788] sm:$0xff]  }
  0x30   :  { %9329 = vmatprep.mubr.msk.bf16.mxu0 %vm1880_vm0, %v10569_v15  ;;  %9733 = vmatprep.mubr.msk.bf16.mxu1 %vm1880_vm0, %v10603_v25  ;;  %v10617_v15 = vld [vmem:[%s13531_s22 + $0x140] sm:$0xff]   ;;  %v10667_v25 = vld [vmem:[%s13531_s22 + $0x790] sm:$0xff]  }
  0x37   :  { %9330 = vmatmul.mubr.msk.bf16.gmra.mrb[16].mxu0 %vm1880_vm0, %v10570_v18  ;;  %9734 = vmatmul.mubr.msk.bf16.gmra.mrb[16].mxu1 %vm1880_vm0, %v10604_v28  ;;  %v10618_v18 = vld [vmem:[%s13531_s22 + $0x148] sm:$0xff]   ;;  %v10668_v28 = vld [vmem:[%s13531_s22 + $0x798] sm:$0xff]  }
  0x38   :  { %9333 = vmatprep.mubr.msk.bf16.mxu0 %vm1880_vm0, %v10571_v19  ;;  %9737 = vmatprep.mubr.msk.bf16.mxu1 %vm1880_vm0, %v10607_v29  ;;  %v10621_v19 = vld [vmem:[%s13531_s22 + $0x150] sm:$0xff]   ;;  %v10671_v29 = vld [vmem:[%s13531_s22 + $0x7a0] sm:$0xff]  }
  0x3f   :  { %9334 = vmatmul.mubr.msk.bf16.gmra.mrb[20].mxu0 %vm1880_vm0, %v10572_v22  ;;  %9738 = vmatmul.mubr.msk.bf16.gmra.mrb[20].mxu1 %vm1880_vm0, %v10608_v32  ;;  %v10622_v22 = vld [vmem:[%s13531_s22 + $0x158] sm:$0xff]   ;;  %v10672_v32 = vld [vmem:[%s13531_s22 + $0x7a8] sm:$0xff]  }
  0x40   :  { %9337 = vmatprep.mubr.msk.bf16.mxu0 %vm1880_vm0, %v10573_v23  ;;  %9741 = vmatprep.mubr.msk.bf16.mxu1 %vm1880_vm0, %v10611_v33  ;;  %v10625_v23 = vld [vmem:[%s13531_s22 + $0x160] sm:$0xff]   ;;  %v10675_v33 = vld [vmem:[%s13531_s22 + $0x7b0] sm:$0xff]  }
  0x47   :  { %9338 = vmatmul.mubr.msk.bf16.gmra.mrb[24].mxu0 %vm1880_vm0, %v10574_v26  ;;  %9742 = vmatmul.mubr.msk.bf16.gmra.mrb[24].mxu1 %vm1880_vm0, %v10612_v36  ;;  %v10626_v26 = vld [vmem:[%s13531_s22 + $0x168] sm:$0xff]   ;;  %v10676_v36 = vld [vmem:[%s13531_s22 + $0x7b8] sm:$0xff]  }
  0x48   :  { %9341 = vmatprep.mubr.msk.bf16.mxu0 %vm1880_vm0, %v10575_v27  ;;  %9745 = vmatprep.mubr.msk.bf16.mxu1 %vm1880_vm0, %v10615_v37  ;;  %v10629_v27 = vld [vmem:[%s13531_s22 + $0x170] sm:$0xff]   ;;  %v10679_v37 = vld [vmem:[%s13531_s22 + $0x7c0] sm:$0xff]  }
  0x4f   :  { %9342 = vmatmul.mubr.msk.bf16.gmra.mrb[28].mxu0 %vm1880_vm0, %v10576_v30  ;;  %9746 = vmatmul.mubr.msk.bf16.gmra.mrb[28].mxu1 %vm1880_vm0, %v10616_v40  ;;  %v10630_v30 = vld [vmem:[%s13531_s22 + $0x178] sm:$0xff]   ;;  %v10680_v40 = vld [vmem:[%s13531_s22 + $0x7c8] sm:$0xff]  }
  0x50   :  { %9345 = vmatprep.mubr.msk.bf16.mxu0 %vm1880_vm0, %v10577_v31  ;;  %9749 = vmatprep.mubr.msk.bf16.mxu1 %vm1880_vm0, %v10619_v41  ;;  %v10633_v31 = vld [vmem:[%s13531_s22 + $0x180] sm:$0xff]   ;;  %v10683_v41 = vld [vmem:[%s13531_s22 + $0x7d0] sm:$0xff]  }
  0x57   :  { %9346 = vmatmul.mubr.msk.bf16.gmra.mrb[32].mxu0 %vm1880_vm0, %v10578_v34  ;;  %9750 = vmatmul.mubr.msk.bf16.gmra.mrb[32].mxu1 %vm1880_vm0, %v10620_v44  ;;  %v10634_v34 = vld [vmem:[%s13531_s22 + $0x188] sm:$0xff]   ;;  %v10684_v44 = vld [vmem:[%s13531_s22 + $0x7d8] sm:$0xff]  }
  0x58   :  { %9349 = vmatprep.mubr.msk.bf16.mxu0 %vm1880_vm0, %v10579_v35  ;;  %9753 = vmatprep.mubr.msk.bf16.mxu1 %vm1880_vm0, %v10623_v45  ;;  %v10637_v35 = vld [vmem:[%s13531_s22 + $0x190] sm:$0xff]   ;;  %v10687_v45 = vld [vmem:[%s13531_s22 + $0x7e0] sm:$0xff]  }
  0x5f   :  { %9350 = vmatmul.mubr.msk.bf16.gmra.mrb[36].mxu0 %vm1880_vm0, %v10580_v38  ;;  %9754 = vmatmul.mubr.msk.bf16.gmra.mrb[36].mxu1 %vm1880_vm0, %v10624_v48  ;;  %v10638_v38 = vld [vmem:[%s13531_s22 + $0x198] sm:$0xff]  }
  0x60   :  { %9353 = vmatprep.mubr.msk.bf16.mxu0 %vm1880_vm0, %v10581_v39  ;;  %9757 = vmatprep.mubr.msk.bf16.mxu1 %vm1880_vm0, %v10627_v49  ;;  %v10641_v39 = vld [vmem:[%s13531_s22 + $0x1a0] sm:$0xff]  }
  0x67   :  { %9354 = vmatmul.mubr.msk.bf16.gmra.mrb[40].mxu0 %vm1880_vm0, %v10582_v42  ;;  %9758 = vmatmul.mubr.msk.bf16.gmra.mrb[40].mxu1 %vm1880_vm0, %v10628_v52  ;;  %v10642_v42 = vld [vmem:[%s13531_s22 + $0x1a8] sm:$0xff]  }
  0x68   :  { %9357 = vmatprep.mubr.msk.bf16.mxu0 %vm1880_vm0, %v10583_v43  ;;  %9761 = vmatprep.mubr.msk.bf16.mxu1 %vm1880_vm0, %v10631_v53  ;;  %v10645_v43 = vld [vmem:[%s13531_s22 + $0x1b0] sm:$0xff]  }
  0x6f   :  { %9358 = vmatmul.mubr.msk.bf16.gmra.mrb[44].mxu0 %vm1880_vm0, %v10584_v46  ;;  %9762 = vmatmul.mubr.msk.bf16.gmra.mrb[44].mxu1 %vm1880_vm0, %v10632_v56 }
  0x70   :  { %9361 = vmatprep.mubr.msk.bf16.mxu0 %vm1880_vm0, %v10585_v47  ;;  %9765 = vmatprep.mubr.msk.bf16.mxu1 %vm1880_vm0, %v10635_v57 }
  0x77   :  { %9362 = vmatmul.mubr.msk.bf16.gmra.mrb[48].mxu0 %vm1880_vm0, %v10586_v50  ;;  %9766 = vmatmul.mubr.msk.bf16.gmra.mrb[48].mxu1 %vm1880_vm0, %v10636_v60 }
  0x78   :  { %9365 = vmatprep.mubr.msk.bf16.mxu0 %vm1880_vm0, %v10589_v51  ;;  %9769 = vmatprep.mubr.msk.bf16.mxu1 %vm1880_vm0, %v10639_v61 }
  0x7f   :  { %9366 = vmatmul.mubr.msk.bf16.gmra.mrb[52].mxu0 %vm1880_vm0, %v10590_v54  ;;  %9770 = vmatmul.mubr.msk.bf16.gmra.mrb[52].mxu1 %vm1880_vm0, %v10640_v0 }
  0x80   :  { %9369 = vmatprep.mubr.msk.bf16.mxu0 %vm1880_vm0, %v10593_v55  ;;  %9773 = vmatprep.mubr.msk.bf16.mxu1 %vm1880_vm0, %v10643_v1 }
  0x87   :  { %9370 = vmatmul.mubr.msk.bf16.gmra.mrb[56].mxu0 %vm1880_vm0, %v10594_v58  ;;  %9774 = vmatmul.mubr.msk.bf16.gmra.mrb[56].mxu1 %vm1880_vm0, %v10644_v4 }
  0x88   :  { %9373 = vmatprep.mubr.msk.bf16.mxu0 %vm1880_vm0, %v10597_v59  ;;  %9777 = vmatprep.mubr.msk.bf16.mxu1 %vm1880_vm0, %v10647_v5 }
  0x8f   :  { %9374 = vmatmul.mubr.msk.bf16.gmra.mrb[60].mxu0 %vm1880_vm0, %v10598_v62  ;;  %9778 = vmatmul.mubr.msk.bf16.gmra.mrb[60].mxu1 %vm1880_vm0, %v10648_v8 }
  0x90   :  { %9377 = vmatprep.mubr.msk.bf16.mxu0 %vm1880_vm0, %v10601_v63  ;;  %9781 = vmatprep.mubr.msk.bf16.mxu1 %vm1880_vm0, %v10651_v9 }
  0x97   :  { %9378 = vmatmul.mubr.msk.bf16.gmra.mrb[64].mxu0 %vm1880_vm0, %v10602_v2  ;;  %9782 = vmatmul.mubr.msk.bf16.gmra.mrb[64].mxu1 %vm1880_vm0, %v10652_v12 }
  0x98   :  { %9381 = vmatprep.mubr.msk.bf16.mxu0 %vm1880_vm0, %v10605_v3  ;;  %9785 = vmatprep.mubr.msk.bf16.mxu1 %vm1880_vm0, %v10655_v13 }
  0x9f   :  { %9382 = vmatmul.mubr.msk.bf16.gmra.mrb[68].mxu0 %vm1880_vm0, %v10606_v6  ;;  %9786 = vmatmul.mubr.msk.bf16.gmra.mrb[68].mxu1 %vm1880_vm0, %v10656_v16 }
  0xa0   :  { %9385 = vmatprep.mubr.msk.bf16.mxu0 %vm1880_vm0, %v10609_v7  ;;  %9789 = vmatprep.mubr.msk.bf16.mxu1 %vm1880_vm0, %v10659_v17 }
  0xa7   :  { %9386 = vmatmul.mubr.msk.bf16.gmra.mrb[72].mxu0 %vm1880_vm0, %v10610_v10  ;;  %9790 = vmatmul.mubr.msk.bf16.gmra.mrb[72].mxu1 %vm1880_vm0, %v10660_v20 }
  0xa8   :  { %9389 = vmatprep.mubr.msk.bf16.mxu0 %vm1880_vm0, %v10613_v11  ;;  %9793 = vmatprep.mubr.msk.bf16.mxu1 %vm1880_vm0, %v10663_v21 }
  0xaf   :  { %9390 = vmatmul.mubr.msk.bf16.gmra.mrb[76].mxu0 %vm1880_vm0, %v10614_v14  ;;  %9794 = vmatmul.mubr.msk.bf16.gmra.mrb[76].mxu1 %vm1880_vm0, %v10664_v24 }
  0xb0   :  { %9393 = vmatprep.mubr.msk.bf16.mxu0 %vm1880_vm0, %v10617_v15  ;;  %9797 = vmatprep.mubr.msk.bf16.mxu1 %vm1880_vm0, %v10667_v25 }
  0xb7   :  { %9394 = vmatmul.mubr.msk.bf16.gmra.mrb[80].mxu0 %vm1880_vm0, %v10618_v18  ;;  %9798 = vmatmul.mubr.msk.bf16.gmra.mrb[80].mxu1 %vm1880_vm0, %v10668_v28 }
  0xb8   :  { %9397 = vmatprep.mubr.msk.bf16.mxu0 %vm1880_vm0, %v10621_v19  ;;  %9801 = vmatprep.mubr.msk.bf16.mxu1 %vm1880_vm0, %v10671_v29 }
  0xbf   :  { %9398 = vmatmul.mubr.msk.bf16.gmra.mrb[84].mxu0 %vm1880_vm0, %v10622_v22  ;;  %9802 = vmatmul.mubr.msk.bf16.gmra.mrb[84].mxu1 %vm1880_vm0, %v10672_v32 }
  0xc0   :  { %9401 = vmatprep.mubr.msk.bf16.mxu0 %vm1880_vm0, %v10625_v23  ;;  %9805 = vmatprep.mubr.msk.bf16.mxu1 %vm1880_vm0, %v10675_v33 }
  0xc7   :  { %9402 = vmatmul.mubr.msk.bf16.gmra.mrb[88].mxu0 %vm1880_vm0, %v10626_v26  ;;  %9806 = vmatmul.mubr.msk.bf16.gmra.mrb[88].mxu1 %vm1880_vm0, %v10676_v36 }
  0xc8   :  { %9405 = vmatprep.mubr.msk.bf16.mxu0 %vm1880_vm0, %v10629_v27  ;;  %9809 = vmatprep.mubr.msk.bf16.mxu1 %vm1880_vm0, %v10679_v37 }
  0xcf   :  { %9406 = vmatmul.mubr.msk.bf16.gmra.mrb[92].mxu0 %vm1880_vm0, %v10630_v30  ;;  %9810 = vmatmul.mubr.msk.bf16.gmra.mrb[92].mxu1 %vm1880_vm0, %v10680_v40 }
  0xd0   :  { %9409 = vmatprep.mubr.msk.bf16.mxu0 %vm1880_vm0, %v10633_v31  ;;  %9813 = vmatprep.mubr.msk.bf16.mxu1 %vm1880_vm0, %v10683_v41 }
  0xd7   :  { %9410 = vmatmul.mubr.msk.bf16.gmra.mrb[96].mxu0 %vm1880_vm0, %v10634_v34 }
  0xd8   :  { %9413 = vmatprep.mubr.msk.bf16.mxu0 %vm1880_vm0, %v10637_v35 }
  0xdf   :  { %9414 = vmatmul.mubr.msk.bf16.gmra.mrb[100].mxu0 %vm1880_vm0, %v10638_v38 }
  0xe0   :  { %9417 = vmatprep.mubr.msk.bf16.mxu0 %vm1880_vm0, %v10641_v39 }
  0xe1   :  { %25 = vsyncpa [#allocation5], 0  ;;  %s13532_s24 = sld [smem:[#allocation35_spill]]  ;;  %9814 = vmatmul.mubr.msk.bf16.gmra.mrb[96].mxu1 %vm1880_vm0, %v10684_v44  ;;  %v10646_v50 = vld [vmem:[%s13531_s22 + $0x1b8] sm:$0xff]   ;;  %v10649_v53 = vld [vmem:[%s13531_s22 + $0x1c0] sm:$0xff]   ;;  %vm6515_vm2 = vcmask 64512  }
  0xe2   :  { %9817 = vmatprep.mubr.msk.bf16.mxu1 %vm1880_vm0, %v10687_v45  ;;  %v10688_v56 = vld [vmem:[%s13531_s22 + $0x7e8] sm:$0xff]   ;;  %v10691_v58 = vld [vmem:[%s13531_s22 + $0x7f0] sm:$0xff]   ;;  %v10692_v10 = vld [vmem:[%s13531_s22 + $0x7f8] sm:$0xff]   ;;  %vm6597_vm3 = vcmask 130048   ;;  %vm10918_vm4 = vmmov 0   ;;  %vm6700_vm5 = vcmask 261120  }
  0xe3   :  { %v10650_v4 = vld [vmem:[%s13531_s22 + $0x1c8] sm:$0xff]   ;;  %v10653_v7 = vld [vmem:[%s13531_s22 + $0x1d0] sm:$0xff]   ;;  %v10654_v22 = vld [vmem:[%s13531_s22 + $0x1d8] sm:$0xff]   ;;  %s10920_s27 = smov 64   ;;  %vm7544_vm6 = vcmask 261126   ;;  %s10923_s28 = smov [#allocation4]  }
  0xe4   :  { %v5247_v14 = vld [vmem:[%s13508_s3 + $0x8] sm:$0xff]  ;;  %v10657_v25 = vld [vmem:[%s13531_s22 + $0x1e0] sm:$0xff]   ;;  %v10661_v41 = vld [vmem:[%s13531_s22 + $0x1f0] sm:$0xff]  }
  0xe5   :  { %v10658_v38 = vld [vmem:[%s13531_s22 + $0x1e8] sm:$0xff]  }
  0xe7   :  { %9418 = vmatmul.mubr.msk.bf16.gmra.mrb[104].mxu0 %vm1880_vm0, %v10642_v42  ;;  %v11453_v46 = vld [vmem:[%s13532_s24] ss:$0 sm:$0xff] }
  0xe8   :  { %9421 = vmatprep.mubr.msk.bf16.mxu0 %vm1880_vm0, %v10645_v43 }
  0xe9   :  { %9818 = vmatmul.mubr.msk.bf16.gmra.mrb[100].mxu1 %vm1880_vm0, %v10688_v56 }
  0xea   :  { %v9315_v47 = vpop.f32.mrb[0].mxu0  ;;  %9821 = vmatprep.mubr.msk.bf16.mxu1 %vm1880_vm0, %v10691_v58  ;;  %v10665_v58 = vld [vmem:[%s13531_s22 + $0x200] sm:$0xff]  }
  0xeb   :  { %v2696_v48 = vadd.f32 %v9315_v47, %v11453_v46  ;;  %v2687_v49 = vpop.f32.mrb[1].mxu0 }
  0xec   :  { %v2688_v51 = vadd.f32 %v11453_v46, %v2687_v49  ;;  %v9316_v52 = vpop.f32.mrb[2].mxu0 }
  0xed   :  { %v2699_v54 = vadd.f32 %v9316_v52, %v11453_v46  ;;  %v2690_v55 = vpop.f32.mrb[3].mxu0  ;;  %v4736_v59 = vmax.f32 %v2696_v48, 0.0 }
  0xee   :  { %v2691_v57 = vadd.f32 %v11453_v46, %v2690_v55  ;;  %v4734_v61 = vmax.f32 %v2688_v51, 0.0  ;;  %v10662_v55 = vld [vmem:[%s13531_s22 + $0x1f8] sm:$0xff]  }
  0xef   :  { %v4737_v60 = vmax.f32 %v2699_v54, 0.0  ;;  %9422 = vmatmul.mubr.msk.bf16.gmra.mrb[108].mxu0 %vm1880_vm0, %v10646_v50 }
  0xf0   :  { %v4735_v62 = vmax.f32 %v2691_v57, 0.0  ;;  %9425 = vmatprep.mubr.msk.bf16.mxu0 %vm1880_vm0, %v10649_v53 }
  0xf1   :  { %v11476_v63 = vpack.c.bf16 %v4737_v60, %v4736_v59  ;;  %9822 = vmatmul.mubr.msk.bf16.gmra.mrb[104].mxu1 %vm1880_vm0, %v10692_v10 }
  0xf2   :  { %v11479_v0 = vpack.c.bf16 %v4735_v62, %v4734_v61  ;;  %v9319_v1 = vpop.f32.mrb[4].mxu0  ;;  %5374 = vmatprep.mubr.f32.mxu1 %v5247_v14 }
  0xf3   :  { %v2712_v2 = vadd.f32 %v9319_v1, %v11453_v46  ;;  %v2703_v3 = vpop.f32.mrb[5].mxu0 }
  0xf4   :  { %v2704_v5 = vadd.f32 %v11453_v46, %v2703_v3  ;;  %v9320_v6 = vpop.f32.mrb[6].mxu0 }
  0xf5   :  { %v2715_v8 = vadd.f32 %v9320_v6, %v11453_v46  ;;  %v2706_v9 = vpop.f32.mrb[7].mxu0  ;;  %v4740_v12 = vmax.f32 %v2712_v2, 0.0 }
  0xf6   :  { %v2707_v11 = vadd.f32 %v11453_v46, %v2706_v9  ;;  %v4738_v15 = vmax.f32 %v2704_v5, 0.0  ;;  %v10666_v9 = vld [vmem:[%s13531_s22 + $0x208] sm:$0xff]  }
  0xf7   :  { %v4741_v13 = vmax.f32 %v2715_v8, 0.0  ;;  %9426 = vmatmul.mubr.msk.bf16.gmra.mrb[112].mxu0 %vm1880_vm0, %v10650_v4 }
  0xf8   :  { %v4739_v16 = vmax.f32 %v2707_v11, 0.0  ;;  %9429 = vmatprep.mubr.msk.bf16.mxu0 %vm1880_vm0, %v10653_v7 }
  0xf9   :  { %v11500_v17 = vpack.c.bf16 %v4741_v13, %v4740_v12  ;;  %v10669_v12 = vld [vmem:[%s13531_s22 + $0x210] sm:$0xff]  }
  0xfa   :  { %v11503_v18 = vpack.c.bf16 %v4739_v16, %v4738_v15  ;;  %v9323_v19 = vpop.f32.mrb[8].mxu0 }
  0xfb   :  { %v2728_v20 = vadd.f32 %v9323_v19, %v11453_v46  ;;  %v2719_v21 = vpop.f32.mrb[9].mxu0 }
  0xfc   :  { %v2720_v23 = vadd.f32 %v11453_v46, %v2719_v21  ;;  %v9324_v24 = vpop.f32.mrb[10].mxu0 }
  0xfd   :  { %v2731_v26 = vadd.f32 %v9324_v24, %v11453_v46  ;;  %v2722_v27 = vpop.f32.mrb[11].mxu0  ;;  %v4744_v29 = vmax.f32 %v2728_v20, 0.0 }
  0xfe   :  { %v2723_v28 = vadd.f32 %v11453_v46, %v2722_v27  ;;  %v4742_v31 = vmax.f32 %v2720_v23, 0.0 }
  0xff   :  { %v4745_v30 = vmax.f32 %v2731_v26, 0.0  ;;  %9430 = vmatmul.mubr.msk.bf16.gmra.mrb[116].mxu0 %vm1880_vm0, %v10654_v22 }
 0x100   :  { %v4743_v32 = vmax.f32 %v2723_v28, 0.0  ;;  %9433 = vmatprep.mubr.msk.bf16.mxu0 %vm1880_vm0, %v10657_v25 }
 0x101   :  { %v11517_v33 = vpack.c.bf16 %v4745_v30, %v4744_v29  ;;  %v10673_v29 = vld [vmem:[%s13531_s22 + $0x220] sm:$0xff]  }
 0x102   :  { %v11519_v34 = vpack.c.bf16 %v4743_v32, %v4742_v31  ;;  %v9327_v35 = vpop.f32.mrb[12].mxu0 }
 0x103   :  { %v2744_v36 = vadd.f32 %v9327_v35, %v11453_v46  ;;  %v2735_v37 = vpop.f32.mrb[13].mxu0 }
 0x104   :  { %v2736_v39 = vadd.f32 %v11453_v46, %v2735_v37  ;;  %v9328_v40 = vpop.f32.mrb[14].mxu0 }
 0x105   :  { %v2747_v42 = vadd.f32 %v9328_v40, %v11453_v46  ;;  %v2738_v43 = vpop.f32.mrb[15].mxu0  ;;  %v4748_v45 = vmax.f32 %v2744_v36, 0.0 }
 0x106   :  { %v2739_v44 = vadd.f32 %v11453_v46, %v2738_v43  ;;  %v4746_v48 = vmax.f32 %v2736_v39, 0.0 }
 0x107   :  { %v4749_v47 = vmax.f32 %v2747_v42, 0.0  ;;  %9434 = vmatmul.mubr.msk.bf16.gmra.mrb[120].mxu0 %vm1880_vm0, %v10658_v38 }
 0x108   :  { %v4747_v49 = vmax.f32 %v2739_v44, 0.0  ;;  %9437 = vmatprep.mubr.msk.bf16.mxu0 %vm1880_vm0, %v10661_v41 }
 0x109   :  { %v11533_v50 = vpack.c.bf16 %v4749_v47, %v4748_v45  ;;  %v10677_v45 = vld [vmem:[%s13531_s22 + $0x230] sm:$0xff]  }
 0x10a   :  { %v11535_v51 = vpack.c.bf16 %v4747_v49, %v4746_v48  ;;  %v9331_v52 = vpop.f32.mrb[16].mxu0 }
 0x10b   :  { %v2760_v53 = vadd.f32 %v9331_v52, %v11453_v46  ;;  %v2751_v54 = vpop.f32.mrb[17].mxu0 }
 0x10c   :  { %v2752_v56 = vadd.f32 %v11453_v46, %v2751_v54  ;;  %v9332_v57 = vpop.f32.mrb[18].mxu0 }
 0x10d   :  { %v2763_v59 = vadd.f32 %v9332_v57, %v11453_v46  ;;  %v2754_v60 = vpop.f32.mrb[19].mxu0  ;;  %v4752_v62 = vmax.f32 %v2760_v53, 0.0 }
 0x10e   :  { %v2755_v61 = vadd.f32 %v11453_v46, %v2754_v60  ;;  %v4750_v2 = vmax.f32 %v2752_v56, 0.0 }
 0x10f   :  { %v4753_v1 = vmax.f32 %v2763_v59, 0.0  ;;  %9438 = vmatmul.mubr.msk.bf16.gmra.mrb[124].mxu0 %vm1880_vm0, %v10662_v55 }
 0x110   :  { %v4751_v3 = vmax.f32 %v2755_v61, 0.0  ;;  %9441 = vmatprep.mubr.msk.bf16.mxu0 %vm1880_vm0, %v10665_v58 }
 0x111   :  { %v9962_v4 = vpack.c.bf16 %v4753_v1, %v4752_v62  ;;  %v10681_v62 = vld [vmem:[%s13531_s22 + $0x240] sm:$0xff]  }
 0x112   :  { %v9335_v5 = vpop.f32.mrb[20].mxu0  ;;  %v9958_v6 = vpack.c.bf16 %v4751_v3, %v4750_v2 }
 0x113   :  { %v2776_v7 = vadd.f32 %v9335_v5, %v11453_v46  ;;  %v2767_v8 = vpop.f32.mrb[21].mxu0 }
 0x114   :  { %v2768_v10 = vadd.f32 %v11453_v46, %v2767_v8  ;;  %v9336_v11 = vpop.f32.mrb[22].mxu0  ;;  %9959 = vmatprep.subr.bf16.mxu1 %v9958_v6  ;;  %v5246_v8 = vld [vmem:[%s13508_s3] sm:$0xff] }
 0x115   :  { %v2779_v13 = vadd.f32 %v9336_v11, %v11453_v46  ;;  %v2770_v14 = vpop.f32.mrb[23].mxu0  ;;  %9961 = vmatpush3.bf16.msra.mxu1 %v11479_v0  ;;  %v4756_v16 = vmax.f32 %v2776_v7, 0.0  ;;  %v10670_v0 = vld [vmem:[%s13531_s22 + $0x218] sm:$0xff]  }
 0x116   :  { %v2771_v15 = vadd.f32 %v11453_v46, %v2770_v14  ;;  %9963 = vmatprep.subr.bf16.mxu1 %v9962_v4  ;;  %v4754_v20 = vmax.f32 %v2768_v10, 0.0  ;;  %v5279_v10 = vld [vmem:[%s13508_s3 + $0x108] sm:$0xff] }
 0x117   :  { %v4757_v19 = vmax.f32 %v2779_v13, 0.0  ;;  %9442 = vmatmul.mubr.msk.bf16.gmra.mrb[128].mxu0 %vm1880_vm0, %v10666_v9  ;;  %v10682_v13 = vld [vmem:[%s13531_s22 + $0x248] sm:$0xff]  }
 0x118   :  { %v4755_v21 = vmax.f32 %v2771_v15, 0.0  ;;  %9445 = vmatprep.mubr.msk.bf16.mxu0 %vm1880_vm0, %v10669_v12  ;;  %v10685_v15 = vld [vmem:[%s13531_s22 + $0x250] sm:$0xff]  }
 0x119   :  { %9965 = vmatpush3.bf16.msra.mxu1 %v11476_v63  ;;  %v9970_v22 = vpack.c.bf16 %v4757_v19, %v4756_v16 }
 0x11a   :  { %v9339_v23 = vpop.f32.mrb[24].mxu0  ;;  %v9966_v24 = vpack.c.bf16 %v4755_v21, %v4754_v20  ;;  %v5278_v20 = vld [vmem:[%s13508_s3 + $0x100] sm:$0xff] }
 0x11b   :  { %v2792_v25 = vadd.f32 %v9339_v23, %v11453_v46  ;;  %v2783_v26 = vpop.f32.mrb[25].mxu0 }
 0x11c   :  { %v2784_v27 = vadd.f32 %v11453_v46, %v2783_v26  ;;  %v9340_v28 = vpop.f32.mrb[26].mxu0  ;;  %9967 = vmatprep.subr.bf16.mxu1 %v9966_v24 }
 0x11d   :  { %v2795_v63 = vadd.f32 %v9340_v28, %v11453_v46  ;;  %v2786_v30 = vpop.f32.mrb[27].mxu0  ;;  %9969 = vmatpush3.bf16.msra.mxu1 %v11503_v18  ;;  %v4760_v32 = vmax.f32 %v2792_v25, 0.0  ;;  %v10674_v18 = vld [vmem:[%s13531_s22 + $0x228] sm:$0xff]  }
 0x11e   :  { %v2787_v31 = vadd.f32 %v11453_v46, %v2786_v30  ;;  %9971 = vmatprep.subr.bf16.mxu1 %v9970_v22  ;;  %v4758_v36 = vmax.f32 %v2784_v27, 0.0  ;;  %v5249_v22 = vld [vmem:[%s13508_s3 + $0x18] sm:$0xff] }
 0x11f   :  { %v4761_v35 = vmax.f32 %v2795_v63, 0.0  ;;  %9446 = vmatmul.mubr.msk.bf16.gmra.mrb[132].mxu0 %vm1880_vm0, %v10670_v0  ;;  %v10686_v30 = vld [vmem:[%s13531_s22 + $0x258] sm:$0xff]  }
 0x120   :  { %v4759_v37 = vmax.f32 %v2787_v31, 0.0  ;;  %9449 = vmatprep.mubr.msk.bf16.mxu0 %vm1880_vm0, %v10673_v29 }
 0x121   :  { %9973 = vmatpush3.bf16.msra.mxu1 %v11500_v17  ;;  %v9978_v38 = vpack.c.bf16 %v4761_v35, %v4760_v32  ;;  %v10689_v35 = vld [vmem:[%s13531_s22 + $0x260] sm:$0xff]  }
 0x122   :  { %v9343_v39 = vpop.f32.mrb[28].mxu0  ;;  %v9974_v40 = vpack.c.bf16 %v4759_v37, %v4758_v36 }
 0x123   :  { %v2808_v41 = vadd.f32 %v9343_v39, %v11453_v46  ;;  %v2799_v42 = vpop.f32.mrb[29].mxu0 }
 0x124   :  { %v2800_v43 = vadd.f32 %v11453_v46, %v2799_v42  ;;  %v9344_v44 = vpop.f32.mrb[30].mxu0  ;;  %9975 = vmatprep.subr.bf16.mxu1 %v9974_v40 }
 0x125   :  { %v2811_v17 = vadd.f32 %v9344_v44, %v11453_v46  ;;  %v2802_v47 = vpop.f32.mrb[31].mxu0  ;;  %9977 = vmatpush3.bf16.msra.mxu1 %v11519_v34  ;;  %v4764_v49 = vmax.f32 %v2808_v41, 0.0  ;;  %v10678_v34 = vld [vmem:[%s13531_s22 + $0x238] sm:$0xff]  }
 0x126   :  { %v2803_v48 = vadd.f32 %v11453_v46, %v2802_v47  ;;  %9979 = vmatprep.subr.bf16.mxu1 %v9978_v38  ;;  %v4762_v53 = vmax.f32 %v2800_v43, 0.0  ;;  %v10690_v47 = vld [vmem:[%s13531_s22 + $0x268] sm:$0xff]  }
 0x127   :  { %v4765_v52 = vmax.f32 %v2811_v17, 0.0  ;;  %9450 = vmatmul.mubr.msk.bf16.gmra.mrb[136].mxu0 %vm1880_vm0, %v10674_v18 }
 0x128   :  { %v4763_v54 = vmax.f32 %v2803_v48, 0.0  ;;  %9453 = vmatprep.mubr.msk.bf16.mxu0 %vm1880_vm0, %v10677_v45 }
 0x129   :  { %9981 = vmatpush3.bf16.msra.mxu1 %v11517_v33  ;;  %v9986_v55 = vpack.c.bf16 %v4765_v52, %v4764_v49  ;;  %v10693_v52 = vld [vmem:[%s13531_s22 + $0x270] sm:$0xff]  }
 0x12a   :  { %v9347_v56 = vpop.f32.mrb[32].mxu0  ;;  %v9982_v57 = vpack.c.bf16 %v4763_v54, %v4762_v53 }
 0x12b   :  { %v2824_v58 = vadd.f32 %v9347_v56, %v11453_v46  ;;  %v2815_v59 = vpop.f32.mrb[33].mxu0 }
 0x12c   :  { %v2816_v60 = vadd.f32 %v11453_v46, %v2815_v59  ;;  %v9348_v61 = vpop.f32.mrb[34].mxu0  ;;  %9983 = vmatprep.subr.bf16.mxu1 %v9982_v57 }
 0x12d   :  { %v2827_v33 = vadd.f32 %v9348_v61, %v11453_v46  ;;  %v2818_v1 = vpop.f32.mrb[35].mxu0  ;;  %9985 = vmatpush3.bf16.msra.mxu1 %v11535_v51  ;;  %v4768_v3 = vmax.f32 %v2824_v58, 0.0 }
 0x12e   :  { %v2819_v2 = vadd.f32 %v11453_v46, %v2818_v1  ;;  %9987 = vmatprep.subr.bf16.mxu1 %v9986_v55  ;;  %v4766_v5 = vmax.f32 %v2816_v60, 0.0  ;;  %v10694_v1 = vld [vmem:[%s13531_s22 + $0x278] sm:$0xff]  }
 0x12f   :  { %v4769_v4 = vmax.f32 %v2827_v33, 0.0  ;;  %9454 = vmatmul.mubr.msk.bf16.gmra.mrb[140].mxu0 %vm1880_vm0, %v10678_v34 }
 0x130   :  { %v4767_v6 = vmax.f32 %v2819_v2, 0.0  ;;  %9457 = vmatprep.mubr.msk.bf16.mxu0 %vm1880_vm0, %v10681_v62 }
 0x131   :  { %v11604_v7 = vpack.c.bf16 %v4769_v4, %v4768_v3  ;;  %9989 = vmatpush3.bf16.msra.mxu1 %v11533_v50  ;;  %v10695_v4 = vld [vmem:[%s13531_s22 + $0x280] sm:$0xff]  }
 0x132   :  { %v11610_v51 = vpack.c.bf16 %v4767_v6, %v4766_v5  ;;  %v9351_v9 = vpop.f32.mrb[36].mxu0 }
 0x133   :  { %v2840_v11 = vadd.f32 %v9351_v9, %v11453_v46  ;;  %v2831_v12 = vpop.f32.mrb[37].mxu0 }
 0x134   :  { %v2832_v50 = vadd.f32 %v11453_v46, %v2831_v12  ;;  %v9352_v14 = vpop.f32.mrb[38].mxu0  ;;  %5375 = vmatmul.mubr.f32.vlgmr.msra.gmra.mrb[108].mxu1 %v5246_v8 }
 0x135   :  { %v2843_v16 = vadd.f32 %v9352_v14, %v11453_v46  ;;  %v2834_v19 = vpop.f32.mrb[39].mxu0  ;;  %5379 = vmatprep.mubr.f32.mxu1 %v5279_v10  ;;  %v4772_v23 = vmax.f32 %v2840_v11, 0.0 }
 0x136   :  { %v2835_v21 = vadd.f32 %v11453_v46, %v2834_v19  ;;  %v4770_v25 = vmax.f32 %v2832_v50, 0.0  ;;  %v10696_v19 = vld [vmem:[%s13531_s22 + $0x288] sm:$0xff]  }
 0x137   :  { %v4773_v24 = vmax.f32 %v2843_v16, 0.0  ;;  %9458 = vmatmul.mubr.msk.bf16.gmra.mrb[144].mxu0 %vm1880_vm0, %v10682_v13 }
 0x138   :  { %v4771_v26 = vmax.f32 %v2835_v21, 0.0  ;;  %9461 = vmatprep.mubr.msk.bf16.mxu0 %vm1880_vm0, %v10685_v15  ;;  %5380 = vmatmul.mubr.f32.gmra.mrb[110].mxu1 %v5278_v20 }
 0x139   :  { %v11633_v0 = vpack.c.bf16 %v4773_v24, %v4772_v23  ;;  %5449 = vmatprep.mubr.f32.mxu1 %v5249_v22  ;;  %v10697_v22 = vld [vmem:[%s13531_s22 + $0x290] sm:$0xff]  }
 0x13a   :  { %v11635_v27 = vpack.c.bf16 %v4771_v26, %v4770_v25  ;;  %v9355_v28 = vpop.f32.mrb[40].mxu0 }
 0x13b   :  { %v2856_v29 = vadd.f32 %v9355_v28, %v11453_v46  ;;  %v2847_v63 = vpop.f32.mrb[41].mxu0 }
 0x13c   :  { %v2848_v31 = vadd.f32 %v11453_v46, %v2847_v63  ;;  %v9356_v32 = vpop.f32.mrb[42].mxu0 }
 0x13d   :  { %v2859_v36 = vadd.f32 %v9356_v32, %v11453_v46  ;;  %v2850_v37 = vpop.f32.mrb[43].mxu0  ;;  %v4776_v39 = vmax.f32 %v2856_v29, 0.0 }
 0x13e   :  { %v2851_v38 = vadd.f32 %v11453_v46, %v2850_v37  ;;  %v4774_v41 = vmax.f32 %v2848_v31, 0.0 }
 0x13f   :  { %v4777_v40 = vmax.f32 %v2859_v36, 0.0  ;;  %9462 = vmatmul.mubr.msk.bf16.gmra.mrb[148].mxu0 %vm1880_vm0, %v10686_v30 }
 0x140   :  { %v4775_v42 = vmax.f32 %v2851_v38, 0.0  ;;  %9465 = vmatprep.mubr.msk.bf16.mxu0 %vm1880_vm0, %v10689_v35 }
 0x141   :  { %v11649_v18 = vpack.c.bf16 %v4777_v40, %v4776_v39  ;;  %v10699_v39 = vld [vmem:[%s13531_s22 + $0x2a0] sm:$0xff]  }
 0x142   :  { %v11651_v43 = vpack.c.bf16 %v4775_v42, %v4774_v41  ;;  %v9359_v44 = vpop.f32.mrb[44].mxu0 }
 0x143   :  { %v2872_v45 = vadd.f32 %v9359_v44, %v11453_v46  ;;  %v2863_v17 = vpop.f32.mrb[45].mxu0 }
 0x144   :  { %v2864_v48 = vadd.f32 %v11453_v46, %v2863_v17  ;;  %v9360_v49 = vpop.f32.mrb[46].mxu0 }
 0x145   :  { %v2875_v53 = vadd.f32 %v9360_v49, %v11453_v46  ;;  %v2866_v54 = vpop.f32.mrb[47].mxu0  ;;  %v4780_v56 = vmax.f32 %v2872_v45, 0.0 }
 0x146   :  { %v2867_v55 = vadd.f32 %v11453_v46, %v2866_v54  ;;  %v4778_v58 = vmax.f32 %v2864_v48, 0.0 }
 0x147   :  { %v4781_v57 = vmax.f32 %v2875_v53, 0.0  ;;  %9466 = vmatmul.mubr.msk.bf16.gmra.mrb[152].mxu0 %vm1880_vm0, %v10690_v47 }
 0x148   :  { %v4779_v59 = vmax.f32 %v2867_v55, 0.0  ;;  %9469 = vmatprep.mubr.msk.bf16.mxu0 %vm1880_vm0, %v10693_v52 }
 0x149   :  { %v11665_v34 = vpack.c.bf16 %v4781_v57, %v4780_v56  ;;  %v10701_v56 = vld [vmem:[%s13531_s22 + $0x2b0] sm:$0xff]  }
 0x14a   :  { %v11667_v60 = vpack.c.bf16 %v4779_v59, %v4778_v58  ;;  %v9363_v61 = vpop.f32.mrb[48].mxu0 }
 0x14b   :  { %v2888_v62 = vadd.f32 %v9363_v61, %v11453_v46  ;;  %v2879_v33 = vpop.f32.mrb[49].mxu0 }
 0x14c   :  { %v2880_v2 = vadd.f32 %v11453_v46, %v2879_v33  ;;  %v9364_v3 = vpop.f32.mrb[50].mxu0 }
 0x14d   :  { %v2891_v5 = vadd.f32 %v9364_v3, %v11453_v46  ;;  %v2882_v6 = vpop.f32.mrb[51].mxu0  ;;  %v4784_v9 = vmax.f32 %v2888_v62, 0.0 }
 0x14e   :  { %v2883_v8 = vadd.f32 %v11453_v46, %v2882_v6  ;;  %v4782_v11 = vmax.f32 %v2880_v2, 0.0 }
 0x14f   :  { %v4785_v10 = vmax.f32 %v2891_v5, 0.0  ;;  %9470 = vmatmul.mubr.msk.bf16.gmra.mrb[156].mxu0 %vm1880_vm0, %v10694_v1 }
 0x150   :  { %v4783_v12 = vmax.f32 %v2883_v8, 0.0  ;;  %9473 = vmatprep.mubr.msk.bf16.mxu0 %vm1880_vm0, %v10695_v4 }
 0x151   :  { %v9994_v13 = vpack.c.bf16 %v4785_v10, %v4784_v9  ;;  %v10703_v9 = vld [vmem:[%s13531_s22 + $0x2c0] sm:$0xff]  }
 0x152   :  { %v9367_v50 = vpop.f32.mrb[52].mxu0  ;;  %v9990_v14 = vpack.c.bf16 %v4783_v12, %v4782_v11 }
 0x153   :  { %v2904_v15 = vadd.f32 %v9367_v50, %v11453_v46  ;;  %v2895_v16 = vpop.f32.mrb[53].mxu0 }
 0x154   :  { %v2896_v20 = vadd.f32 %v11453_v46, %v2895_v16  ;;  %v9368_v21 = vpop.f32.mrb[54].mxu0  ;;  %9991 = vmatprep.subr.bf16.mxu1 %v9990_v14  ;;  %v5248_v16 = vld [vmem:[%s13508_s3 + $0x10] sm:$0xff] }
 0x155   :  { %v2907_v23 = vadd.f32 %v9368_v21, %v11453_v46  ;;  %v2898_v24 = vpop.f32.mrb[55].mxu0  ;;  %9993 = vmatpush3.bf16.msra.mxu1 %v11610_v51  ;;  %v4788_v26 = vmax.f32 %v2904_v15, 0.0  ;;  %v10698_v51 = vld [vmem:[%s13531_s22 + $0x298] sm:$0xff]  }
 0x156   :  { %v2899_v25 = vadd.f32 %v11453_v46, %v2898_v24  ;;  %9995 = vmatprep.subr.bf16.mxu1 %v9994_v13  ;;  %v4786_v29 = vmax.f32 %v2896_v20, 0.0  ;;  %v5281_v20 = vld [vmem:[%s13508_s3 + $0x118] sm:$0xff] }
 0x157   :  { %v4789_v28 = vmax.f32 %v2907_v23, 0.0  ;;  %9474 = vmatmul.mubr.msk.bf16.gmra.mrb[160].mxu0 %vm1880_vm0, %v10696_v19  ;;  %v10704_v23 = vld [vmem:[%s13531_s22 + $0x2c8] sm:$0xff]  }
 0x158   :  { %v4787_v63 = vmax.f32 %v2899_v25, 0.0  ;;  %9477 = vmatprep.mubr.msk.bf16.mxu0 %vm1880_vm0, %v10697_v22  ;;  %v10705_v25 = vld [vmem:[%s13531_s22 + $0x2d0] sm:$0xff]  }
 0x159   :  { %9997 = vmatpush3.bf16.msra.mxu1 %v11604_v7  ;;  %v10002_v30 = vpack.c.bf16 %v4789_v28, %v4788_v26 }
 0x15a   :  { %v9371_v31 = vpop.f32.mrb[56].mxu0  ;;  %v9998_v32 = vpack.c.bf16 %v4787_v63, %v4786_v29  ;;  %v5280_v29 = vld [vmem:[%s13508_s3 + $0x110] sm:$0xff] }
 0x15b   :  { %v2920_v35 = vadd.f32 %v9371_v31, %v11453_v46  ;;  %v2911_v36 = vpop.f32.mrb[57].mxu0 }
 0x15c   :  { %v2912_v37 = vadd.f32 %v11453_v46, %v2911_v36  ;;  %v9372_v38 = vpop.f32.mrb[58].mxu0  ;;  %9999 = vmatprep.subr.bf16.mxu1 %v9998_v32 }
 0x15d   :  { %v2923_v7 = vadd.f32 %v9372_v38, %v11453_v46  ;;  %v2914_v40 = vpop.f32.mrb[59].mxu0  ;;  %10001 = vmatpush3.bf16.msra.mxu1 %v11635_v27  ;;  %v4792_v42 = vmax.f32 %v2920_v35, 0.0  ;;  %v10700_v27 = vld [vmem:[%s13531_s22 + $0x2a8] sm:$0xff]  }
 0x15e   :  { %v2915_v41 = vadd.f32 %v11453_v46, %v2914_v40  ;;  %10003 = vmatprep.subr.bf16.mxu1 %v10002_v30  ;;  %v4790_v45 = vmax.f32 %v2912_v37, 0.0  ;;  %v5251_v30 = vld [vmem:[%s13508_s3 + $0x28] sm:$0xff]  ;;  %v10706_v40 = vld [vmem:[%s13531_s22 + $0x2d8] sm:$0xff]  }
 0x15f   :  { %v4793_v44 = vmax.f32 %v2923_v7, 0.0  ;;  %9478 = vmatmul.mubr.msk.bf16.gmra.mrb[164].mxu0 %vm1880_vm0, %v10698_v51 }
 0x160   :  { %v4791_v17 = vmax.f32 %v2915_v41, 0.0  ;;  %9481 = vmatprep.mubr.msk.bf16.mxu0 %vm1880_vm0, %v10699_v39 }
 0x161   :  { %10005 = vmatpush3.bf16.msra.mxu1 %v11633_v0  ;;  %v10010_v47 = vpack.c.bf16 %v4793_v44, %v4792_v42  ;;  %v10707_v44 = vld [vmem:[%s13531_s22 + $0x2e0] sm:$0xff]  }
 0x162   :  { %v9375_v48 = vpop.f32.mrb[60].mxu0  ;;  %v10006_v49 = vpack.c.bf16 %v4791_v17, %v4790_v45 }
 0x163   :  { %v2936_v52 = vadd.f32 %v9375_v48, %v11453_v46  ;;  %v2927_v53 = vpop.f32.mrb[61].mxu0 }
 0x164   :  { %v2928_v54 = vadd.f32 %v11453_v46, %v2927_v53  ;;  %v9376_v55 = vpop.f32.mrb[62].mxu0  ;;  %10007 = vmatprep.subr.bf16.mxu1 %v10006_v49 }
 0x165   :  { %v2939_v0 = vadd.f32 %v9376_v55, %v11453_v46  ;;  %v2930_v57 = vpop.f32.mrb[63].mxu0  ;;  %10009 = vmatpush3.bf16.msra.mxu1 %v11651_v43  ;;  %v4796_v59 = vmax.f32 %v2936_v52, 0.0  ;;  %v10702_v43 = vld [vmem:[%s13531_s22 + $0x2b8] sm:$0xff]  }
 0x166   :  { %v2931_v58 = vadd.f32 %v11453_v46, %v2930_v57  ;;  %10011 = vmatprep.subr.bf16.mxu1 %v10010_v47  ;;  %v4794_v62 = vmax.f32 %v2928_v54, 0.0  ;;  %v10708_v57 = vld [vmem:[%s13531_s22 + $0x2e8] sm:$0xff]  }
 0x167   :  { %v4797_v61 = vmax.f32 %v2939_v0, 0.0  ;;  %9482 = vmatmul.mubr.msk.bf16.gmra.mrb[168].mxu0 %vm1880_vm0, %v10700_v27 }
 0x168   :  { %v4795_v33 = vmax.f32 %v2931_v58, 0.0  ;;  %9485 = vmatprep.mubr.msk.bf16.mxu0 %vm1880_vm0, %v10701_v56 }
 0x169   :  { %10013 = vmatpush3.bf16.msra.mxu1 %v11649_v18  ;;  %v10018_v1 = vpack.c.bf16 %v4797_v61, %v4796_v59  ;;  %v10709_v61 = vld [vmem:[%s13531_s22 + $0x2f0] sm:$0xff]  }
 0x16a   :  { %v9379_v2 = vpop.f32.mrb[64].mxu0  ;;  %v10014_v3 = vpack.c.bf16 %v4795_v33, %v4794_v62 }
 0x16b   :  { %v2952_v4 = vadd.f32 %v9379_v2, %v11453_v46  ;;  %v2943_v5 = vpop.f32.mrb[65].mxu0 }
 0x16c   :  { %v2944_v6 = vadd.f32 %v11453_v46, %v2943_v5  ;;  %v9380_v8 = vpop.f32.mrb[66].mxu0  ;;  %10015 = vmatprep.subr.bf16.mxu1 %v10014_v3 }
 0x16d   :  { %v2955_v18 = vadd.f32 %v9380_v8, %v11453_v46  ;;  %v2946_v10 = vpop.f32.mrb[67].mxu0  ;;  %10017 = vmatpush3.bf16.msra.mxu1 %v11667_v60  ;;  %v4800_v12 = vmax.f32 %v2952_v4, 0.0 }
 0x16e   :  { %v2947_v11 = vadd.f32 %v11453_v46, %v2946_v10  ;;  %10019 = vmatprep.subr.bf16.mxu1 %v10018_v1  ;;  %v4798_v50 = vmax.f32 %v2944_v6, 0.0  ;;  %v10710_v10 = vld [vmem:[%s13531_s22 + $0x2f8] sm:$0xff]  }
 0x16f   :  { %v4801_v13 = vmax.f32 %v2955_v18, 0.0  ;;  %9486 = vmatmul.mubr.msk.bf16.gmra.mrb[172].mxu0 %vm1880_vm0, %v10702_v43 }
 0x170   :  { %v4799_v14 = vmax.f32 %v2947_v11, 0.0  ;;  %9489 = vmatprep.mubr.msk.bf16.mxu0 %vm1880_vm0, %v10703_v9 }
 0x171   :  { %v11736_v15 = vpack.c.bf16 %v4801_v13, %v4800_v12  ;;  %10021 = vmatpush3.bf16.msra.mxu1 %v11665_v34  ;;  %v10711_v13 = vld [vmem:[%s13531_s22 + $0x300] sm:$0xff]  }
 0x172   :  { %v11742_v60 = vpack.c.bf16 %v4799_v14, %v4798_v50  ;;  %v9383_v19 = vpop.f32.mrb[68].mxu0 }
 0x173   :  { %v2968_v21 = vadd.f32 %v9383_v19, %v11453_v46  ;;  %v2959_v22 = vpop.f32.mrb[69].mxu0 }
 0x174   :  { %v2960_v34 = vadd.f32 %v11453_v46, %v2959_v22  ;;  %v9384_v24 = vpop.f32.mrb[70].mxu0  ;;  %5450 = vmatmul.mubr.f32.vlgmr.msra.gmra.mrb[112].mxu1 %v5248_v16 }
 0x175   :  { %v2971_v26 = vadd.f32 %v9384_v24, %v11453_v46  ;;  %v2962_v28 = vpop.f32.mrb[71].mxu0  ;;  %5454 = vmatprep.mubr.f32.mxu1 %v5281_v20  ;;  %v4804_v31 = vmax.f32 %v2968_v21, 0.0 }
 0x176   :  { %v2963_v63 = vadd.f32 %v11453_v46, %v2962_v28  ;;  %v4802_v35 = vmax.f32 %v2960_v34, 0.0  ;;  %v10712_v28 = vld [vmem:[%s13531_s22 + $0x308] sm:$0xff]  }
 0x177   :  { %v4805_v32 = vmax.f32 %v2971_v26, 0.0  ;;  %9490 = vmatmul.mubr.msk.bf16.gmra.mrb[176].mxu0 %vm1880_vm0, %v10704_v23 }
 0x178   :  { %v4803_v36 = vmax.f32 %v2963_v63, 0.0  ;;  %9493 = vmatprep.mubr.msk.bf16.mxu0 %vm1880_vm0, %v10705_v25  ;;  %5455 = vmatmul.mubr.f32.gmra.mrb[114].mxu1 %v5280_v29 }
 0x179   :  { %v11765_v51 = vpack.c.bf16 %v4805_v32, %v4804_v31  ;;  %5524 = vmatprep.mubr.f32.mxu1 %v5251_v30  ;;  %v10713_v30 = vld [vmem:[%s13531_s22 + $0x310] sm:$0xff]  }
 0x17a   :  { %v11767_v37 = vpack.c.bf16 %v4803_v36, %v4802_v35  ;;  %v9387_v38 = vpop.f32.mrb[72].mxu0 }
 0x17b   :  { %v2984_v39 = vadd.f32 %v9387_v38, %v11453_v46  ;;  %v2975_v7 = vpop.f32.mrb[73].mxu0 }
 0x17c   :  { %v2976_v41 = vadd.f32 %v11453_v46, %v2975_v7  ;;  %v9388_v42 = vpop.f32.mrb[74].mxu0 }
 0x17d   :  { %v2987_v45 = vadd.f32 %v9388_v42, %v11453_v46  ;;  %v2978_v17 = vpop.f32.mrb[75].mxu0  ;;  %v4808_v48 = vmax.f32 %v2984_v39, 0.0 }
 0x17e   :  { %v2979_v47 = vadd.f32 %v11453_v46, %v2978_v17  ;;  %v4806_v52 = vmax.f32 %v2976_v41, 0.0 }
 0x17f   :  { %v4809_v49 = vmax.f32 %v2987_v45, 0.0  ;;  %9494 = vmatmul.mubr.msk.bf16.gmra.mrb[180].mxu0 %vm1880_vm0, %v10706_v40 }
 0x180   :  { %v4807_v53 = vmax.f32 %v2979_v47, 0.0  ;;  %9497 = vmatprep.mubr.msk.bf16.mxu0 %vm1880_vm0, %v10707_v44 }
 0x181   :  { %v11781_v27 = vpack.c.bf16 %v4809_v49, %v4808_v48  ;;  %v10715_v48 = vld [vmem:[%s13531_s22 + $0x320] sm:$0xff]  }
 0x182   :  { %v11783_v54 = vpack.c.bf16 %v4807_v53, %v4806_v52  ;;  %v9391_v55 = vpop.f32.mrb[76].mxu0 }
 0x183   :  { %v3000_v56 = vadd.f32 %v9391_v55, %v11453_v46  ;;  %v2991_v0 = vpop.f32.mrb[77].mxu0 }
 0x184   :  { %v2992_v58 = vadd.f32 %v11453_v46, %v2991_v0  ;;  %v9392_v59 = vpop.f32.mrb[78].mxu0 }
 0x185   :  { %v3003_v62 = vadd.f32 %v9392_v59, %v11453_v46  ;;  %v2994_v33 = vpop.f32.mrb[79].mxu0  ;;  %v4812_v2 = vmax.f32 %v3000_v56, 0.0 }
 0x186   :  { %v2995_v1 = vadd.f32 %v11453_v46, %v2994_v33  ;;  %v4810_v4 = vmax.f32 %v2992_v58, 0.0 }
 0x187   :  { %v4813_v3 = vmax.f32 %v3003_v62, 0.0  ;;  %9498 = vmatmul.mubr.msk.bf16.gmra.mrb[184].mxu0 %vm1880_vm0, %v10708_v57 }
 0x188   :  { %v4811_v5 = vmax.f32 %v2995_v1, 0.0  ;;  %9501 = vmatprep.mubr.msk.bf16.mxu0 %vm1880_vm0, %v10709_v61 }
 0x189   :  { %v11797_v43 = vpack.c.bf16 %v4813_v3, %v4812_v2  ;;  %v10717_v2 = vld [vmem:[%s13531_s22 + $0x330] sm:$0xff]  }
 0x18a   :  { %v11799_v6 = vpack.c.bf16 %v4811_v5, %v4810_v4  ;;  %v9395_v8 = vpop.f32.mrb[80].mxu0 }
 0x18b   :  { %v3016_v9 = vadd.f32 %v9395_v8, %v11453_v46  ;;  %v3007_v18 = vpop.f32.mrb[81].mxu0 }
 0x18c   :  { %v3008_v11 = vadd.f32 %v11453_v46, %v3007_v18  ;;  %v9396_v12 = vpop.f32.mrb[82].mxu0 }
 0x18d   :  { %v3019_v50 = vadd.f32 %v9396_v12, %v11453_v46  ;;  %v3010_v14 = vpop.f32.mrb[83].mxu0  ;;  %v4816_v19 = vmax.f32 %v3016_v9, 0.0 }
 0x18e   :  { %v3011_v16 = vadd.f32 %v11453_v46, %v3010_v14  ;;  %v4814_v21 = vmax.f32 %v3008_v11, 0.0 }
 0x18f   :  { %v4817_v20 = vmax.f32 %v3019_v50, 0.0  ;;  %9502 = vmatmul.mubr.msk.bf16.gmra.mrb[188].mxu0 %vm1880_vm0, %v10710_v10 }
 0x190   :  { %v4815_v22 = vmax.f32 %v3011_v16, 0.0  ;;  %9505 = vmatprep.mubr.msk.bf16.mxu0 %vm1880_vm0, %v10711_v13 }
 0x191   :  { %v10026_v23 = vpack.c.bf16 %v4817_v20, %v4816_v19  ;;  %v10719_v19 = vld [vmem:[%s13531_s22 + $0x340] sm:$0xff]  }
 0x192   :  { %v9399_v34 = vpop.f32.mrb[84].mxu0  ;;  %v10022_v24 = vpack.c.bf16 %v4815_v22, %v4814_v21 }
 0x193   :  { %v3032_v25 = vadd.f32 %v9399_v34, %v11453_v46  ;;  %v3023_v26 = vpop.f32.mrb[85].mxu0 }
 0x194   :  { %v3024_v29 = vadd.f32 %v11453_v46, %v3023_v26  ;;  %v9400_v63 = vpop.f32.mrb[86].mxu0  ;;  %10023 = vmatprep.subr.bf16.mxu1 %v10022_v24  ;;  %v5250_v26 = vld [vmem:[%s13508_s3 + $0x20] sm:$0xff] }
 0x195   :  { %v3035_v31 = vadd.f32 %v9400_v63, %v11453_v46  ;;  %v3026_v32 = vpop.f32.mrb[87].mxu0  ;;  %10025 = vmatpush3.bf16.msra.mxu1 %v11742_v60  ;;  %v4820_v36 = vmax.f32 %v3032_v25, 0.0  ;;  %v10714_v60 = vld [vmem:[%s13531_s22 + $0x318] sm:$0xff]  }
 0x196   :  { %v3027_v35 = vadd.f32 %v11453_v46, %v3026_v32  ;;  %10027 = vmatprep.subr.bf16.mxu1 %v10026_v23  ;;  %v4818_v39 = vmax.f32 %v3024_v29, 0.0  ;;  %v5283_v29 = vld [vmem:[%s13508_s3 + $0x128] sm:$0xff] }
 0x197   :  { %v4821_v38 = vmax.f32 %v3035_v31, 0.0  ;;  %9506 = vmatmul.mubr.msk.bf16.gmra.mrb[192].mxu0 %vm1880_vm0, %v10712_v28  ;;  %v10720_v31 = vld [vmem:[%s13531_s22 + $0x348] sm:$0xff]  }
 0x198   :  { %v4819_v7 = vmax.f32 %v3027_v35, 0.0  ;;  %9509 = vmatprep.mubr.msk.bf16.mxu0 %vm1880_vm0, %v10713_v30  ;;  %v10721_v35 = vld [vmem:[%s13531_s22 + $0x350] sm:$0xff]  }
 0x199   :  { %10029 = vmatpush3.bf16.msra.mxu1 %v11736_v15  ;;  %v10034_v40 = vpack.c.bf16 %v4821_v38, %v4820_v36 }
 0x19a   :  { %v9403_v41 = vpop.f32.mrb[88].mxu0  ;;  %v10030_v42 = vpack.c.bf16 %v4819_v7, %v4818_v39  ;;  %v5282_v39 = vld [vmem:[%s13508_s3 + $0x120] sm:$0xff] }
 0x19b   :  { %v3048_v44 = vadd.f32 %v9403_v41, %v11453_v46  ;;  %v3039_v45 = vpop.f32.mrb[89].mxu0 }
 0x19c   :  { %v3040_v17 = vadd.f32 %v11453_v46, %v3039_v45  ;;  %v9404_v47 = vpop.f32.mrb[90].mxu0  ;;  %10031 = vmatprep.subr.bf16.mxu1 %v10030_v42 }
 0x19d   :  { %v3051_v15 = vadd.f32 %v9404_v47, %v11453_v46  ;;  %v3042_v49 = vpop.f32.mrb[91].mxu0  ;;  %10033 = vmatpush3.bf16.msra.mxu1 %v11767_v37  ;;  %v4824_v53 = vmax.f32 %v3048_v44, 0.0  ;;  %v10716_v37 = vld [vmem:[%s13531_s22 + $0x328] sm:$0xff]  }
 0x19e   :  { %v3043_v52 = vadd.f32 %v11453_v46, %v3042_v49  ;;  %10035 = vmatprep.subr.bf16.mxu1 %v10034_v40  ;;  %v4822_v56 = vmax.f32 %v3040_v17, 0.0  ;;  %v5253_v40 = vld [vmem:[%s13508_s3 + $0x38] sm:$0xff] }
 0x19f   :  { %v4825_v55 = vmax.f32 %v3051_v15, 0.0  ;;  %9510 = vmatmul.mubr.msk.bf16.gmra.mrb[196].mxu0 %vm1880_vm0, %v10714_v60  ;;  %v10722_v49 = vld [vmem:[%s13531_s22 + $0x358] sm:$0xff]  }
 0x1a0   :  { %v4823_v0 = vmax.f32 %v3043_v52, 0.0  ;;  %9513 = vmatprep.mubr.msk.bf16.mxu0 %vm1880_vm0, %v10715_v48 }
 0x1a1   :  { %10037 = vmatpush3.bf16.msra.mxu1 %v11765_v51  ;;  %v10042_v57 = vpack.c.bf16 %v4825_v55, %v4824_v53  ;;  %v10723_v55 = vld [vmem:[%s13531_s22 + $0x360] sm:$0xff]  }
 0x1a2   :  { %v9407_v58 = vpop.f32.mrb[92].mxu0  ;;  %v10038_v59 = vpack.c.bf16 %v4823_v0, %v4822_v56 }
 0x1a3   :  { %v3064_v61 = vadd.f32 %v9407_v58, %v11453_v46  ;;  %v3055_v62 = vpop.f32.mrb[93].mxu0 }
 0x1a4   :  { %v3056_v33 = vadd.f32 %v11453_v46, %v3055_v62  ;;  %v9408_v1 = vpop.f32.mrb[94].mxu0  ;;  %10039 = vmatprep.subr.bf16.mxu1 %v10038_v59 }
 0x1a5   :  { %v3067_v51 = vadd.f32 %v9408_v1, %v11453_v46  ;;  %v3058_v3 = vpop.f32.mrb[95].mxu0  ;;  %10041 = vmatpush3.bf16.msra.mxu1 %v11783_v54  ;;  %v4828_v5 = vmax.f32 %v3064_v61, 0.0  ;;  %v10718_v54 = vld [vmem:[%s13531_s22 + $0x338] sm:$0xff]  }
 0x1a6   :  { %v3059_v4 = vadd.f32 %v11453_v46, %v3058_v3  ;;  %10043 = vmatprep.subr.bf16.mxu1 %v10042_v57  ;;  %v4826_v9 = vmax.f32 %v3056_v33, 0.0  ;;  %v10724_v3 = vld [vmem:[%s13531_s22 + $0x368] sm:$0xff]  }
 0x1a7   :  { %v4829_v8 = vmax.f32 %v3067_v51, 0.0  ;;  %9514 = vmatmul.mubr.msk.bf16.gmra.mrb[200].mxu0 %vm1880_vm0, %v10716_v37 }
 0x1a8   :  { %v4827_v18 = vmax.f32 %v3059_v4, 0.0  ;;  %9517 = vmatprep.mubr.msk.bf16.mxu0 %vm1880_vm0, %v10717_v2 }
 0x1a9   :  { %10045 = vmatpush3.bf16.msra.mxu1 %v11781_v27  ;;  %v10050_v10 = vpack.c.bf16 %v4829_v8, %v4828_v5  ;;  %v11866_v27 = vld [vmem:[%s13532_s24] ss:$0 sm:$0xff]  ;;  %v10725_v8 = vld [vmem:[%s13531_s22 + $0x370] sm:$0xff]  }
 0x1aa   :  { %v9411_v11 = vpop.f32.mrb[96].mxu0  ;;  %v10046_v12 = vpack.c.bf16 %v4827_v18, %v4826_v9 }
 0x1ab   :  { %v3080_v13 = vadd.f32 %v9411_v11, %v11453_v46  ;;  %v3071_v50 = vpop.f32.mrb[97].mxu0 }
 0x1ac   :  { %v3072_v14 = vadd.f32 %v11453_v46, %v3071_v50  ;;  %v9412_v16 = vpop.f32.mrb[98].mxu0  ;;  %10047 = vmatprep.subr.bf16.mxu1 %v10046_v12 }
 0x1ad   :  { %v3083_v20 = vadd.f32 %v11866_v27, %v9412_v16  ;;  %v3074_v21 = vpop.f32.mrb[99].mxu0  ;;  %10049 = vmatpush3.bf16.msra.mxu1 %v11799_v6  ;;  %v4832_v46 = vmax.f32 %v3080_v13, 0.0 }
 0x1ae   :  { %v3075_v22 = vadd.f32 %v11866_v27, %v3074_v21  ;;  %10051 = vmatprep.subr.bf16.mxu1 %v10050_v10  ;;  %v4830_v34 = vmax.f32 %v3072_v14, 0.0  ;;  %v10726_v21 = vld [vmem:[%s13531_s22 + $0x378] sm:$0xff]  }
 0x1af   :  { %v4833_v23 = vmax.f32 %v3083_v20, 0.0  ;;  %9518 = vmatmul.mubr.msk.bf16.gmra.mrb[204].mxu0 %vm1880_vm0, %v10718_v54 }
 0x1b0   :  { %v4831_v24 = vmax.f32 %v3075_v22, 0.0  ;;  %9521 = vmatprep.mubr.msk.bf16.mxu0 %vm1880_vm0, %v10719_v19 }
 0x1b1   :  { %v11873_v25 = vpack.c.bf16 %v4833_v23, %v4832_v46  ;;  %10053 = vmatpush3.bf16.msra.mxu1 %v11797_v43  ;;  %v10727_v23 = vld [vmem:[%s13531_s22 + $0x380] sm:$0xff]  }
 0x1b2   :  { %v11879_v6 = vpack.c.bf16 %v4831_v24, %v4830_v34  ;;  %v9415_v28 = vpop.f32.mrb[100].mxu0 }
 0x1b3   :  { %v3096_v63 = vadd.f32 %v11866_v27, %v9415_v28  ;;  %v3087_v30 = vpop.f32.mrb[101].mxu0 }
 0x1b4   :  { %v3088_v43 = vadd.f32 %v11866_v27, %v3087_v30  ;;  %v9416_v32 = vpop.f32.mrb[102].mxu0  ;;  %5525 = vmatmul.mubr.f32.vlgmr.msra.gmra.mrb[116].mxu1 %v5250_v26 }
 0x1b5   :  { %v3099_v36 = vadd.f32 %v11866_v27, %v9416_v32  ;;  %v3090_v38 = vpop.f32.mrb[103].mxu0  ;;  %5529 = vmatprep.mubr.f32.mxu1 %v5283_v29  ;;  %v4836_v41 = vmax.f32 %v3096_v63, 0.0 }
 0x1b6   :  { %v3091_v7 = vadd.f32 %v11866_v27, %v3090_v38  ;;  %v4834_v44 = vmax.f32 %v3088_v43, 0.0  ;;  %v10728_v38 = vld [vmem:[%s13531_s22 + $0x388] sm:$0xff]  }
 0x1b7   :  { %v4837_v42 = vmax.f32 %v3099_v36, 0.0  ;;  %9522 = vmatmul.mubr.msk.bf16.gmra.mrb[208].mxu0 %vm1880_vm0, %v10720_v31 }
 0x1b8   :  { %v4835_v45 = vmax.f32 %v3091_v7, 0.0  ;;  %9525 = vmatprep.mubr.msk.bf16.mxu0 %vm1880_vm0, %v10721_v35  ;;  %5530 = vmatmul.mubr.f32.gmra.mrb[118].mxu1 %v5282_v39 }
 0x1b9   :  { %v11902_v60 = vpack.c.bf16 %v4837_v42, %v4836_v41  ;;  %5599 = vmatprep.mubr.f32.mxu1 %v5253_v40  ;;  %v10729_v40 = vld [vmem:[%s13531_s22 + $0x390] sm:$0xff]  }
 0x1ba   :  { %v11904_v17 = vpack.c.bf16 %v4835_v45, %v4834_v44  ;;  %v9419_v47 = vpop.f32.mrb[104].mxu0 }
 0x1bb   :  { %v3112_v48 = vadd.f32 %v11866_v27, %v9419_v47  ;;  %v3103_v15 = vpop.f32.mrb[105].mxu0 }
 0x1bc   :  { %v3104_v52 = vadd.f32 %v11866_v27, %v3103_v15  ;;  %v9420_v53 = vpop.f32.mrb[106].mxu0 }
 0x1bd   :  { %v3115_v56 = vadd.f32 %v11866_v27, %v9420_v53  ;;  %v3106_v0 = vpop.f32.mrb[107].mxu0  ;;  %v4840_v58 = vmax.f32 %v3112_v48, 0.0 }
 0x1be   :  { %v3107_v57 = vadd.f32 %v11866_v27, %v3106_v0  ;;  %v4838_v61 = vmax.f32 %v3104_v52, 0.0 }
 0x1bf   :  { %v4841_v59 = vmax.f32 %v3115_v56, 0.0  ;;  %9526 = vmatmul.mubr.msk.bf16.gmra.mrb[212].mxu0 %vm1880_vm0, %v10722_v49 }
 0x1c0   :  { %v4839_v62 = vmax.f32 %v3107_v57, 0.0  ;;  %9529 = vmatprep.mubr.msk.bf16.mxu0 %vm1880_vm0, %v10723_v55 }
 0x1c1   :  { %v11918_v37 = vpack.c.bf16 %v4841_v59, %v4840_v58  ;;  %v10731_v58 = vld [vmem:[%s13531_s22 + $0x3a0] sm:$0xff]  }
 0x1c2   :  { %v11920_v33 = vpack.c.bf16 %v4839_v62, %v4838_v61  ;;  %v9423_v1 = vpop.f32.mrb[108].mxu0 }
 0x1c3   :  { %v3128_v2 = vadd.f32 %v11866_v27, %v9423_v1  ;;  %v3119_v51 = vpop.f32.mrb[109].mxu0 }
 0x1c4   :  { %v3120_v4 = vadd.f32 %v11866_v27, %v3119_v51  ;;  %v9424_v5 = vpop.f32.mrb[110].mxu0 }
 0x1c5   :  { %v3131_v9 = vadd.f32 %v11866_v27, %v9424_v5  ;;  %v3122_v18 = vpop.f32.mrb[111].mxu0  ;;  %v4844_v11 = vmax.f32 %v3128_v2, 0.0 }
 0x1c6   :  { %v3123_v10 = vadd.f32 %v11866_v27, %v3122_v18  ;;  %v4842_v13 = vmax.f32 %v3120_v4, 0.0 }
 0x1c7   :  { %v4845_v12 = vmax.f32 %v3131_v9, 0.0  ;;  %9530 = vmatmul.mubr.msk.bf16.gmra.mrb[216].mxu0 %vm1880_vm0, %v10724_v3 }
 0x1c8   :  { %v4843_v50 = vmax.f32 %v3123_v10, 0.0  ;;  %9533 = vmatprep.mubr.msk.bf16.mxu0 %vm1880_vm0, %v10725_v8 }
 0x1c9   :  { %v11934_v54 = vpack.c.bf16 %v4845_v12, %v4844_v11  ;;  %v10733_v11 = vld [vmem:[%s13531_s22 + $0x3b0] sm:$0xff]  }
 0x1ca   :  { %v11936_v14 = vpack.c.bf16 %v4843_v50, %v4842_v13  ;;  %v9427_v16 = vpop.f32.mrb[112].mxu0 }
 0x1cb   :  { %v3144_v19 = vadd.f32 %v11866_v27, %v9427_v16  ;;  %v3135_v20 = vpop.f32.mrb[113].mxu0 }
 0x1cc   :  { %v3136_v22 = vadd.f32 %v11866_v27, %v3135_v20  ;;  %v9428_v46 = vpop.f32.mrb[114].mxu0 }
 0x1cd   :  { %v3147_v34 = vadd.f32 %v11866_v27, %v9428_v46  ;;  %v3138_v24 = vpop.f32.mrb[115].mxu0  ;;  %v4848_v28 = vmax.f32 %v3144_v19, 0.0 }
 0x1ce   :  { %v3139_v26 = vadd.f32 %v11866_v27, %v3138_v24  ;;  %v4846_v63 = vmax.f32 %v3136_v22, 0.0 }
 0x1cf   :  { %v4849_v29 = vmax.f32 %v3147_v34, 0.0  ;;  %9534 = vmatmul.mubr.msk.bf16.gmra.mrb[220].mxu0 %vm1880_vm0, %v10726_v21 }
 0x1d0   :  { %v4847_v30 = vmax.f32 %v3139_v26, 0.0  ;;  %9537 = vmatprep.mubr.msk.bf16.mxu0 %vm1880_vm0, %v10727_v23 }
 0x1d1   :  { %v10058_v31 = vpack.c.bf16 %v4849_v29, %v4848_v28  ;;  %v10735_v28 = vld [vmem:[%s13531_s22 + $0x3c0] sm:$0xff]  }
 0x1d2   :  { %v9431_v43 = vpop.f32.mrb[116].mxu0  ;;  %v10054_v32 = vpack.c.bf16 %v4847_v30, %v4846_v63 }
 0x1d3   :  { %v3160_v35 = vadd.f32 %v11866_v27, %v9431_v43  ;;  %v3151_v36 = vpop.f32.mrb[117].mxu0 }
 0x1d4   :  { %v3152_v39 = vadd.f32 %v11866_v27, %v3151_v36  ;;  %v9432_v7 = vpop.f32.mrb[118].mxu0  ;;  %10055 = vmatprep.subr.bf16.mxu1 %v10054_v32  ;;  %v5252_v36 = vld [vmem:[%s13508_s3 + $0x30] sm:$0xff] }
 0x1d5   :  { %v3163_v41 = vadd.f32 %v11866_v27, %v9432_v7  ;;  %v3154_v42 = vpop.f32.mrb[119].mxu0  ;;  %10057 = vmatpush3.bf16.msra.mxu1 %v11879_v6  ;;  %v4852_v45 = vmax.f32 %v3160_v35, 0.0  ;;  %v10730_v6 = vld [vmem:[%s13531_s22 + $0x398] sm:$0xff]  }
 0x1d6   :  { %v3155_v44 = vadd.f32 %v11866_v27, %v3154_v42  ;;  %10059 = vmatprep.subr.bf16.mxu1 %v10058_v31  ;;  %v4850_v48 = vmax.f32 %v3152_v39, 0.0  ;;  %v5285_v39 = vld [vmem:[%s13508_s3 + $0x138] sm:$0xff] }
 0x1d7   :  { %v4853_v47 = vmax.f32 %v3163_v41, 0.0  ;;  %9538 = vmatmul.mubr.msk.bf16.gmra.mrb[224].mxu0 %vm1880_vm0, %v10728_v38  ;;  %v10736_v41 = vld [vmem:[%s13531_s22 + $0x3c8] sm:$0xff]  }
 0x1d8   :  { %v4851_v15 = vmax.f32 %v3155_v44, 0.0  ;;  %9541 = vmatprep.mubr.msk.bf16.mxu0 %vm1880_vm0, %v10729_v40  ;;  %v10737_v44 = vld [vmem:[%s13531_s22 + $0x3d0] sm:$0xff]  }
 0x1d9   :  { %10061 = vmatpush3.bf16.msra.mxu1 %v11873_v25  ;;  %v10066_v49 = vpack.c.bf16 %v4853_v47, %v4852_v45 }
 0x1da   :  { %v9435_v52 = vpop.f32.mrb[120].mxu0  ;;  %v10062_v53 = vpack.c.bf16 %v4851_v15, %v4850_v48  ;;  %v5284_v48 = vld [vmem:[%s13508_s3 + $0x130] sm:$0xff] }
 0x1db   :  { %v3176_v55 = vadd.f32 %v11866_v27, %v9435_v52  ;;  %v3167_v56 = vpop.f32.mrb[121].mxu0 }
 0x1dc   :  { %v3168_v0 = vadd.f32 %v11866_v27, %v3167_v56  ;;  %v9436_v57 = vpop.f32.mrb[122].mxu0  ;;  %10063 = vmatprep.subr.bf16.mxu1 %v10062_v53 }
 0x1dd   :  { %v3179_v25 = vadd.f32 %v11866_v27, %v9436_v57  ;;  %v3170_v59 = vpop.f32.mrb[123].mxu0  ;;  %10065 = vmatpush3.bf16.msra.mxu1 %v11904_v17  ;;  %v4856_v62 = vmax.f32 %v3176_v55, 0.0  ;;  %v10732_v17 = vld [vmem:[%s13531_s22 + $0x3a8] sm:$0xff]  }
 0x1de   :  { %v3171_v61 = vadd.f32 %v11866_v27, %v3170_v59  ;;  %10067 = vmatprep.subr.bf16.mxu1 %v10066_v49  ;;  %v4854_v2 = vmax.f32 %v3168_v0, 0.0  ;;  %v5255_v49 = vld [vmem:[%s13508_s3 + $0x48] sm:$0xff]  ;;  %v10738_v59 = vld [vmem:[%s13531_s22 + $0x3d8] sm:$0xff]  }
 0x1df   :  { %v4857_v1 = vmax.f32 %v3179_v25, 0.0  ;;  %9542 = vmatmul.mubr.msk.bf16.gmra.mrb[228].mxu0 %vm1880_vm0, %v10730_v6 }
 0x1e0   :  { %v4855_v51 = vmax.f32 %v3171_v61, 0.0  ;;  %9545 = vmatprep.mubr.msk.bf16.mxu0 %vm1880_vm0, %v10731_v58 }
 0x1e1   :  { %10069 = vmatpush3.bf16.msra.mxu1 %v11902_v60  ;;  %v10074_v3 = vpack.c.bf16 %v4857_v1, %v4856_v62  ;;  %v10739_v1 = vld [vmem:[%s13531_s22 + $0x3e0] sm:$0xff]  }
 0x1e2   :  { %v9439_v4 = vpop.f32.mrb[124].mxu0  ;;  %v10070_v5 = vpack.c.bf16 %v4855_v51, %v4854_v2 }
 0x1e3   :  { %v3192_v8 = vadd.f32 %v11866_v27, %v9439_v4  ;;  %v3183_v9 = vpop.f32.mrb[125].mxu0 }
 0x1e4   :  { %v3184_v18 = vadd.f32 %v11866_v27, %v3183_v9  ;;  %v9440_v10 = vpop.f32.mrb[126].mxu0  ;;  %10071 = vmatprep.subr.bf16.mxu1 %v10070_v5 }
 0x1e5   :  { %v3195_v60 = vadd.f32 %v11866_v27, %v9440_v10  ;;  %v3186_v12 = vpop.f32.mrb[127].mxu0  ;;  %10073 = vmatpush3.bf16.msra.mxu1 %v11920_v33  ;;  %v4860_v50 = vmax.f32 %v3192_v8, 0.0  ;;  %v10734_v33 = vld [vmem:[%s13531_s22 + $0x3b8] sm:$0xff]  }
 0x1e6   :  { %v3187_v13 = vadd.f32 %v11866_v27, %v3186_v12  ;;  %10075 = vmatprep.subr.bf16.mxu1 %v10074_v3  ;;  %v4858_v19 = vmax.f32 %v3184_v18, 0.0  ;;  %v10740_v12 = vld [vmem:[%s13531_s22 + $0x3e8] sm:$0xff]  }
 0x1e7   :  { %v4861_v16 = vmax.f32 %v3195_v60, 0.0  ;;  %9546 = vmatmul.mubr.msk.bf16.gmra.mrb[232].mxu0 %vm1880_vm0, %v10732_v17 }
 0x1e8   :  { %v4859_v20 = vmax.f32 %v3187_v13, 0.0  ;;  %9549 = vmatprep.mubr.msk.bf16.mxu0 %vm1880_vm0, %v10733_v11 }
 0x1e9   :  { %10077 = vmatpush3.bf16.msra.mxu1 %v11918_v37  ;;  %v10082_v21 = vpack.c.bf16 %v4861_v16, %v4860_v50  ;;  %v10741_v16 = vld [vmem:[%s13531_s22 + $0x3f0] sm:$0xff]  }
 0x1ea   :  { %v9443_v22 = vpop.f32.mrb[128].mxu0  ;;  %v10078_v46 = vpack.c.bf16 %v4859_v20, %v4858_v19 }
 0x1eb   :  { %v3208_v23 = vadd.f32 %v11866_v27, %v9443_v22  ;;  %v3199_v34 = vpop.f32.mrb[129].mxu0 }
 0x1ec   :  { %v3200_v24 = vadd.f32 %v11866_v27, %v3199_v34  ;;  %v9444_v26 = vpop.f32.mrb[130].mxu0  ;;  %10079 = vmatprep.subr.bf16.mxu1 %v10078_v46 }
 0x1ed   :  { %v3211_v37 = vadd.f32 %v11866_v27, %v9444_v26  ;;  %v3202_v29 = vpop.f32.mrb[131].mxu0  ;;  %10081 = vmatpush3.bf16.msra.mxu1 %v11936_v14  ;;  %v4864_v30 = vmax.f32 %v3208_v23, 0.0 }
 0x1ee   :  { %v3203_v63 = vadd.f32 %v11866_v27, %v3202_v29  ;;  %10083 = vmatprep.subr.bf16.mxu1 %v10082_v21  ;;  %v4862_v43 = vmax.f32 %v3200_v24, 0.0  ;;  %v10742_v29 = vld [vmem:[%s13531_s22 + $0x3f8] sm:$0xff]  }
 0x1ef   :  { %v4865_v31 = vmax.f32 %v3211_v37, 0.0  ;;  %9550 = vmatmul.mubr.msk.bf16.gmra.mrb[236].mxu0 %vm1880_vm0, %v10734_v33 }
 0x1f0   :  { %v4863_v32 = vmax.f32 %v3203_v63, 0.0  ;;  %9553 = vmatprep.mubr.msk.bf16.mxu0 %vm1880_vm0, %v10735_v28 }
 0x1f1   :  { %v12005_v35 = vpack.c.bf16 %v4865_v31, %v4864_v30  ;;  %10085 = vmatpush3.bf16.msra.mxu1 %v11934_v54  ;;  %v10743_v31 = vld [vmem:[%s13531_s22 + $0x400] sm:$0xff]  }
 0x1f2   :  { %v12011_v14 = vpack.c.bf16 %v4863_v32, %v4862_v43  ;;  %v9447_v38 = vpop.f32.mrb[132].mxu0 }
 0x1f3   :  { %v3224_v7 = vadd.f32 %v11866_v27, %v9447_v38  ;;  %v3215_v40 = vpop.f32.mrb[133].mxu0 }
 0x1f4   :  { %v3216_v54 = vadd.f32 %v11866_v27, %v3215_v40  ;;  %v9448_v42 = vpop.f32.mrb[134].mxu0  ;;  %5600 = vmatmul.mubr.f32.vlgmr.msra.gmra.mrb[120].mxu1 %v5252_v36 }
 0x1f5   :  { %v3227_v45 = vadd.f32 %v11866_v27, %v9448_v42  ;;  %v3218_v47 = vpop.f32.mrb[135].mxu0  ;;  %5604 = vmatprep.mubr.f32.mxu1 %v5285_v39  ;;  %v4868_v52 = vmax.f32 %v3224_v7, 0.0 }
 0x1f6   :  { %v3219_v15 = vadd.f32 %v11866_v27, %v3218_v47  ;;  %v4866_v55 = vmax.f32 %v3216_v54, 0.0  ;;  %v10744_v47 = vld [vmem:[%s13531_s22 + $0x408] sm:$0xff]  }
 0x1f7   :  { %v4869_v53 = vmax.f32 %v3227_v45, 0.0  ;;  %9554 = vmatmul.mubr.msk.bf16.gmra.mrb[240].mxu0 %vm1880_vm0, %v10736_v41 }
 0x1f8   :  { %v4867_v56 = vmax.f32 %v3219_v15, 0.0  ;;  %9557 = vmatprep.mubr.msk.bf16.mxu0 %vm1880_vm0, %v10737_v44  ;;  %5605 = vmatmul.mubr.f32.gmra.mrb[122].mxu1 %v5284_v48 }
 0x1f9   :  { %v12034_v6 = vpack.c.bf16 %v4869_v53, %v4868_v52  ;;  %5674 = vmatprep.mubr.f32.mxu1 %v5255_v49  ;;  %v10745_v49 = vld [vmem:[%s13531_s22 + $0x410] sm:$0xff]  }
 0x1fa   :  { %v12036_v0 = vpack.c.bf16 %v4867_v56, %v4866_v55  ;;  %v9451_v57 = vpop.f32.mrb[136].mxu0 }
 0x1fb   :  { %v3240_v58 = vadd.f32 %v11866_v27, %v9451_v57  ;;  %v3231_v25 = vpop.f32.mrb[137].mxu0 }
 0x1fc   :  { %v3232_v61 = vadd.f32 %v11866_v27, %v3231_v25  ;;  %v9452_v62 = vpop.f32.mrb[138].mxu0 }
 0x1fd   :  { %v3243_v2 = vadd.f32 %v11866_v27, %v9452_v62  ;;  %v3234_v51 = vpop.f32.mrb[139].mxu0  ;;  %v4872_v4 = vmax.f32 %v3240_v58, 0.0 }
 0x1fe   :  { %v3235_v3 = vadd.f32 %v11866_v27, %v3234_v51  ;;  %v4870_v8 = vmax.f32 %v3232_v61, 0.0 }
 0x1ff   :  { %v4873_v5 = vmax.f32 %v3243_v2, 0.0  ;;  %9558 = vmatmul.mubr.msk.bf16.gmra.mrb[244].mxu0 %vm1880_vm0, %v10738_v59 }
 0x200   :  { %v4871_v9 = vmax.f32 %v3235_v3, 0.0  ;;  %9561 = vmatprep.mubr.msk.bf16.mxu0 %vm1880_vm0, %v10739_v1 }
 0x201   :  { %v12050_v17 = vpack.c.bf16 %v4873_v5, %v4872_v4  ;;  %v10747_v4 = vld [vmem:[%s13531_s22 + $0x420] sm:$0xff]  }
 0x202   :  { %v12052_v18 = vpack.c.bf16 %v4871_v9, %v4870_v8  ;;  %v9455_v10 = vpop.f32.mrb[140].mxu0 }
 0x203   :  { %v3256_v11 = vadd.f32 %v11866_v27, %v9455_v10  ;;  %v3247_v60 = vpop.f32.mrb[141].mxu0 }
 0x204   :  { %v3248_v13 = vadd.f32 %v11866_v27, %v3247_v60  ;;  %v9456_v50 = vpop.f32.mrb[142].mxu0 }
 0x205   :  { %v3259_v19 = vadd.f32 %v11866_v27, %v9456_v50  ;;  %v3250_v20 = vpop.f32.mrb[143].mxu0  ;;  %v4876_v22 = vmax.f32 %v3256_v11, 0.0 }
 0x206   :  { %v3251_v21 = vadd.f32 %v11866_v27, %v3250_v20  ;;  %v4874_v23 = vmax.f32 %v3248_v13, 0.0 }
 0x207   :  { %v4877_v46 = vmax.f32 %v3259_v19, 0.0  ;;  %9562 = vmatmul.mubr.msk.bf16.gmra.mrb[248].mxu0 %vm1880_vm0, %v10740_v12 }
 0x208   :  { %v4875_v34 = vmax.f32 %v3251_v21, 0.0  ;;  %9565 = vmatprep.mubr.msk.bf16.mxu0 %vm1880_vm0, %v10741_v16 }
 0x209   :  { %v12066_v33 = vpack.c.bf16 %v4877_v46, %v4876_v22  ;;  %v10749_v22 = vld [vmem:[%s13531_s22 + $0x430] sm:$0xff]  }
 0x20a   :  { %v12068_v24 = vpack.c.bf16 %v4875_v34, %v4874_v23  ;;  %v9459_v26 = vpop.f32.mrb[144].mxu0 }
 0x20b   :  { %v3272_v28 = vadd.f32 %v11866_v27, %v9459_v26  ;;  %v3263_v37 = vpop.f32.mrb[145].mxu0 }
 0x20c   :  { %v3264_v63 = vadd.f32 %v11866_v27, %v3263_v37  ;;  %v9460_v30 = vpop.f32.mrb[146].mxu0 }
 0x20d   :  { %v3275_v43 = vadd.f32 %v11866_v27, %v9460_v30  ;;  %v3266_v32 = vpop.f32.mrb[147].mxu0  ;;  %v4880_v38 = vmax.f32 %v3272_v28, 0.0 }
 0x20e   :  { %v3267_v36 = vadd.f32 %v11866_v27, %v3266_v32  ;;  %v4878_v7 = vmax.f32 %v3264_v63, 0.0 }
 0x20f   :  { %v4881_v39 = vmax.f32 %v3275_v43, 0.0  ;;  %9566 = vmatmul.mubr.msk.bf16.gmra.mrb[252].mxu0 %vm1880_vm0, %v10742_v29 }
 0x210   :  { %v4879_v40 = vmax.f32 %v3267_v36, 0.0  ;;  %9569 = vmatprep.mubr.msk.bf16.mxu0 %vm1880_vm0, %v10743_v31 }
 0x211   :  { %v10090_v41 = vpack.c.bf16 %v4881_v39, %v4880_v38  ;;  %v10751_v38 = vld [vmem:[%s13531_s22 + $0x440] sm:$0xff]  }
 0x212   :  { %v9463_v54 = vpop.f32.mrb[148].mxu0  ;;  %v10086_v42 = vpack.c.bf16 %v4879_v40, %v4878_v7  ;;  %v9719_v7 = vpop.f32.mrb[0].mxu1 }
 0x213   :  { %v3288_v44 = vadd.f32 %v11866_v27, %v9463_v54  ;;  %v3279_v45 = vpop.f32.mrb[149].mxu0 }
 0x214   :  { %v3280_v48 = vadd.f32 %v11866_v27, %v3279_v45  ;;  %v9464_v15 = vpop.f32.mrb[150].mxu0  ;;  %10087 = vmatprep.subr.bf16.mxu1 %v10086_v42 }
 0x215   :  { %v3291_v52 = vadd.f32 %v11866_v27, %v9464_v15  ;;  %v3282_v53 = vpop.f32.mrb[151].mxu0  ;;  %10089 = vmatpush3.bf16.msra.mxu1 %v12011_v14  ;;  %v4884_v56 = vmax.f32 %v3288_v44, 0.0  ;;  %v10746_v14 = vld [vmem:[%s13531_s22 + $0x418] sm:$0xff]  }
 0x216   :  { %v3283_v55 = vadd.f32 %v11866_v27, %v3282_v53  ;;  %10091 = vmatprep.subr.bf16.mxu1 %v10090_v41  ;;  %v4882_v58 = vmax.f32 %v3280_v48, 0.0  ;;  %v4303_v41 = vpop.f32.mrb[1].mxu1 }
 0x217   :  { %v4885_v57 = vmax.f32 %v3291_v52, 0.0  ;;  %9570 = vmatmul.mubr.msk.bf16.gmra.mrb[0].mxu0 %vm1880_vm0, %v10744_v47  ;;  %v9720_v44 = vpop.f32.mrb[2].mxu1  ;;  %v4304_v52 = vadd.f32 %v11866_v27, %v4303_v41 }
 0x218   :  { %v4883_v25 = vmax.f32 %v3283_v55, 0.0  ;;  %9573 = vmatprep.mubr.msk.bf16.mxu0 %vm1880_vm0, %v10745_v49  ;;  %v4306_v48 = vpop.f32.mrb[3].mxu1  ;;  %v4312_v49 = vadd.f32 %v11866_v27, %v9719_v7  ;;  %v4315_v53 = vadd.f32 %v11866_v27, %v9720_v44 }
 0x219   :  { %v10098_v59 = vpack.c.bf16 %v4885_v57, %v4884_v56  ;;  %10093 = vmatpush3.bf16.msra.mxu1 %v12005_v35  ;;  %v5287_v57 = vld [vmem:[%s13508_s3 + $0x148] sm:$0xff] }
 0x21a   :  { %v10094_v61 = vpack.c.bf16 %v4883_v25, %v4882_v58  ;;  %v9467_v62 = vpop.f32.mrb[152].mxu0  ;;  %v4307_v58 = vadd.f32 %v11866_v27, %v4306_v48 }
 0x21b   :  { %v3304_v1 = vadd.f32 %v11866_v27, %v9467_v62  ;;  %v3295_v2 = vpop.f32.mrb[153].mxu0  ;;  %v5138_v62 = vmax.f32 %v4304_v52, 0.0 }
 0x21c   :  { %v3296_v51 = vadd.f32 %v11866_v27, %v3295_v2  ;;  %v9468_v3 = vpop.f32.mrb[154].mxu0  ;;  %10095 = vmatprep.subr.bf16.mxu1 %v10094_v61  ;;  %v5140_v61 = vmax.f32 %v4312_v49, 0.0 }
 0x21d   :  { %v3307_v5 = vadd.f32 %v11866_v27, %v9468_v3  ;;  %v3298_v35 = vpop.f32.mrb[155].mxu0  ;;  %10097 = vmatpush3.bf16.msra.mxu1 %v12036_v0  ;;  %v4888_v9 = vmax.f32 %v3304_v1, 0.0  ;;  %v10748_v0 = vld [vmem:[%s13531_s22 + $0x428] sm:$0xff]   ;;  %v5141_v1 = vmax.f32 %v4315_v53, 0.0  ;;  %v5139_v3 = vmax.f32 %v4307_v58, 0.0 }
 0x21e   :  { %v3299_v8 = vadd.f32 %v11866_v27, %v3298_v35  ;;  %10099 = vmatprep.subr.bf16.mxu1 %v10098_v59  ;;  %v4886_v11 = vmax.f32 %v3296_v51, 0.0  ;;  %v10752_v59 = vld [vmem:[%s13531_s22 + $0x448] sm:$0xff]   ;;  %v10753_v51 = vld [vmem:[%s13531_s22 + $0x450] sm:$0xff]   ;;  %v5286_v35 = vld [vmem:[%s13508_s3 + $0x140] sm:$0xff] }
 0x21f   :  { %v4889_v10 = vmax.f32 %v3307_v5, 0.0  ;;  %9574 = vmatmul.mubr.msk.bf16.gmra.mrb[4].mxu0 %vm1880_vm0, %v10746_v14 }
 0x220   :  { %v4887_v60 = vmax.f32 %v3299_v8, 0.0  ;;  %9577 = vmatprep.mubr.msk.bf16.mxu0 %vm1880_vm0, %v10747_v4  ;;  %v12164_v8 = vpack.c.bf16 %v5141_v1, %v5140_v61  ;;  %v10756_v61 = vld [vmem:[%s13531_s22 + $0x468] sm:$0xff]  }
 0x221   :  { %v10106_v12 = vpack.c.bf16 %v4889_v10, %v4888_v9  ;;  %10101 = vmatpush3.bf16.msra.mxu1 %v12034_v6  ;;  %v9723_v9 = vpop.f32.mrb[4].mxu1 }
 0x222   :  { %v10102_v13 = vpack.c.bf16 %v4887_v60, %v4886_v11  ;;  %v9471_v50 = vpop.f32.mrb[156].mxu0  ;;  %v5257_v11 = vld [vmem:[%s13508_s3 + $0x58] sm:$0xff]  ;;  %v12170_v60 = vpack.c.bf16 %v5139_v3, %v5138_v62  ;;  %v10757_v3 = vld [vmem:[%s13531_s22 + $0x470] sm:$0xff]  }
 0x223   :  { %v3320_v16 = vadd.f32 %v11866_v27, %v9471_v50  ;;  %v3311_v19 = vpop.f32.mrb[157].mxu0 }
 0x224   :  { %v3312_v20 = vadd.f32 %v11866_v27, %v3311_v19  ;;  %v9472_v21 = vpop.f32.mrb[158].mxu0  ;;  %10103 = vmatprep.subr.bf16.mxu1 %v10102_v13 }
 0x225   :  { %v3323_v46 = vadd.f32 %v11866_v27, %v9472_v21  ;;  %v3314_v6 = vpop.f32.mrb[159].mxu0  ;;  %10105 = vmatpush3.bf16.msra.mxu1 %v12052_v18  ;;  %v4892_v34 = vmax.f32 %v3320_v16, 0.0  ;;  %v10750_v18 = vld [vmem:[%s13531_s22 + $0x438] sm:$0xff]  }
 0x226   :  { %v3315_v23 = vadd.f32 %v11866_v27, %v3314_v6  ;;  %10107 = vmatprep.subr.bf16.mxu1 %v10106_v12  ;;  %v4890_v28 = vmax.f32 %v3312_v20, 0.0  ;;  %v4319_v12 = vpop.f32.mrb[5].mxu1 }
 0x227   :  { %v4893_v26 = vmax.f32 %v3323_v46, 0.0  ;;  %9578 = vmatmul.mubr.msk.bf16.gmra.mrb[8].mxu0 %vm1880_vm0, %v10748_v0  ;;  %v9724_v16 = vpop.f32.mrb[6].mxu1  ;;  %v4320_v46 = vadd.f32 %v11866_v27, %v4319_v12 }
 0x228   :  { %v4891_v37 = vmax.f32 %v3315_v23, 0.0  ;;  %9581 = vmatprep.mubr.msk.bf16.mxu0 %vm1880_vm0, %v10749_v22  ;;  %v4322_v20 = vpop.f32.mrb[7].mxu1  ;;  %v4328_v22 = vadd.f32 %v11866_v27, %v9723_v9  ;;  %v4331_v6 = vadd.f32 %v11866_v27, %v9724_v16 }
 0x229   :  { %v10114_v29 = vpack.c.bf16 %v4893_v26, %v4892_v34  ;;  %10109 = vmatpush3.bf16.msra.mxu1 %v12050_v17  ;;  %v4323_v26 = vadd.f32 %v11866_v27, %v4322_v20  ;;  %v9727_v7 = vpop.f32.mrb[8].mxu1 }
 0x22a   :  { %v10110_v63 = vpack.c.bf16 %v4891_v37, %v4890_v28  ;;  %v9475_v30 = vpop.f32.mrb[160].mxu0  ;;  %v4344_v52 = vadd.f32 %v11866_v27, %v9727_v7 }
 0x22b   :  { %v3336_v31 = vadd.f32 %v11866_v27, %v9475_v30  ;;  %v3327_v43 = vpop.f32.mrb[161].mxu0  ;;  %v5142_v30 = vmax.f32 %v4320_v46, 0.0 }
 0x22c   :  { %v3328_v32 = vadd.f32 %v11866_v27, %v3327_v43  ;;  %v9476_v36 = vpop.f32.mrb[162].mxu0  ;;  %10111 = vmatprep.subr.bf16.mxu1 %v10110_v63  ;;  %v5144_v63 = vmax.f32 %v4328_v22, 0.0  ;;  %v5148_v62 = vmax.f32 %v4344_v52, 0.0 }
 0x22d   :  { %v3339_v39 = vadd.f32 %v11866_v27, %v9476_v36  ;;  %v3330_v17 = vpop.f32.mrb[163].mxu0  ;;  %10113 = vmatpush3.bf16.msra.mxu1 %v12068_v24  ;;  %v4896_v54 = vmax.f32 %v3336_v31, 0.0  ;;  %v5254_v24 = vld [vmem:[%s13508_s3 + $0x40] sm:$0xff]  ;;  %v5145_v31 = vmax.f32 %v4331_v6, 0.0  ;;  %v5143_v36 = vmax.f32 %v4323_v26, 0.0 }
 0x22e   :  { %v3331_v40 = vadd.f32 %v11866_v27, %v3330_v17  ;;  %10115 = vmatprep.subr.bf16.mxu1 %v10114_v29  ;;  %v4894_v45 = vmax.f32 %v3328_v32, 0.0  ;;  %v10754_v29 = vld [vmem:[%s13531_s22 + $0x458] sm:$0xff]   ;;  %v10755_v32 = vld [vmem:[%s13531_s22 + $0x460] sm:$0xff]  }
 0x22f   :  { %v4897_v42 = vmax.f32 %v3339_v39, 0.0  ;;  %9582 = vmatmul.mubr.msk.bf16.gmra.mrb[12].mxu0 %vm1880_vm0, %v10750_v18  ;;  %v12191_v17 = vpack.c.bf16 %v5145_v31, %v5144_v63  ;;  %v12194_v41 = vpack.c.bf16 %v5143_v36, %v5142_v30  ;;  %v10758_v31 = vld [vmem:[%s13531_s22 + $0x478] sm:$0xff]  }
 0x230   :  { %v4895_v47 = vmax.f32 %v3331_v40, 0.0  ;;  %9585 = vmatprep.mubr.msk.bf16.mxu0 %vm1880_vm0, %v10751_v38 }
 0x231   :  { %v12137_v15 = vpack.c.bf16 %v4897_v42, %v4896_v54  ;;  %10117 = vmatpush3.bf16.msra.mxu1 %v12066_v33  ;;  %v4335_v54 = vpop.f32.mrb[9].mxu1 }
 0x232   :  { %v12146_v55 = vpack.c.bf16 %v4895_v47, %v4894_v45  ;;  %v9479_v56 = vpop.f32.mrb[164].mxu0  ;;  %v9728_v45 = vpop.f32.mrb[10].mxu1  ;;  %v4336_v53 = vadd.f32 %v11866_v27, %v4335_v54 }
 0x233   :  { %v3352_v33 = vadd.f32 %v11866_v27, %v9479_v56  ;;  %v3343_v25 = vpop.f32.mrb[165].mxu0  ;;  %v4347_v56 = vadd.f32 %v11866_v27, %v9728_v45 }
 0x234   :  { %v3344_v2 = vadd.f32 %v11866_v27, %v3343_v25  ;;  %v9480_v14 = vpop.f32.mrb[166].mxu0  ;;  %5675 = vmatmul.mubr.f32.vlgmr.msra.gmra.mrb[124].mxu1 %v5254_v24  ;;  %v4338_v24 = vpop.f32.mrb[11].mxu1  ;;  %v5146_v1 = vmax.f32 %v4336_v53, 0.0 }
 0x235   :  { %v3355_v4 = vadd.f32 %v11866_v27, %v9480_v14  ;;  %v3346_v5 = vpop.f32.mrb[167].mxu0  ;;  %5679 = vmatprep.mubr.f32.mxu1 %v5287_v57  ;;  %v4900_v13 = vmax.f32 %v3352_v33, 0.0  ;;  %v4339_v33 = vadd.f32 %v11866_v27, %v4338_v24 }
 0x236   :  { %v3347_v10 = vadd.f32 %v11866_v27, %v3346_v5  ;;  %v4898_v19 = vmax.f32 %v3344_v2, 0.0  ;;  %v5149_v2 = vmax.f32 %v4347_v56, 0.0 }
 0x237   :  { %v4901_v50 = vmax.f32 %v3355_v4, 0.0  ;;  %9586 = vmatmul.mubr.msk.bf16.gmra.mrb[16].mxu0 %vm1880_vm0, %v10752_v59  ;;  %v5147_v4 = vmax.f32 %v4339_v33, 0.0 }
 0x238   :  { %v4899_v0 = vmax.f32 %v3347_v10, 0.0  ;;  %9589 = vmatprep.mubr.msk.bf16.mxu0 %vm1880_vm0, %v10753_v51  ;;  %5680 = vmatmul.mubr.f32.gmra.mrb[126].mxu1 %v5286_v35  ;;  %v12215_v9 = vpack.c.bf16 %v5149_v2, %v5148_v62  ;;  %v9731_v10 = vpop.f32.mrb[12].mxu1 }
 0x239   :  { %v12174_v21 = vpack.c.bf16 %v4901_v50, %v4900_v13  ;;  %5749 = vmatprep.mubr.f32.mxu1 %v5257_v11  ;;  %v12218_v12 = vpack.c.bf16 %v5147_v4, %v5146_v1  ;;  %v4351_v13 = vpop.f32.mrb[13].mxu1  ;;  %v4360_v6 = vadd.f32 %v11866_v27, %v9731_v10  ;;  %v10760_v4 = vld [vmem:[%s13531_s22 + $0x488] sm:$0xff]  }
 0x23a   :  { %v12179_v23 = vpack.c.bf16 %v4899_v0, %v4898_v19  ;;  %v9483_v34 = vpop.f32.mrb[168].mxu0  ;;  %v9732_v19 = vpop.f32.mrb[14].mxu1 }
 0x23b   :  { %v3368_v28 = vadd.f32 %v11866_v27, %v9483_v34  ;;  %v3359_v37 = vpop.f32.mrb[169].mxu0  ;;  %v4354_v22 = vpop.f32.mrb[15].mxu1  ;;  %v4352_v34 = vadd.f32 %v11866_v27, %v4351_v13  ;;  %v4363_v26 = vadd.f32 %v11866_v27, %v9732_v19 }
 0x23c   :  { %v3360_v43 = vadd.f32 %v11866_v27, %v3359_v37  ;;  %v9484_v18 = vpop.f32.mrb[170].mxu0 }
 0x23d   :  { %v3371_v38 = vadd.f32 %v11866_v27, %v9484_v18  ;;  %v3362_v39 = vpop.f32.mrb[171].mxu0  ;;  %v4904_v42 = vmax.f32 %v3368_v28, 0.0  ;;  %v5150_v18 = vmax.f32 %v4352_v34, 0.0 }
 0x23e   :  { %v3363_v40 = vadd.f32 %v11866_v27, %v3362_v39  ;;  %v4902_v47 = vmax.f32 %v3360_v43, 0.0  ;;  %v5152_v43 = vmax.f32 %v4360_v6, 0.0  ;;  %v10759_v39 = vld [vmem:[%s13531_s22 + $0x480] sm:$0xff]  }
 0x23f   :  { %v4905_v44 = vmax.f32 %v3371_v38, 0.0  ;;  %9590 = vmatmul.mubr.msk.bf16.gmra.mrb[20].mxu0 %vm1880_vm0, %v10754_v29  ;;  %v4355_v29 = vadd.f32 %v11866_v27, %v4354_v22 }
 0x240   :  { %v4903_v48 = vmax.f32 %v3363_v40, 0.0  ;;  %9593 = vmatprep.mubr.msk.bf16.mxu0 %vm1880_vm0, %v10755_v32  ;;  %v5153_v32 = vmax.f32 %v4363_v26, 0.0 }
 0x241   :  { %v12198_v49 = vpack.c.bf16 %v4905_v44, %v4904_v42  ;;  %v5151_v7 = vmax.f32 %v4355_v29, 0.0  ;;  %v9735_v44 = vpop.f32.mrb[16].mxu1 }
 0x242   :  { %v12203_v57 = vpack.c.bf16 %v4903_v48, %v4902_v47  ;;  %v9487_v58 = vpop.f32.mrb[172].mxu0  ;;  %v12239_v42 = vpack.c.bf16 %v5153_v32, %v5152_v43  ;;  %v4367_v48 = vpop.f32.mrb[17].mxu1 }
 0x243   :  { %v3384_v25 = vadd.f32 %v11866_v27, %v9487_v58  ;;  %v3375_v59 = vpop.f32.mrb[173].mxu0  ;;  %v12242_v47 = vpack.c.bf16 %v5151_v7, %v5150_v18  ;;  %v9736_v53 = vpop.f32.mrb[18].mxu1 }
 0x244   :  { %v3376_v14 = vadd.f32 %v11866_v27, %v3375_v59  ;;  %v9488_v51 = vpop.f32.mrb[174].mxu0  ;;  %v4370_v33 = vpop.f32.mrb[19].mxu1  ;;  %v4376_v59 = vadd.f32 %v11866_v27, %v9735_v44  ;;  %v4379_v62 = vadd.f32 %v11866_v27, %v9736_v53  ;;  %v10763_v53 = vld [vmem:[%s13531_s22 + $0x4a0] sm:$0xff]  }
 0x245   :  { %v3387_v5 = vadd.f32 %v11866_v27, %v9488_v51  ;;  %v3378_v35 = vpop.f32.mrb[175].mxu0  ;;  %v4908_v50 = vmax.f32 %v3384_v25, 0.0  ;;  %v9739_v22 = vpop.f32.mrb[20].mxu1 }
 0x246   :  { %v3379_v11 = vadd.f32 %v11866_v27, %v3378_v35  ;;  %v4906_v0 = vmax.f32 %v3376_v14, 0.0  ;;  %v4371_v14 = vadd.f32 %v11866_v27, %v4370_v33  ;;  %v5157_v10 = vmax.f32 %v4379_v62, 0.0  ;;  %v4383_v26 = vpop.f32.mrb[21].mxu1 }
 0x247   :  { %v4909_v16 = vmax.f32 %v3387_v5, 0.0  ;;  %9594 = vmatmul.mubr.msk.bf16.gmra.mrb[24].mxu0 %vm1880_vm0, %v10756_v61  ;;  %v4368_v61 = vadd.f32 %v11866_v27, %v4367_v48  ;;  %v5156_v5 = vmax.f32 %v4376_v59, 0.0 }
 0x248   :  { %v4907_v20 = vmax.f32 %v3379_v11, 0.0  ;;  %9597 = vmatprep.mubr.msk.bf16.mxu0 %vm1880_vm0, %v10757_v3 }
 0x249   :  { %v12222_v46 = vpack.c.bf16 %v4909_v16, %v4908_v50  ;;  %v5154_v35 = vmax.f32 %v4368_v61, 0.0  ;;  %v10761_v50 = vld [vmem:[%s13531_s22 + $0x490] sm:$0xff]   ;;  %v5155_v16 = vmax.f32 %v4371_v14, 0.0 }
 0x24a   :  { %v12227_v28 = vpack.c.bf16 %v4907_v20, %v4906_v0  ;;  %v9491_v37 = vpop.f32.mrb[176].mxu0  ;;  %v12260_v20 = vpack.c.bf16 %v5157_v10, %v5156_v5 }
 0x24b   :  { %v3400_v63 = vadd.f32 %v11866_v27, %v9491_v37  ;;  %v3391_v30 = vpop.f32.mrb[177].mxu0  ;;  %v12263_v34 = vpack.c.bf16 %v5155_v16, %v5154_v35 }
 0x24c   :  { %v3392_v36 = vadd.f32 %v11866_v27, %v3391_v30  ;;  %v9492_v38 = vpop.f32.mrb[178].mxu0 }
 0x24d   :  { %v3403_v40 = vadd.f32 %v11866_v27, %v9492_v38  ;;  %v3394_v54 = vpop.f32.mrb[179].mxu0  ;;  %v4912_v24 = vmax.f32 %v3400_v63, 0.0  ;;  %v9740_v63 = vpop.f32.mrb[22].mxu1 }
 0x24e   :  { %v3395_v45 = vadd.f32 %v11866_v27, %v3394_v54  ;;  %v4910_v56 = vmax.f32 %v3392_v36, 0.0  ;;  %v4386_v43 = vpop.f32.mrb[23].mxu1 }
 0x24f   :  { %v4913_v52 = vmax.f32 %v3403_v40, 0.0  ;;  %9598 = vmatmul.mubr.msk.bf16.gmra.mrb[28].mxu0 %vm1880_vm0, %v10758_v31  ;;  %v9743_v59 = vpop.f32.mrb[24].mxu1 }
 0x250   :  { %v4911_v58 = vmax.f32 %v3395_v45, 0.0  ;;  %9601 = vmatprep.mubr.msk.bf16.mxu0 %vm1880_vm0, %v10759_v39 }
 0x251   :  { %v10122_v25 = vpack.c.bf16 %v4913_v52, %v4912_v24 }
 0x252   :  { %v10118_v1 = vpack.c.bf16 %v4911_v58, %v4910_v56  ;;  %v9495_v2 = vpop.f32.mrb[180].mxu0 }
 0x253   :  { %v3416_v51 = vadd.f32 %v11866_v27, %v9495_v2  ;;  %v3407_v3 = vpop.f32.mrb[181].mxu0 }
 0x254   :  { %v3408_v11 = vadd.f32 %v11866_v27, %v3407_v3  ;;  %v9496_v13 = vpop.f32.mrb[182].mxu0  ;;  %10119 = vmatprep.subr.bf16.mxu1 %v10118_v1  ;;  %v4399_v1 = vpop.f32.mrb[25].mxu1 }
 0x255   :  { %v3419_v19 = vadd.f32 %v11866_v27, %v9496_v13  ;;  %v3410_v0 = vpop.f32.mrb[183].mxu0  ;;  %10121 = vmatpush3.bf16.msra.mxu1 %v12146_v55  ;;  %v4916_v37 = vmax.f32 %v3416_v51, 0.0  ;;  %v9744_v51 = vpop.f32.mrb[26].mxu1 }
 0x256   :  { %v3411_v6 = vadd.f32 %v11866_v27, %v3410_v0  ;;  %10123 = vmatprep.subr.bf16.mxu1 %v10122_v25  ;;  %v4914_v30 = vmax.f32 %v3408_v11, 0.0  ;;  %v12271_v27 = vld [vmem:[%s13532_s24] ss:$0 sm:$0xff]  ;;  %v4402_v5 = vpop.f32.mrb[27].mxu1 }
 0x257   :  { %v4917_v29 = vmax.f32 %v3419_v19, 0.0  ;;  %9602 = vmatmul.mubr.msk.bf16.gmra.mrb[32].mxu0 %vm1880_vm0, %v10760_v4  ;;  %v4392_v18 = vadd.f32 %v12271_v27, %v9739_v22  ;;  %v4384_v32 = vadd.f32 %v12271_v27, %v4383_v26  ;;  %v4395_v36 = vadd.f32 %v12271_v27, %v9740_v63  ;;  %v10764_v22 = vld [vmem:[%s13531_s22 + $0x4a8] sm:$0xff]   ;;  %v10765_v63 = vld [vmem:[%s13531_s22 + $0x4b0] sm:$0xff]  }
 0x258   :  { %v4915_v31 = vmax.f32 %v3411_v6, 0.0  ;;  %9605 = vmatprep.mubr.msk.bf16.mxu0 %vm1880_vm0, %v10761_v50  ;;  %v4387_v7 = vadd.f32 %v12271_v27, %v4386_v43  ;;  %v4408_v35 = vadd.f32 %v12271_v27, %v9743_v59  ;;  %v4400_v10 = vadd.f32 %v12271_v27, %v4399_v1  ;;  %v10766_v59 = vld [vmem:[%s13531_s22 + $0x4b8] sm:$0xff]  }
 0x259   :  { %v10130_v55 = vpack.c.bf16 %v4917_v29, %v4916_v37  ;;  %10125 = vmatpush3.bf16.msra.mxu1 %v12137_v15  ;;  %v10762_v15 = vld [vmem:[%s13531_s22 + $0x498] sm:$0xff]   ;;  %v5160_v44 = vmax.f32 %v4392_v18, 0.0  ;;  %v5158_v45 = vmax.f32 %v4384_v32, 0.0  ;;  %v5161_v48 = vmax.f32 %v4395_v36, 0.0  ;;  %v9747_v18 = vpop.f32.mrb[28].mxu1 }
 0x25a   :  { %v10126_v38 = vpack.c.bf16 %v4915_v31, %v4914_v30  ;;  %v9499_v39 = vpop.f32.mrb[184].mxu0  ;;  %v5159_v56 = vmax.f32 %v4387_v7, 0.0  ;;  %v4411_v11 = vadd.f32 %v12271_v27, %v9744_v51  ;;  %v4403_v16 = vadd.f32 %v12271_v27, %v4402_v5  ;;  %v10767_v51 = vld [vmem:[%s13531_s22 + $0x4c0] sm:$0xff]  }
 0x25b   :  { %v3432_v40 = vadd.f32 %v12271_v27, %v9499_v39  ;;  %v3423_v54 = vpop.f32.mrb[185].mxu0  ;;  %v12287_v25 = vpack.c.bf16 %v5161_v48, %v5160_v44  ;;  %v5164_v6 = vmax.f32 %v4408_v35, 0.0  ;;  %v5162_v26 = vmax.f32 %v4400_v10, 0.0 }
 0x25c   :  { %v3424_v24 = vadd.f32 %v12271_v27, %v3423_v54  ;;  %v9500_v52 = vpop.f32.mrb[186].mxu0  ;;  %10127 = vmatprep.subr.bf16.mxu1 %v10126_v38  ;;  %v12290_v62 = vpack.c.bf16 %v5159_v56, %v5158_v45  ;;  %v5163_v30 = vmax.f32 %v4403_v16, 0.0  ;;  %v4415_v38 = vpop.f32.mrb[29].mxu1  ;;  %v4424_v45 = vadd.f32 %v12271_v27, %v9747_v18 }
 0x25d   :  { %v3435_v58 = vadd.f32 %v12271_v27, %v9500_v52  ;;  %v3426_v33 = vpop.f32.mrb[187].mxu0  ;;  %10129 = vmatpush3.bf16.msra.mxu1 %v12179_v23  ;;  %v4920_v2 = vmax.f32 %v3432_v40, 0.0  ;;  %v9748_v40 = vpop.f32.mrb[30].mxu1  ;;  %v4416_v48 = vadd.f32 %v12271_v27, %v4415_v38 }
 0x25e   :  { %v3427_v61 = vadd.f32 %v12271_v27, %v3426_v33  ;;  %10131 = vmatprep.subr.bf16.mxu1 %v10130_v55  ;;  %v4918_v3 = vmax.f32 %v3424_v24, 0.0  ;;  %v12312_v36 = vpack.c.bf16 %v5163_v30, %v5162_v26  ;;  %v4418_v44 = vpop.f32.mrb[31].mxu1  ;;  %v4427_v24 = vadd.f32 %v12271_v27, %v9748_v40  ;;  %v5256_v26 = vld [vmem:[%s13508_s3 + $0x50] sm:$0xff] }
 0x25f   :  { %v4921_v14 = vmax.f32 %v3435_v58, 0.0  ;;  %9606 = vmatmul.mubr.msk.bf16.gmra.mrb[36].mxu0 %vm1880_vm0, %v10762_v15  ;;  %v4419_v56 = vadd.f32 %v12271_v27, %v4418_v44  ;;  %v5166_v1 = vmax.f32 %v4416_v48, 0.0  ;;  %v9751_v35 = vpop.f32.mrb[32].mxu1  ;;  %v5288_v48 = vld [vmem:[%s13508_s3 + $0x150] sm:$0xff] }
 0x260   :  { %v4919_v4 = vmax.f32 %v3427_v61, 0.0  ;;  %9609 = vmatprep.mubr.msk.bf16.mxu0 %vm1880_vm0, %v10763_v53  ;;  %v5168_v61 = vmax.f32 %v4424_v45, 0.0 }
 0x261   :  { %v10138_v23 = vpack.c.bf16 %v4921_v14, %v4920_v2  ;;  %10133 = vmatpush3.bf16.msra.mxu1 %v12174_v21  ;;  %v5165_v21 = vmax.f32 %v4411_v11, 0.0 }
 0x262   :  { %v10134_v13 = vpack.c.bf16 %v4919_v4, %v4918_v3  ;;  %v9503_v50 = vpop.f32.mrb[188].mxu0  ;;  %v5167_v3 = vmax.f32 %v4419_v56, 0.0  ;;  %v5259_v56 = vld [vmem:[%s13508_s3 + $0x68] sm:$0xff] }
 0x263   :  { %v3448_v19 = vadd.f32 %v12271_v27, %v9503_v50  ;;  %v3439_v0 = vpop.f32.mrb[189].mxu0  ;;  %v12309_v55 = vpack.c.bf16 %v5165_v21, %v5164_v6  ;;  %v4440_v21 = vadd.f32 %v12271_v27, %v9751_v35 }
 0x264   :  { %v3440_v37 = vadd.f32 %v12271_v27, %v3439_v0  ;;  %v9504_v29 = vpop.f32.mrb[190].mxu0  ;;  %10135 = vmatprep.subr.bf16.mxu1 %v10134_v13  ;;  %v12334_v11 = vpack.c.bf16 %v5167_v3, %v5166_v1  ;;  %v4431_v13 = vpop.f32.mrb[33].mxu1 }
 0x265   :  { %v3451_v31 = vadd.f32 %v12271_v27, %v9504_v29  ;;  %v3442_v43 = vpop.f32.mrb[191].mxu0  ;;  %10137 = vmatpush3.bf16.msra.mxu1 %v12203_v57  ;;  %v4924_v39 = vmax.f32 %v3448_v19, 0.0  ;;  %v9752_v19 = vpop.f32.mrb[34].mxu1  ;;  %v5172_v38 = vmax.f32 %v4440_v21, 0.0 }
 0x266   :  { %v3443_v32 = vadd.f32 %v12271_v27, %v3442_v43  ;;  %10139 = vmatprep.subr.bf16.mxu1 %v10138_v23  ;;  %v4922_v54 = vmax.f32 %v3440_v37, 0.0  ;;  %v4434_v6 = vpop.f32.mrb[35].mxu1  ;;  %v4432_v37 = vadd.f32 %v12271_v27, %v4431_v13  ;;  %v4443_v29 = vadd.f32 %v12271_v27, %v9752_v19  ;;  %v10770_v19 = vld [vmem:[%s13531_s22 + $0x4d8] sm:$0xff]  }
 0x267   :  { %v4925_v7 = vmax.f32 %v3451_v31, 0.0  ;;  %9610 = vmatmul.mubr.msk.bf16.gmra.mrb[40].mxu0 %vm1880_vm0, %v10764_v22  ;;  %v5289_v31 = vld [vmem:[%s13508_s3 + $0x158] sm:$0xff]  ;;  %v4435_v43 = vadd.f32 %v12271_v27, %v4434_v6 }
 0x268   :  { %v4923_v15 = vmax.f32 %v3443_v32, 0.0  ;;  %9613 = vmatprep.mubr.msk.bf16.mxu0 %vm1880_vm0, %v10765_v63  ;;  %v10768_v32 = vld [vmem:[%s13531_s22 + $0x4c8] sm:$0xff]  }
 0x269   :  { %v10146_v57 = vpack.c.bf16 %v4925_v7, %v4924_v39  ;;  %10141 = vmatpush3.bf16.msra.mxu1 %v12198_v49  ;;  %v5169_v49 = vmax.f32 %v4427_v24, 0.0  ;;  %v5170_v39 = vmax.f32 %v4432_v37, 0.0  ;;  %v5173_v7 = vmax.f32 %v4443_v29, 0.0  ;;  %v10771_v37 = vld [vmem:[%s13531_s22 + $0x4e0] sm:$0xff]  }
 0x26a   :  { %v10142_v52 = vpack.c.bf16 %v4923_v15, %v4922_v54  ;;  %v9507_v53 = vpop.f32.mrb[192].mxu0  ;;  %v10769_v15 = vld [vmem:[%s13531_s22 + $0x4d0] sm:$0xff]   ;;  %v5171_v44 = vmax.f32 %v4435_v43, 0.0 }
 0x26b   :  { %v3464_v58 = vadd.f32 %v12271_v27, %v9507_v53  ;;  %v3455_v33 = vpop.f32.mrb[193].mxu0  ;;  %v12331_v23 = vpack.c.bf16 %v5169_v49, %v5168_v61  ;;  %v12365_v24 = vpack.c.bf16 %v5173_v7, %v5172_v38 }
 0x26c   :  { %v3456_v2 = vadd.f32 %v12271_v27, %v3455_v33  ;;  %v9508_v14 = vpop.f32.mrb[194].mxu0  ;;  %10143 = vmatprep.subr.bf16.mxu1 %v10142_v52  ;;  %v9755_v52 = vpop.f32.mrb[36].mxu1 }
 0x26d   :  { %v3467_v4 = vadd.f32 %v12271_v27, %v9508_v14  ;;  %v3458_v5 = vpop.f32.mrb[195].mxu0  ;;  %10145 = vmatpush3.bf16.msra.mxu1 %v12227_v28  ;;  %v4928_v50 = vmax.f32 %v3464_v58, 0.0  ;;  %v12371_v58 = vpack.c.bf16 %v5171_v44, %v5170_v39  ;;  %v4447_v33 = vpop.f32.mrb[37].mxu1  ;;  %v4456_v3 = vadd.f32 %v12271_v27, %v9755_v52 }
 0x26e   :  { %v3459_v10 = vadd.f32 %v12271_v27, %v3458_v5  ;;  %10147 = vmatprep.subr.bf16.mxu1 %v10146_v57  ;;  %v4926_v0 = vmax.f32 %v3456_v2, 0.0  ;;  %v9756_v1 = vpop.f32.mrb[38].mxu1 }
 0x26f   :  { %v4929_v16 = vmax.f32 %v3467_v4, 0.0  ;;  %9614 = vmatmul.mubr.msk.bf16.gmra.mrb[44].mxu0 %vm1880_vm0, %v10766_v59  ;;  %v4450_v14 = vpop.f32.mrb[39].mxu1  ;;  %v4448_v4 = vadd.f32 %v12271_v27, %v4447_v33  ;;  %v4459_v5 = vadd.f32 %v12271_v27, %v9756_v1  ;;  %v10772_v1 = vld [vmem:[%s13531_s22 + $0x4e8] sm:$0xff]  }
 0x270   :  { %v4927_v22 = vmax.f32 %v3459_v10, 0.0  ;;  %9617 = vmatprep.mubr.msk.bf16.mxu0 %vm1880_vm0, %v10767_v51  ;;  %v4451_v13 = vadd.f32 %v12271_v27, %v4450_v14 }
 0x271   :  { %v12338_v28 = vpack.c.bf16 %v4929_v16, %v4928_v50  ;;  %10149 = vmatpush3.bf16.msra.mxu1 %v12222_v46  ;;  %v5177_v6 = vmax.f32 %v4459_v5, 0.0  ;;  %v10773_v5 = vld [vmem:[%s13531_s22 + $0x4f0] sm:$0xff]  }
 0x272   :  { %v12347_v63 = vpack.c.bf16 %v4927_v22, %v4926_v0  ;;  %v9511_v30 = vpop.f32.mrb[196].mxu0  ;;  %v5176_v0 = vmax.f32 %v4456_v3, 0.0  ;;  %v5174_v22 = vmax.f32 %v4448_v4, 0.0  ;;  %v5175_v29 = vmax.f32 %v4451_v13, 0.0 }
 0x273   :  { %v3480_v46 = vadd.f32 %v12271_v27, %v9511_v30  ;;  %v3471_v18 = vpop.f32.mrb[197].mxu0 }
 0x274   :  { %v3472_v40 = vadd.f32 %v12271_v27, %v3471_v18  ;;  %v9512_v54 = vpop.f32.mrb[198].mxu0  ;;  %5750 = vmatmul.mubr.f32.vlgmr.msra.gmra.mrb[128].mxu1 %v5256_v26  ;;  %v12392_v43 = vpack.c.bf16 %v5177_v6, %v5176_v0 }
 0x275   :  { %v3483_v57 = vadd.f32 %v12271_v27, %v9512_v54  ;;  %v3474_v45 = vpop.f32.mrb[199].mxu0  ;;  %5754 = vmatprep.mubr.f32.mxu1 %v5289_v31  ;;  %v4932_v59 = vmax.f32 %v3480_v46, 0.0  ;;  %v9759_v46 = vpop.f32.mrb[40].mxu1 }
 0x276   :  { %v3475_v53 = vadd.f32 %v12271_v27, %v3474_v45  ;;  %v4930_v49 = vmax.f32 %v3472_v40, 0.0  ;;  %v4463_v38 = vpop.f32.mrb[41].mxu1  ;;  %v4472_v45 = vadd.f32 %v12271_v27, %v9759_v46 }
 0x277   :  { %v4933_v61 = vmax.f32 %v3483_v57, 0.0  ;;  %9618 = vmatmul.mubr.msk.bf16.gmra.mrb[48].mxu0 %vm1880_vm0, %v10768_v32  ;;  %v12395_v32 = vpack.c.bf16 %v5175_v29, %v5174_v22  ;;  %v9760_v40 = vpop.f32.mrb[42].mxu1 }
 0x278   :  { %v4931_v2 = vmax.f32 %v3475_v53, 0.0  ;;  %9621 = vmatprep.mubr.msk.bf16.mxu0 %vm1880_vm0, %v10769_v15  ;;  %5755 = vmatmul.mubr.f32.gmra.mrb[130].mxu1 %v5288_v48  ;;  %v4466_v44 = vpop.f32.mrb[43].mxu1  ;;  %v4464_v48 = vadd.f32 %v12271_v27, %v4463_v38  ;;  %v4475_v52 = vadd.f32 %v12271_v27, %v9760_v40 }
 0x279   :  { %v12375_v51 = vpack.c.bf16 %v4933_v61, %v4932_v59  ;;  %5824 = vmatprep.mubr.f32.mxu1 %v5259_v56  ;;  %v4467_v33 = vadd.f32 %v12271_v27, %v4466_v44 }
 0x27a   :  { %v12380_v35 = vpack.c.bf16 %v4931_v2, %v4930_v49  ;;  %v9515_v10 = vpop.f32.mrb[200].mxu0  ;;  %v5180_v49 = vmax.f32 %v4472_v45, 0.0  ;;  %v5178_v2 = vmax.f32 %v4464_v48, 0.0  ;;  %v5181_v14 = vmax.f32 %v4475_v52, 0.0  ;;  %v10774_v45 = vld [vmem:[%s13531_s22 + $0x4f8] sm:$0xff]  }
 0x27b   :  { %v3496_v50 = vadd.f32 %v12271_v27, %v9515_v10  ;;  %v3487_v16 = vpop.f32.mrb[201].mxu0  ;;  %v5179_v10 = vmax.f32 %v4467_v33, 0.0 }
 0x27c   :  { %v3488_v26 = vadd.f32 %v12271_v27, %v3487_v16  ;;  %v9516_v21 = vpop.f32.mrb[202].mxu0  ;;  %v12416_v16 = vpack.c.bf16 %v5181_v14, %v5180_v49 }
 0x27d   :  { %v3499_v30 = vadd.f32 %v12271_v27, %v9516_v21  ;;  %v3490_v31 = vpop.f32.mrb[203].mxu0  ;;  %v4936_v39 = vmax.f32 %v3496_v50, 0.0  ;;  %v12419_v22 = vpack.c.bf16 %v5179_v10, %v5178_v2 }
 0x27e   :  { %v3491_v18 = vadd.f32 %v12271_v27, %v3490_v31  ;;  %v4934_v54 = vmax.f32 %v3488_v26, 0.0 }
 0x27f   :  { %v4937_v7 = vmax.f32 %v3499_v30, 0.0  ;;  %9622 = vmatmul.mubr.msk.bf16.gmra.mrb[52].mxu0 %vm1880_vm0, %v10770_v19  ;;  %v9763_v19 = vpop.f32.mrb[44].mxu1 }
 0x280   :  { %v4935_v15 = vmax.f32 %v3491_v18, 0.0  ;;  %9625 = vmatprep.mubr.msk.bf16.mxu0 %vm1880_vm0, %v10771_v37  ;;  %v4479_v6 = vpop.f32.mrb[45].mxu1  ;;  %v4488_v18 = vadd.f32 %v12271_v27, %v9763_v19 }
 0x281   :  { %v12399_v57 = vpack.c.bf16 %v4937_v7, %v4936_v39  ;;  %v9764_v37 = vpop.f32.mrb[46].mxu1  ;;  %v4480_v38 = vadd.f32 %v12271_v27, %v4479_v6 }
 0x282   :  { %v12404_v53 = vpack.c.bf16 %v4935_v15, %v4934_v54  ;;  %v9519_v56 = vpop.f32.mrb[204].mxu0  ;;  %v4482_v31 = vpop.f32.mrb[47].mxu1  ;;  %v4491_v39 = vadd.f32 %v12271_v27, %v9764_v37  ;;  %v5184_v48 = vmax.f32 %v4488_v18, 0.0 }
 0x283   :  { %v3512_v59 = vadd.f32 %v12271_v27, %v9519_v56  ;;  %v3503_v61 = vpop.f32.mrb[205].mxu0  ;;  %v4483_v54 = vadd.f32 %v12271_v27, %v4482_v31  ;;  %v5182_v52 = vmax.f32 %v4480_v38, 0.0 }
 0x284   :  { %v3504_v3 = vadd.f32 %v12271_v27, %v3503_v61  ;;  %v9520_v4 = vpop.f32.mrb[206].mxu0  ;;  %v5185_v56 = vmax.f32 %v4491_v39, 0.0  ;;  %v10775_v61 = vld [vmem:[%s13531_s22 + $0x500] sm:$0xff]  }
 0x285   :  { %v3515_v13 = vadd.f32 %v12271_v27, %v9520_v4  ;;  %v3506_v50 = vpop.f32.mrb[207].mxu0  ;;  %v4940_v26 = vmax.f32 %v3512_v59, 0.0 }
 0x286   :  { %v3507_v0 = vadd.f32 %v12271_v27, %v3506_v50  ;;  %v4938_v29 = vmax.f32 %v3504_v3, 0.0  ;;  %v12440_v14 = vpack.c.bf16 %v5185_v56, %v5184_v48  ;;  %v9767_v3 = vpop.f32.mrb[48].mxu1  ;;  %v10777_v56 = vld [vmem:[%s13531_s22 + $0x510] sm:$0xff]  }
 0x287   :  { %v4941_v21 = vmax.f32 %v3515_v13, 0.0  ;;  %9626 = vmatmul.mubr.msk.bf16.gmra.mrb[56].mxu0 %vm1880_vm0, %v10772_v1  ;;  %v5183_v1 = vmax.f32 %v4483_v54, 0.0  ;;  %v4495_v10 = vpop.f32.mrb[49].mxu1  ;;  %v4504_v37 = vadd.f32 %v12271_v27, %v9767_v3  ;;  %v10776_v54 = vld [vmem:[%s13531_s22 + $0x508] sm:$0xff]  }
 0x288   :  { %v4939_v30 = vmax.f32 %v3507_v0, 0.0  ;;  %9629 = vmatprep.mubr.msk.bf16.mxu0 %vm1880_vm0, %v10773_v5  ;;  %v9768_v19 = vpop.f32.mrb[50].mxu1 }
 0x289   :  { %v12423_v46 = vpack.c.bf16 %v4941_v21, %v4940_v26  ;;  %v12443_v5 = vpack.c.bf16 %v5183_v1, %v5182_v52  ;;  %v4498_v26 = vpop.f32.mrb[51].mxu1 }
 0x28a   :  { %v12428_v7 = vpack.c.bf16 %v4939_v30, %v4938_v29  ;;  %v9523_v40 = vpop.f32.mrb[208].mxu0  ;;  %v4496_v29 = vadd.f32 %v12271_v27, %v4495_v10  ;;  %v4507_v30 = vadd.f32 %v12271_v27, %v9768_v19  ;;  %v4499_v38 = vadd.f32 %v12271_v27, %v4498_v26 }
 0x28b   :  { %v3528_v15 = vadd.f32 %v12271_v27, %v9523_v40  ;;  %v3519_v44 = vpop.f32.mrb[209].mxu0 }
 0x28c   :  { %v3520_v33 = vadd.f32 %v12271_v27, %v3519_v44  ;;  %v9524_v59 = vpop.f32.mrb[210].mxu0  ;;  %v5186_v44 = vmax.f32 %v4496_v29, 0.0 }
 0x28d   :  { %v3531_v49 = vadd.f32 %v12271_v27, %v9524_v59  ;;  %v3522_v2 = vpop.f32.mrb[211].mxu0  ;;  %v4944_v13 = vmax.f32 %v3528_v15, 0.0  ;;  %v5188_v15 = vmax.f32 %v4504_v37, 0.0 }
 0x28e   :  { %v3523_v4 = vadd.f32 %v12271_v27, %v3522_v2  ;;  %v4942_v0 = vmax.f32 %v3520_v33, 0.0  ;;  %v5187_v33 = vmax.f32 %v4499_v38, 0.0 }
 0x28f   :  { %v4945_v50 = vmax.f32 %v3531_v49, 0.0  ;;  %9630 = vmatmul.mubr.msk.bf16.gmra.mrb[60].mxu0 %vm1880_vm0, %v10774_v45  ;;  %v5189_v45 = vmax.f32 %v4507_v30, 0.0  ;;  %v9771_v49 = vpop.f32.mrb[52].mxu1 }
 0x290   :  { %v4943_v6 = vmax.f32 %v3523_v4, 0.0  ;;  %9633 = vmatprep.mubr.msk.bf16.mxu0 %vm1880_vm0, %v10775_v61  ;;  %v12464_v3 = vpack.c.bf16 %v5187_v33, %v5186_v44  ;;  %v4511_v4 = vpop.f32.mrb[53].mxu1  ;;  %v4520_v26 = vadd.f32 %v12271_v27, %v9771_v49 }
 0x291   :  { %v10154_v21 = vpack.c.bf16 %v4945_v50, %v4944_v13  ;;  %v12461_v1 = vpack.c.bf16 %v5189_v45, %v5188_v15  ;;  %v9772_v50 = vpop.f32.mrb[54].mxu1  ;;  %v10779_v45 = vld [vmem:[%s13531_s22 + $0x520] sm:$0xff]  }
 0x292   :  { %v10150_v31 = vpack.c.bf16 %v4943_v6, %v4942_v0  ;;  %v9527_v18 = vpop.f32.mrb[212].mxu0  ;;  %v4514_v6 = vpop.f32.mrb[55].mxu1  ;;  %v4523_v37 = vadd.f32 %v12271_v27, %v9772_v50 }
 0x293   :  { %v3544_v39 = vadd.f32 %v12271_v27, %v9527_v18  ;;  %v3535_v40 = vpop.f32.mrb[213].mxu0  ;;  %13533 = vst [vmem:[#allocation8_spill] sm:$0xff] %v12461_v1 }
 0x294   :  { %v3536_v48 = vadd.f32 %v12271_v27, %v3535_v40  ;;  %v9528_v52 = vpop.f32.mrb[214].mxu0  ;;  %10151 = vmatprep.subr.bf16.mxu1 %v10150_v31  ;;  %v4515_v31 = vadd.f32 %v12271_v27, %v4514_v6  ;;  %v5192_v40 = vmax.f32 %v4520_v26, 0.0 }
 0x295   :  { %v3547_v59 = vadd.f32 %v12271_v27, %v9528_v52  ;;  %v3538_v61 = vpop.f32.mrb[215].mxu0  ;;  %10153 = vmatpush3.bf16.msra.mxu1 %v12347_v63  ;;  %v4948_v10 = vmax.f32 %v3544_v39, 0.0  ;;  %v10778_v39 = vld [vmem:[%s13531_s22 + $0x518] sm:$0xff]  }
 0x296   :  { %v3539_v2 = vadd.f32 %v12271_v27, %v3538_v61  ;;  %10155 = vmatprep.subr.bf16.mxu1 %v10154_v21  ;;  %v4946_v19 = vmax.f32 %v3536_v48, 0.0  ;;  %v4512_v21 = vadd.f32 %v12271_v27, %v4511_v4  ;;  %v5191_v48 = vmax.f32 %v4515_v31, 0.0 }
 0x297   :  { %v4949_v13 = vmax.f32 %v3547_v59, 0.0  ;;  %9634 = vmatmul.mubr.msk.bf16.gmra.mrb[64].mxu0 %vm1880_vm0, %v10776_v54  ;;  %v9775_v59 = vpop.f32.mrb[56].mxu1 }
 0x298   :  { %v4947_v0 = vmax.f32 %v3539_v2, 0.0  ;;  %9637 = vmatprep.mubr.msk.bf16.mxu0 %vm1880_vm0, %v10777_v56  ;;  %v5190_v54 = vmax.f32 %v4512_v21, 0.0  ;;  %v4527_v2 = vpop.f32.mrb[57].mxu1  ;;  %v4536_v6 = vadd.f32 %v12271_v27, %v9775_v59 }
 0x299   :  { %v10162_v63 = vpack.c.bf16 %v4949_v13, %v4948_v10  ;;  %10157 = vmatpush3.bf16.msra.mxu1 %v12338_v28  ;;  %v5193_v28 = vmax.f32 %v4523_v37, 0.0  ;;  %v9776_v13 = vpop.f32.mrb[58].mxu1 }
 0x29a   :  { %v10158_v29 = vpack.c.bf16 %v4947_v0, %v4946_v19  ;;  %v9531_v30 = vpop.f32.mrb[216].mxu0  ;;  %v12486_v49 = vpack.c.bf16 %v5191_v48, %v5190_v54  ;;  %v4530_v0 = vpop.f32.mrb[59].mxu1  ;;  %v4539_v26 = vadd.f32 %v12271_v27, %v9776_v13 }
 0x29b   :  { %v3560_v18 = vadd.f32 %v12271_v27, %v9531_v30  ;;  %v3551_v38 = vpop.f32.mrb[217].mxu0  ;;  %v12483_v33 = vpack.c.bf16 %v5193_v28, %v5192_v40  ;;  %v10781_v28 = vld [vmem:[%s13531_s22 + $0x530] sm:$0xff]  }
 0x29c   :  { %v3552_v15 = vadd.f32 %v12271_v27, %v3551_v38  ;;  %v9532_v44 = vpop.f32.mrb[218].mxu0  ;;  %10159 = vmatprep.subr.bf16.mxu1 %v10158_v29  ;;  %13535 = vst [vmem:[#allocation10_spill] sm:$0xff] %v12486_v49  ;;  %v4531_v29 = vadd.f32 %v12271_v27, %v4530_v0  ;;  %v5196_v38 = vmax.f32 %v4536_v6, 0.0 }
 0x29d   :  { %v3563_v52 = vadd.f32 %v12271_v27, %v9532_v44  ;;  %v3554_v56 = vpop.f32.mrb[219].mxu0  ;;  %10161 = vmatpush3.bf16.msra.mxu1 %v12380_v35  ;;  %13534 = vst [vmem:[#allocation9_spill] sm:$0xff] %v12483_v33  ;;  %v4952_v4 = vmax.f32 %v3560_v18, 0.0  ;;  %v10780_v18 = vld [vmem:[%s13531_s22 + $0x528] sm:$0xff]  }
 0x29e   :  { %v3555_v61 = vadd.f32 %v12271_v27, %v3554_v56  ;;  %10163 = vmatprep.subr.bf16.mxu1 %v10162_v63  ;;  %v4950_v50 = vmax.f32 %v3552_v15, 0.0  ;;  %v4528_v63 = vadd.f32 %v12271_v27, %v4527_v2  ;;  %v5195_v15 = vmax.f32 %v4531_v29, 0.0 }
 0x29f   :  { %v4953_v10 = vmax.f32 %v3563_v52, 0.0  ;;  %9638 = vmatmul.mubr.msk.bf16.gmra.mrb[68].mxu0 %vm1880_vm0, %v10778_v39  ;;  %v9779_v52 = vpop.f32.mrb[60].mxu1 }
 0x2a0   :  { %v4951_v19 = vmax.f32 %v3555_v61, 0.0  ;;  %9641 = vmatprep.mubr.msk.bf16.mxu0 %vm1880_vm0, %v10779_v45  ;;  %v5194_v39 = vmax.f32 %v4528_v63, 0.0  ;;  %v4543_v61 = vpop.f32.mrb[61].mxu1  ;;  %v4552_v0 = vadd.f32 %v12271_v27, %v9779_v52 }
 0x2a1   :  { %v10170_v35 = vpack.c.bf16 %v4953_v10, %v4952_v4  ;;  %10165 = vmatpush3.bf16.msra.mxu1 %v12375_v51  ;;  %v5197_v51 = vmax.f32 %v4539_v26, 0.0  ;;  %v9780_v10 = vpop.f32.mrb[62].mxu1 }
 0x2a2   :  { %v10166_v21 = vpack.c.bf16 %v4951_v19, %v4950_v50  ;;  %v9535_v37 = vpop.f32.mrb[220].mxu0  ;;  %v12508_v59 = vpack.c.bf16 %v5195_v15, %v5194_v39  ;;  %v4546_v19 = vpop.f32.mrb[63].mxu1  ;;  %v4555_v6 = vadd.f32 %v12271_v27, %v9780_v10 }
 0x2a3   :  { %v3576_v30 = vadd.f32 %v12271_v27, %v9535_v37  ;;  %v3567_v31 = vpop.f32.mrb[221].mxu0  ;;  %v12505_v48 = vpack.c.bf16 %v5197_v51, %v5196_v38  ;;  %v10783_v51 = vld [vmem:[%s13531_s22 + $0x540] sm:$0xff]  }
 0x2a4   :  { %v3568_v40 = vadd.f32 %v12271_v27, %v3567_v31  ;;  %v9536_v54 = vpop.f32.mrb[222].mxu0  ;;  %10167 = vmatprep.subr.bf16.mxu1 %v10166_v21  ;;  %13537 = vst [vmem:[#allocation12_spill] sm:$0xff] %v12508_v59  ;;  %v4547_v21 = vadd.f32 %v12271_v27, %v4546_v19  ;;  %v5200_v31 = vmax.f32 %v4552_v0, 0.0  ;;  %v5258_v19 = vld [vmem:[%s13508_s3 + $0x60] sm:$0xff] }
 0x2a5   :  { %v3579_v44 = vadd.f32 %v12271_v27, %v9536_v54  ;;  %v3570_v45 = vpop.f32.mrb[223].mxu0  ;;  %10169 = vmatpush3.bf16.msra.mxu1 %v12404_v53  ;;  %13536 = vst [vmem:[#allocation11_spill] sm:$0xff] %v12505_v48  ;;  %v4956_v2 = vmax.f32 %v3576_v30, 0.0  ;;  %v10782_v30 = vld [vmem:[%s13531_s22 + $0x538] sm:$0xff]  }
 0x2a6   :  { %v3571_v56 = vadd.f32 %v12271_v27, %v3570_v45  ;;  %10171 = vmatprep.subr.bf16.mxu1 %v10170_v35  ;;  %v4954_v13 = vmax.f32 %v3568_v40, 0.0  ;;  %v4544_v35 = vadd.f32 %v12271_v27, %v4543_v61  ;;  %v5199_v40 = vmax.f32 %v4547_v21, 0.0 }
 0x2a7   :  { %v4957_v4 = vmax.f32 %v3579_v44, 0.0  ;;  %9642 = vmatmul.mubr.msk.bf16.gmra.mrb[72].mxu0 %vm1880_vm0, %v10780_v18  ;;  %v9783_v44 = vpop.f32.mrb[64].mxu1 }
 0x2a8   :  { %v4955_v50 = vmax.f32 %v3571_v56, 0.0  ;;  %9645 = vmatprep.mubr.msk.bf16.mxu0 %vm1880_vm0, %v10781_v28  ;;  %v5198_v18 = vmax.f32 %v4544_v35, 0.0  ;;  %v4559_v56 = vpop.f32.mrb[65].mxu1 }
 0x2a9   :  { %v10178_v53 = vpack.c.bf16 %v4957_v4, %v4956_v2  ;;  %10173 = vmatpush3.bf16.msra.mxu1 %v12399_v57  ;;  %v5201_v57 = vmax.f32 %v4555_v6, 0.0  ;;  %v9784_v4 = vpop.f32.mrb[66].mxu1  ;;  %v4560_v0 = vadd.f32 %v12271_v27, %v4559_v56 }
 0x2aa   :  { %v10174_v63 = vpack.c.bf16 %v4955_v50, %v4954_v13  ;;  %v9539_v26 = vpop.f32.mrb[224].mxu0  ;;  %v12530_v52 = vpack.c.bf16 %v5199_v40, %v5198_v18  ;;  %v4562_v50 = vpop.f32.mrb[67].mxu1  ;;  %v4571_v35 = vadd.f32 %v12271_v27, %v9784_v4 }
 0x2ab   :  { %v3592_v37 = vadd.f32 %v12271_v27, %v9539_v26  ;;  %v3583_v29 = vpop.f32.mrb[225].mxu0  ;;  %v12527_v15 = vpack.c.bf16 %v5201_v57, %v5200_v31  ;;  %v5291_v26 = vld [vmem:[%s13508_s3 + $0x168] sm:$0xff]  ;;  %v4563_v21 = vadd.f32 %v12271_v27, %v4562_v50  ;;  %v5202_v31 = vmax.f32 %v4560_v0, 0.0 }
 0x2ac   :  { %v3584_v38 = vadd.f32 %v12271_v27, %v3583_v29  ;;  %v9540_v39 = vpop.f32.mrb[226].mxu0  ;;  %10175 = vmatprep.subr.bf16.mxu1 %v10174_v63  ;;  %v10784_v29 = vld [vmem:[%s13531_s22 + $0x548] sm:$0xff]   ;;  %v5205_v18 = vmax.f32 %v4571_v35, 0.0 }
 0x2ad   :  { %v3595_v54 = vadd.f32 %v12271_v27, %v9540_v39  ;;  %v3586_v28 = vpop.f32.mrb[227].mxu0  ;;  %10177 = vmatpush3.bf16.msra.mxu1 %v12428_v7  ;;  %v4960_v61 = vmax.f32 %v3592_v37, 0.0  ;;  %v10785_v39 = vld [vmem:[%s13531_s22 + $0x550] sm:$0xff]  }
 0x2ae   :  { %v3587_v45 = vadd.f32 %v12271_v27, %v3586_v28  ;;  %10179 = vmatprep.subr.bf16.mxu1 %v10178_v53  ;;  %v4958_v10 = vmax.f32 %v3584_v38, 0.0  ;;  %v4568_v53 = vadd.f32 %v12271_v27, %v9783_v44  ;;  %v5290_v28 = vld [vmem:[%s13508_s3 + $0x160] sm:$0xff] }
 0x2af   :  { %v4961_v2 = vmax.f32 %v3595_v54, 0.0  ;;  %9646 = vmatmul.mubr.msk.bf16.gmra.mrb[76].mxu0 %vm1880_vm0, %v10782_v30 }
 0x2b0   :  { %v4959_v13 = vmax.f32 %v3587_v45, 0.0  ;;  %9649 = vmatprep.mubr.msk.bf16.mxu0 %vm1880_vm0, %v10783_v51  ;;  %v5204_v30 = vmax.f32 %v4568_v53, 0.0  ;;  %v5203_v51 = vmax.f32 %v4563_v21, 0.0  ;;  %v9787_v45 = vpop.f32.mrb[68].mxu1 }
 0x2b1   :  { %v12534_v7 = vpack.c.bf16 %v4961_v2, %v4960_v61  ;;  %10181 = vmatpush3.bf16.msra.mxu1 %v12423_v46  ;;  %v5261_v61 = vld [vmem:[%s13508_s3 + $0x78] sm:$0xff]  ;;  %v4575_v4 = vpop.f32.mrb[69].mxu1 }
 0x2b2   :  { %v12543_v6 = vpack.c.bf16 %v4959_v13, %v4958_v10  ;;  %v9543_v63 = vpop.f32.mrb[228].mxu0  ;;  %v12561_v44 = vpack.c.bf16 %v5205_v18, %v5204_v30  ;;  %v12567_v2 = vpack.c.bf16 %v5203_v51, %v5202_v31  ;;  %v9788_v50 = vpop.f32.mrb[70].mxu1  ;;  %v10786_v18 = vld [vmem:[%s13531_s22 + $0x558] sm:$0xff]  }
 0x2b3   :  { %v3608_v46 = vadd.f32 %v12271_v27, %v9543_v63  ;;  %v3599_v37 = vpop.f32.mrb[229].mxu0  ;;  %v4578_v0 = vpop.f32.mrb[71].mxu1  ;;  %v4584_v63 = vadd.f32 %v12271_v27, %v9787_v45  ;;  %v4587_v21 = vadd.f32 %v12271_v27, %v9788_v50 }
 0x2b4   :  { %v3600_v57 = vadd.f32 %v12271_v27, %v3599_v37  ;;  %v9544_v38 = vpop.f32.mrb[230].mxu0  ;;  %5825 = vmatmul.mubr.f32.vlgmr.msra.gmra.mrb[132].mxu1 %v5258_v19 }
 0x2b5   :  { %v3611_v40 = vadd.f32 %v12271_v27, %v9544_v38  ;;  %v3602_v54 = vpop.f32.mrb[231].mxu0  ;;  %5829 = vmatprep.mubr.f32.mxu1 %v5291_v26  ;;  %v4964_v10 = vmax.f32 %v3608_v46, 0.0  ;;  %v4576_v26 = vadd.f32 %v12271_v27, %v4575_v4  ;;  %v9791_v4 = vpop.f32.mrb[72].mxu1 }
 0x2b6   :  { %v3603_v56 = vadd.f32 %v12271_v27, %v3602_v54  ;;  %v4962_v19 = vmax.f32 %v3600_v57, 0.0  ;;  %v5208_v57 = vmax.f32 %v4584_v63, 0.0  ;;  %v10787_v54 = vld [vmem:[%s13531_s22 + $0x560] sm:$0xff]   ;;  %v4591_v50 = vpop.f32.mrb[73].mxu1 }
 0x2b7   :  { %v4965_v13 = vmax.f32 %v3611_v40, 0.0  ;;  %9650 = vmatmul.mubr.msk.bf16.gmra.mrb[80].mxu0 %vm1880_vm0, %v10784_v29  ;;  %v4579_v29 = vadd.f32 %v12271_v27, %v4578_v0  ;;  %v5206_v38 = vmax.f32 %v4576_v26, 0.0  ;;  %v9792_v0 = vpop.f32.mrb[74].mxu1 }
 0x2b8   :  { %v4963_v53 = vmax.f32 %v3603_v56, 0.0  ;;  %9653 = vmatprep.mubr.msk.bf16.mxu0 %vm1880_vm0, %v10785_v39  ;;  %5830 = vmatmul.mubr.f32.gmra.mrb[134].mxu1 %v5290_v28  ;;  %v5209_v39 = vmax.f32 %v4587_v21, 0.0  ;;  %v4594_v21 = vpop.f32.mrb[75].mxu1 }
 0x2b9   :  { %v12571_v35 = vpack.c.bf16 %v4965_v13, %v4964_v10  ;;  %5899 = vmatprep.mubr.f32.mxu1 %v5261_v61  ;;  %v5207_v28 = vmax.f32 %v4579_v29, 0.0  ;;  %v4600_v29 = vadd.f32 %v12271_v27, %v9791_v4 }
 0x2ba   :  { %v12576_v46 = vpack.c.bf16 %v4963_v53, %v4962_v19  ;;  %v9547_v37 = vpop.f32.mrb[232].mxu0  ;;  %v12588_v61 = vpack.c.bf16 %v5209_v39, %v5208_v57  ;;  %v4603_v57 = vadd.f32 %v12271_v27, %v9792_v0  ;;  %v4595_v39 = vadd.f32 %v12271_v27, %v4594_v21 }
 0x2bb   :  { %v3624_v30 = vadd.f32 %v12271_v27, %v9547_v37  ;;  %v3615_v31 = vpop.f32.mrb[233].mxu0  ;;  %v12591_v13 = vpack.c.bf16 %v5207_v28, %v5206_v38 }
 0x2bc   :  { %v3616_v51 = vadd.f32 %v12271_v27, %v3615_v31  ;;  %v9548_v40 = vpop.f32.mrb[234].mxu0  ;;  %13538 = vst [vmem:[#allocation13_spill] sm:$0xff] %v12588_v61  ;;  %v4592_v31 = vadd.f32 %v12271_v27, %v4591_v50  ;;  %v5211_v50 = vmax.f32 %v4595_v39, 0.0 }
 0x2bd   :  { %v3627_v45 = vadd.f32 %v12271_v27, %v9548_v40  ;;  %v3618_v56 = vpop.f32.mrb[235].mxu0  ;;  %13539 = vst [vmem:[#allocation14_spill] sm:$0xff] %v12591_v13  ;;  %v4968_v19 = vmax.f32 %v3624_v30, 0.0  ;;  %v10788_v40 = vld [vmem:[%s13531_s22 + $0x568] sm:$0xff]  }
 0x2be   :  { %v3619_v10 = vadd.f32 %v12271_v27, %v3618_v56  ;;  %v4966_v63 = vmax.f32 %v3616_v51, 0.0  ;;  %v5210_v28 = vmax.f32 %v4592_v31, 0.0 }
 0x2bf   :  { %v4969_v53 = vmax.f32 %v3627_v45, 0.0  ;;  %9654 = vmatmul.mubr.msk.bf16.gmra.mrb[84].mxu0 %vm1880_vm0, %v10786_v18  ;;  %v5213_v45 = vmax.f32 %v4603_v57, 0.0 }
 0x2c0   :  { %v4967_v26 = vmax.f32 %v3619_v10, 0.0  ;;  %9657 = vmatprep.mubr.msk.bf16.mxu0 %vm1880_vm0, %v10787_v54  ;;  %v5212_v54 = vmax.f32 %v4600_v29, 0.0  ;;  %v10789_v10 = vld [vmem:[%s13531_s22 + $0x570] sm:$0xff]   ;;  %v12615_v21 = vpack.c.bf16 %v5211_v50, %v5210_v28 }
 0x2c1   :  { %v12595_v37 = vpack.c.bf16 %v4969_v53, %v4968_v19 }
 0x2c2   :  { %v12600_v38 = vpack.c.bf16 %v4967_v26, %v4966_v63  ;;  %v9551_v30 = vpop.f32.mrb[236].mxu0  ;;  %v12612_v0 = vpack.c.bf16 %v5213_v45, %v5212_v54  ;;  %v9795_v63 = vpop.f32.mrb[76].mxu1  ;;  %13541 = vst [vmem:[#allocation16_spill] sm:$0xff] %v12615_v21 }
 0x2c3   :  { %v3640_v18 = vadd.f32 %v12271_v27, %v9551_v30  ;;  %v3631_v51 = vpop.f32.mrb[237].mxu0  ;;  %v4607_v29 = vpop.f32.mrb[77].mxu1  ;;  %v4616_v54 = vadd.f32 %v12271_v27, %v9795_v63 }
 0x2c4   :  { %v3632_v56 = vadd.f32 %v12271_v27, %v3631_v51  ;;  %v9552_v4 = vpop.f32.mrb[238].mxu0  ;;  %13540 = vst [vmem:[#allocation15_spill] sm:$0xff] %v12612_v0  ;;  %v9796_v30 = vpop.f32.mrb[78].mxu1  ;;  %v4608_v45 = vadd.f32 %v12271_v27, %v4607_v29 }
 0x2c5   :  { %v3643_v19 = vadd.f32 %v12271_v27, %v9552_v4  ;;  %v3634_v53 = vpop.f32.mrb[239].mxu0  ;;  %v4972_v31 = vmax.f32 %v3640_v18, 0.0  ;;  %v4610_v39 = vpop.f32.mrb[79].mxu1  ;;  %v4619_v28 = vadd.f32 %v12271_v27, %v9796_v30 }
 0x2c6   :  { %v3635_v26 = vadd.f32 %v12271_v27, %v3634_v53  ;;  %v4970_v51 = vmax.f32 %v3632_v56, 0.0  ;;  %v5216_v53 = vmax.f32 %v4616_v54, 0.0  ;;  %v12641_v54 = vld [vmem:[%s13532_s24] ss:$0 sm:$0xff] }
 0x2c7   :  { %v4973_v57 = vmax.f32 %v3643_v19, 0.0  ;;  %9658 = vmatmul.mubr.msk.bf16.gmra.mrb[88].mxu0 %vm1880_vm0, %v10788_v40  ;;  %v4611_v19 = vadd.f32 %v12271_v27, %v4610_v39 }
 0x2c8   :  { %v4971_v48 = vmax.f32 %v3635_v26, 0.0  ;;  %9661 = vmatprep.mubr.msk.bf16.mxu0 %vm1880_vm0, %v10789_v10  ;;  %v10790_v10 = vld [vmem:[%s13531_s22 + $0x578] sm:$0xff]   ;;  %v5214_v26 = vmax.f32 %v4608_v45, 0.0 }
 0x2c9   :  { %v12619_v4 = vpack.c.bf16 %v4973_v57, %v4972_v31  ;;  %v5217_v31 = vmax.f32 %v4619_v28, 0.0  ;;  %v5215_v57 = vmax.f32 %v4611_v19, 0.0 }
 0x2ca   :  { %v12624_v50 = vpack.c.bf16 %v4971_v48, %v4970_v51  ;;  %v9555_v18 = vpop.f32.mrb[240].mxu0  ;;  %v10791_v48 = vld [vmem:[%s13531_s22 + $0x580] sm:$0xff]  }
 0x2cb   :  { %v3656_v40 = vadd.f32 %v12271_v27, %v9555_v18  ;;  %v3647_v56 = vpop.f32.mrb[241].mxu0  ;;  %v12636_v39 = vpack.c.bf16 %v5217_v31, %v5216_v53  ;;  %v9799_v18 = vpop.f32.mrb[80].mxu1  ;;  %v12644_v28 = vpack.c.bf16 %v5215_v57, %v5214_v26 }
 0x2cc   :  { %v3648_v63 = vadd.f32 %v12271_v27, %v3647_v56  ;;  %v9556_v29 = vpop.f32.mrb[242].mxu0  ;;  %v4623_v56 = vpop.f32.mrb[81].mxu1 }
 0x2cd   :  { %v3659_v30 = vadd.f32 %v12271_v27, %v9556_v29  ;;  %v3650_v51 = vpop.f32.mrb[243].mxu0  ;;  %13542 = vst [vmem:[#allocation17_spill] sm:$0xff] %v12636_v39  ;;  %13543 = vst [vmem:[#allocation18_spill] sm:$0xff] %v12644_v28  ;;  %v4976_v0 = vmax.f32 %v3656_v40, 0.0  ;;  %v9800_v19 = vpop.f32.mrb[82].mxu1  ;;  %v4632_v39 = vadd.f32 %v12641_v54, %v9799_v18  ;;  %v4624_v21 = vadd.f32 %v12641_v54, %v4623_v56  ;;  %v10793_v56 = vld [vmem:[%s13531_s22 + $0x590] sm:$0xff]  }
 0x2ce   :  { %v3651_v45 = vadd.f32 %v12641_v54, %v3650_v51  ;;  %v4974_v27 = vmax.f32 %v3648_v63, 0.0  ;;  %v4626_v53 = vpop.f32.mrb[83].mxu1  ;;  %v4635_v51 = vadd.f32 %v12641_v54, %v9800_v19  ;;  %v10792_v63 = vld [vmem:[%s13531_s22 + $0x588] sm:$0xff]  }
 0x2cf   :  { %v4977_v59 = vmax.f32 %v3659_v30, 0.0  ;;  %9662 = vmatmul.mubr.msk.bf16.gmra.mrb[92].mxu0 %vm1880_vm0, %v10790_v10  ;;  %v4627_v40 = vadd.f32 %v12641_v54, %v4626_v53 }
 0x2d0   :  { %v4975_v29 = vmax.f32 %v3651_v45, 0.0  ;;  %9665 = vmatprep.mubr.msk.bf16.mxu0 %vm1880_vm0, %v10791_v48  ;;  %v5220_v48 = vmax.f32 %v4632_v39, 0.0  ;;  %v5218_v45 = vmax.f32 %v4624_v21, 0.0 }
 0x2d1   :  { %v10186_v31 = vpack.c.bf16 %v4977_v59, %v4976_v0  ;;  %v5221_v59 = vmax.f32 %v4635_v51, 0.0  ;;  %v5219_v19 = vmax.f32 %v4627_v40, 0.0 }
 0x2d2   :  { %v10182_v26 = vpack.c.bf16 %v4975_v29, %v4974_v27  ;;  %v9559_v57 = vpop.f32.mrb[244].mxu0 }
 0x2d3   :  { %v3672_v30 = vadd.f32 %v12641_v54, %v9559_v57  ;;  %v3663_v10 = vpop.f32.mrb[245].mxu0  ;;  %v12662_v53 = vpack.c.bf16 %v5221_v59, %v5220_v48  ;;  %v9803_v57 = vpop.f32.mrb[84].mxu1  ;;  %v12665_v39 = vpack.c.bf16 %v5219_v19, %v5218_v45 }
 0x2d4   :  { %v3664_v0 = vadd.f32 %v12641_v54, %v3663_v10  ;;  %v9560_v18 = vpop.f32.mrb[246].mxu0  ;;  %10183 = vmatprep.subr.bf16.mxu1 %v10182_v26  ;;  %v4639_v51 = vpop.f32.mrb[85].mxu1  ;;  %v4648_v48 = vadd.f32 %v12641_v54, %v9803_v57 }
 0x2d5   :  { %v3675_v27 = vadd.f32 %v12641_v54, %v9560_v18  ;;  %v3666_v29 = vpop.f32.mrb[247].mxu0  ;;  %10185 = vmatpush3.bf16.msra.mxu1 %v12543_v6  ;;  %13544 = vst [vmem:[#allocation19_spill] sm:$0xff] %v12662_v53  ;;  %13545 = vst [vmem:[#allocation20_spill] sm:$0xff] %v12665_v39  ;;  %v4980_v26 = vmax.f32 %v3672_v30, 0.0  ;;  %v9804_v28 = vpop.f32.mrb[86].mxu1 }
 0x2d6   :  { %v3667_v21 = vadd.f32 %v12641_v54, %v3666_v29  ;;  %10187 = vmatprep.subr.bf16.mxu1 %v10186_v31  ;;  %v4978_v40 = vmax.f32 %v3664_v0, 0.0  ;;  %v4642_v18 = vpop.f32.mrb[87].mxu1  ;;  %v4640_v31 = vadd.f32 %v12641_v54, %v4639_v51  ;;  %v4651_v45 = vadd.f32 %v12641_v54, %v9804_v28 }
 0x2d7   :  { %v4981_v10 = vmax.f32 %v3675_v27, 0.0  ;;  %9666 = vmatmul.mubr.msk.bf16.gmra.mrb[96].mxu0 %vm1880_vm0, %v10792_v63  ;;  %v4643_v19 = vadd.f32 %v12641_v54, %v4642_v18  ;;  %v5224_v27 = vmax.f32 %v4648_v48, 0.0 }
 0x2d8   :  { %v4979_v33 = vmax.f32 %v3667_v21, 0.0  ;;  %9669 = vmatprep.mubr.msk.bf16.mxu0 %vm1880_vm0, %v10793_v56  ;;  %v10794_v56 = vld [vmem:[%s13531_s22 + $0x598] sm:$0xff]   ;;  %v5222_v29 = vmax.f32 %v4640_v31, 0.0 }
 0x2d9   :  { %v10194_v6 = vpack.c.bf16 %v4981_v10, %v4980_v26  ;;  %10189 = vmatpush3.bf16.msra.mxu1 %v12534_v7  ;;  %v5225_v7 = vmax.f32 %v4651_v45, 0.0  ;;  %v5223_v28 = vmax.f32 %v4643_v19, 0.0 }
 0x2da   :  { %v10190_v59 = vpack.c.bf16 %v4979_v33, %v4978_v40  ;;  %v9563_v30 = vpop.f32.mrb[248].mxu0  ;;  %v10795_v33 = vld [vmem:[%s13531_s22 + $0x5a0] sm:$0xff]   ;;  %v9807_v40 = vpop.f32.mrb[88].mxu1 }
 0x2db   :  { %v3688_v63 = vadd.f32 %v12641_v54, %v9563_v30  ;;  %v3679_v0 = vpop.f32.mrb[249].mxu0  ;;  %v12684_v10 = vpack.c.bf16 %v5225_v7, %v5224_v27  ;;  %v12687_v48 = vpack.c.bf16 %v5223_v28, %v5222_v29  ;;  %v4655_v31 = vpop.f32.mrb[89].mxu1  ;;  %v4664_v27 = vadd.f32 %v12641_v54, %v9807_v40 }
 0x2dc   :  { %v3680_v57 = vadd.f32 %v12641_v54, %v3679_v0  ;;  %v9564_v21 = vpop.f32.mrb[250].mxu0  ;;  %10191 = vmatprep.subr.bf16.mxu1 %v10190_v59  ;;  %v9808_v30 = vpop.f32.mrb[90].mxu1 }
 0x2dd   :  { %v3691_v51 = vadd.f32 %v12641_v54, %v9564_v21  ;;  %v3682_v26 = vpop.f32.mrb[251].mxu0  ;;  %10193 = vmatpush3.bf16.msra.mxu1 %v12576_v46  ;;  %13546 = vst [vmem:[#allocation21_spill] sm:$0xff] %v12684_v10  ;;  %13547 = vst [vmem:[#allocation22_spill] sm:$0xff] %v12687_v48  ;;  %v4984_v45 = vmax.f32 %v3688_v63, 0.0  ;;  %v4658_v21 = vpop.f32.mrb[91].mxu1  ;;  %v4667_v29 = vadd.f32 %v12641_v54, %v9808_v30 }
 0x2de   :  { %v3683_v18 = vadd.f32 %v12641_v54, %v3682_v26  ;;  %10195 = vmatprep.subr.bf16.mxu1 %v10194_v6  ;;  %v4982_v19 = vmax.f32 %v3680_v57, 0.0  ;;  %v4656_v6 = vadd.f32 %v12641_v54, %v4655_v31  ;;  %v4659_v28 = vadd.f32 %v12641_v54, %v4658_v21  ;;  %v10797_v31 = vld [vmem:[%s13531_s22 + $0x5b0] sm:$0xff]  }
 0x2df   :  { %v4985_v59 = vmax.f32 %v3691_v51, 0.0  ;;  %9670 = vmatmul.mubr.msk.bf16.gmra.mrb[100].mxu0 %vm1880_vm0, %v10794_v56  ;;  %v5228_v51 = vmax.f32 %v4664_v27, 0.0 }
 0x2e0   :  { %v4983_v0 = vmax.f32 %v3683_v18, 0.0  ;;  %9673 = vmatprep.mubr.msk.bf16.mxu0 %vm1880_vm0, %v10795_v33  ;;  %v10796_v33 = vld [vmem:[%s13531_s22 + $0x5a8] sm:$0xff]   ;;  %v5226_v26 = vmax.f32 %v4656_v6, 0.0 }
 0x2e1   :  { %v10202_v46 = vpack.c.bf16 %v4985_v59, %v4984_v45  ;;  %10197 = vmatpush3.bf16.msra.mxu1 %v12571_v35  ;;  %v5229_v35 = vmax.f32 %v4667_v29, 0.0  ;;  %v5227_v45 = vmax.f32 %v4659_v28, 0.0 }
 0x2e2   :  { %v10198_v7 = vpack.c.bf16 %v4983_v0, %v4982_v19  ;;  %v9567_v63 = vpop.f32.mrb[252].mxu0  ;;  %v9811_v0 = vpop.f32.mrb[92].mxu1 }
 0x2e3   :  { %v3704_v56 = vadd.f32 %v12641_v54, %v9567_v63  ;;  %v3695_v57 = vpop.f32.mrb[253].mxu0  ;;  %v12706_v19 = vpack.c.bf16 %v5229_v35, %v5228_v51  ;;  %v12709_v27 = vpack.c.bf16 %v5227_v45, %v5226_v26  ;;  %v4671_v6 = vpop.f32.mrb[93].mxu1  ;;  %v4680_v51 = vadd.f32 %v12641_v54, %v9811_v0 }
 0x2e4   :  { %v3696_v40 = vadd.f32 %v12641_v54, %v3695_v57  ;;  %v9568_v18 = vpop.f32.mrb[254].mxu0  ;;  %10199 = vmatprep.subr.bf16.mxu1 %v10198_v7  ;;  %v9812_v63 = vpop.f32.mrb[94].mxu1 }
 0x2e5   :  { %v3707_v59 = vadd.f32 %v12641_v54, %v9568_v18  ;;  %v3698_v30 = vpop.f32.mrb[255].mxu0  ;;  %10201 = vmatpush3.bf16.msra.mxu1 %v12600_v38  ;;  %13548 = vst [vmem:[#allocation23_spill] sm:$0xff] %v12706_v19  ;;  %13549 = vst [vmem:[#allocation24_spill] sm:$0xff] %v12709_v27  ;;  %v4988_v29 = vmax.f32 %v3704_v56, 0.0  ;;  %v4674_v18 = vpop.f32.mrb[95].mxu1  ;;  %v4683_v26 = vadd.f32 %v12641_v54, %v9812_v63 }
 0x2e6   :  { %v3699_v21 = vadd.f32 %v12641_v54, %v3698_v30  ;;  %10203 = vmatprep.subr.bf16.mxu1 %v10202_v46  ;;  %v4986_v28 = vmax.f32 %v3696_v40, 0.0  ;;  %v4672_v46 = vadd.f32 %v12641_v54, %v4671_v6  ;;  %v4675_v45 = vadd.f32 %v12641_v54, %v4674_v18  ;;  %v10799_v6 = vld [vmem:[%s13531_s22 + $0x5c0] sm:$0xff]  }
 0x2e7   :  { %v4989_v7 = vmax.f32 %v3707_v59, 0.0  ;;  %9674 = vmatmul.mubr.msk.bf16.gmra.mrb[104].mxu0 %vm1880_vm0, %v10796_v33  ;;  %v5232_v59 = vmax.f32 %v4680_v51, 0.0 }
 0x2e8   :  { %v4987_v57 = vmax.f32 %v3699_v21, 0.0  ;;  %9677 = vmatprep.mubr.msk.bf16.mxu0 %vm1880_vm0, %v10797_v31  ;;  %v10798_v31 = vld [vmem:[%s13531_s22 + $0x5b8] sm:$0xff]   ;;  %v5230_v30 = vmax.f32 %v4672_v46, 0.0 }
 0x2e9   :  { %v10210_v38 = vpack.c.bf16 %v4989_v7, %v4988_v29  ;;  %10205 = vmatpush3.bf16.msra.mxu1 %v12595_v37  ;;  %v5233_v37 = vmax.f32 %v4683_v26, 0.0  ;;  %v5231_v29 = vmax.f32 %v4675_v45, 0.0 }
 0x2ea   :  { %v10206_v35 = vpack.c.bf16 %v4987_v57, %v4986_v28  ;;  %v9571_v56 = vpop.f32.mrb[0].mxu0  ;;  %v9815_v57 = vpop.f32.mrb[96].mxu1 }
 0x2eb   :  { %v3720_v33 = vadd.f32 %v12641_v54, %v9571_v56  ;;  %v3711_v40 = vpop.f32.mrb[1].mxu0  ;;  %v12728_v28 = vpack.c.bf16 %v5233_v37, %v5232_v59  ;;  %v12731_v51 = vpack.c.bf16 %v5231_v29, %v5230_v30  ;;  %v4687_v46 = vpop.f32.mrb[97].mxu1  ;;  %v4696_v59 = vadd.f32 %v12641_v54, %v9815_v57 }
 0x2ec   :  { %v3712_v0 = vadd.f32 %v12641_v54, %v3711_v40  ;;  %v9572_v21 = vpop.f32.mrb[2].mxu0  ;;  %10207 = vmatprep.subr.bf16.mxu1 %v10206_v35  ;;  %v9816_v56 = vpop.f32.mrb[98].mxu1 }
 0x2ed   :  { %v3723_v7 = vadd.f32 %v12641_v54, %v9572_v21  ;;  %v3714_v63 = vpop.f32.mrb[3].mxu0  ;;  %10209 = vmatpush3.bf16.msra.mxu1 %v12624_v50  ;;  %13550 = vst [vmem:[#allocation25_spill] sm:$0xff] %v12728_v28  ;;  %13551 = vst [vmem:[#allocation26_spill] sm:$0xff] %v12731_v51  ;;  %v4992_v26 = vmax.f32 %v3720_v33, 0.0  ;;  %v4690_v21 = vpop.f32.mrb[99].mxu1  ;;  %v4688_v33 = vadd.f32 %v12641_v54, %v4687_v46  ;;  %v5236_v46 = vmax.f32 %v4696_v59, 0.0 }
 0x2ee   :  { %v3715_v18 = vadd.f32 %v12641_v54, %v3714_v63  ;;  %10211 = vmatprep.subr.bf16.mxu1 %v10210_v38  ;;  %v4990_v45 = vmax.f32 %v3712_v0, 0.0  ;;  %v5260_v38 = vld [vmem:[%s13508_s3 + $0x70] sm:$0xff]  ;;  %v9819_v30 = vpop.f32.mrb[100].mxu1 }
 0x2ef   :  { %v4993_v35 = vmax.f32 %v3723_v7, 0.0  ;;  %9678 = vmatmul.mubr.msk.bf16.gmra.mrb[108].mxu0 %vm1880_vm0, %v10798_v31  ;;  %v4699_v31 = vadd.f32 %v12641_v54, %v9816_v56  ;;  %v4712_v29 = vadd.f32 %v12641_v54, %v9819_v30  ;;  %v4703_v7 = vpop.f32.mrb[101].mxu1  ;;  %v5292_v59 = vld [vmem:[%s13508_s3 + $0x170] sm:$0xff] }
 0x2f0   :  { %v4991_v40 = vmax.f32 %v3715_v18, 0.0  ;;  %9681 = vmatprep.mubr.msk.bf16.mxu0 %vm1880_vm0, %v10799_v6  ;;  %v5293_v6 = vld [vmem:[%s13508_s3 + $0x178] sm:$0xff]  ;;  %v10800_v18 = vld [vmem:[%s13531_s22 + $0x5c8] sm:$0xff]   ;;  %v9820_v56 = vpop.f32.mrb[102].mxu1 }
 0x2f1   :  { %v12735_v50 = vpack.c.bf16 %v4993_v35, %v4992_v26  ;;  %10213 = vmatpush3.bf16.msra.mxu1 %v12619_v4  ;;  %v4691_v4 = vadd.f32 %v12641_v54, %v4690_v21  ;;  %v5234_v26 = vmax.f32 %v4688_v33, 0.0  ;;  %v5237_v35 = vmax.f32 %v4699_v31, 0.0  ;;  %v10801_v21 = vld [vmem:[%s13531_s22 + $0x5d0] sm:$0xff]   ;;  %v4706_v19 = vpop.f32.mrb[103].mxu1 }
 0x2f2   :  { %v12744_v37 = vpack.c.bf16 %v4991_v40, %v4990_v45  ;;  %v9575_v0 = vpop.f32.mrb[4].mxu0  ;;  %v4704_v31 = vadd.f32 %v12641_v54, %v4703_v7 }
 0x2f3   :  { %v3736_v63 = vadd.f32 %v12641_v54, %v9575_v0  ;;  %v3727_v57 = vpop.f32.mrb[5].mxu0  ;;  %v5235_v30 = vmax.f32 %v4691_v4, 0.0  ;;  %v12763_v33 = vpack.c.bf16 %v5237_v35, %v5236_v46  ;;  %v5263_v4 = vld [vmem:[%s13508_s3 + $0x88] sm:$0xff] }
 0x2f4   :  { %v3728_v45 = vadd.f32 %v12641_v54, %v3727_v57  ;;  %v9576_v40 = vpop.f32.mrb[6].mxu0  ;;  %5900 = vmatmul.mubr.f32.vlgmr.msra.gmra.mrb[136].mxu1 %v5260_v38  ;;  %v9823_v57 = vpop.f32.mrb[104].mxu1 }
 0x2f5   :  { %v3739_v0 = vadd.f32 %v12641_v54, %v9576_v40  ;;  %v3730_v27 = vpop.f32.mrb[7].mxu0  ;;  %5904 = vmatprep.mubr.f32.mxu1 %v5293_v6  ;;  %13552 = vst [vmem:[#allocation27_spill] sm:$0xff] %v12763_v33  ;;  %v12770_v10 = vpack.c.bf16 %v5235_v30, %v5234_v26  ;;  %v5240_v40 = vmax.f32 %v4712_v29, 0.0  ;;  %v4715_v6 = vadd.f32 %v12641_v54, %v9820_v56  ;;  %v4719_v48 = vpop.f32.mrb[105].mxu1 }
 0x2f6   :  { %v3731_v38 = vadd.f32 %v12641_v54, %v3730_v27  ;;  %v4996_v53 = vmax.f32 %v3736_v63, 0.0  ;;  %v9824_v46 = vpop.f32.mrb[106].mxu1  ;;  %v4994_v35 = vmax.f32 %v3728_v45, 0.0  ;;  %v5238_v26 = vmax.f32 %v4704_v31, 0.0 }
 0x2f7   :  { %13553 = vst [vmem:[#allocation28_spill] sm:$0xff] %v12770_v10  ;;  %v4997_v39 = vmax.f32 %v3739_v0, 0.0  ;;  %9682 = vmatmul.mubr.msk.bf16.gmra.mrb[112].mxu0 %vm1880_vm0, %v10800_v18  ;;  %v5241_v27 = vmax.f32 %v4715_v6, 0.0  ;;  %v4722_v33 = vpop.f32.mrb[107].mxu1  ;;  %v4707_v29 = vadd.f32 %v12641_v54, %v4706_v19  ;;  %v4728_v18 = vadd.f32 %v12641_v54, %v9823_v57 }
 0x2f8   :  { %v4995_v7 = vmax.f32 %v3731_v38, 0.0  ;;  %5905 = vmatmul.mubr.f32.gmra.mrb[138].mxu1 %v5292_v59  ;;  %9685 = vmatprep.mubr.msk.bf16.mxu0 %vm1880_vm0, %v10801_v21  ;;  %v8669_v56 = vpop.f32.mrb[108].mxu1  ;;  %v4720_v45 = vadd.f32 %v12641_v54, %v4719_v48  ;;  %v4731_v19 = vadd.f32 %v12641_v54, %v9824_v46  ;;  %v4723_v31 = vadd.f32 %v12641_v54, %v4722_v33  ;;  %v10803_v48 = vld [vmem:[%s13531_s22 + $0x5e0] sm:$0xff]  }
 0x2f9   :  { %v12775_v28 = vpack.c.bf16 %v4997_v39, %v4996_v53  ;;  %5974 = vmatprep.mubr.f32.mxu1 %v5263_v4  ;;  %v12780_v0 = vpack.c.bf16 %v5241_v27, %v5240_v40  ;;  %v8670_v59 = vpop.f32.mrb[109].mxu1  ;;  %v10802_v53 = vld [vmem:[%s13531_s22 + $0x5d8] sm:$0xff]   ;;  %v5239_v39 = vmax.f32 %v4707_v29, 0.0  ;;  %v5244_v57 = vmax.f32 %v4728_v18, 0.0 }
 0x2fa   :  { %v12778_v30 = vpack.c.bf16 %v4995_v7, %v4994_v35  ;;  %v9579_v63 = vpop.f32.mrb[8].mxu0  ;;  %v8672_v4 = vpop.f32.mrb[110].mxu1  ;;  %v5242_v35 = vmax.f32 %v4720_v45, 0.0  ;;  %v5245_v29 = vmax.f32 %v4731_v19, 0.0  ;;  %v5243_v10 = vmax.f32 %v4723_v31, 0.0 }
 0x2fb   :  { %13554 = vst [vmem:[#allocation29_spill] sm:$0xff] %v12780_v0  ;;  %v3752_v21 = vadd.f32 %v12641_v54, %v9579_v63  ;;  %v3743_v38 = vpop.f32.mrb[9].mxu0  ;;  %v8673_v7 = vpop.f32.mrb[111].mxu1  ;;  %v12795_v0 = vpack.c.bf16 %v5239_v39, %v5238_v26  ;;  %v8671_v51 = vadd.f32 %v8670_v59, %v8669_v56 }
 0x2fc   :  { %v3744_v40 = vadd.f32 %v12641_v54, %v3743_v38  ;;  %v9580_v6 = vpop.f32.mrb[10].mxu0  ;;  %v8707_v46 = vpop.f32.mrb[112].mxu1  ;;  %v12799_v13 = vpack.c.bf16 %v5245_v29, %v5244_v57  ;;  %v12802_v26 = vpack.c.bf16 %v5243_v10, %v5242_v35 }
 0x2fd   :  { %v3755_v27 = vadd.f32 %v12641_v54, %v9580_v6  ;;  %v3746_v63 = vpop.f32.mrb[11].mxu0  ;;  %13555 = vst [vmem:[#allocation30_spill] sm:$0xff] %v12795_v0  ;;  %v8708_v38 = vpop.f32.mrb[113].mxu1  ;;  %v5000_v61 = vmax.f32 %v3752_v21, 0.0  ;;  %v8674_v6 = vadd.f32 %v8673_v7, %v8672_v4 }
 0x2fe   :  { %v3747_v33 = vadd.f32 %v12641_v54, %v3746_v63  ;;  %13556 = vst [vmem:[#allocation31_spill] sm:$0xff] %v12799_v13  ;;  %v8710_v18 = vpop.f32.mrb[114].mxu1  ;;  %v4998_v45 = vmax.f32 %v3744_v40, 0.0  ;;  %13557 = vst [vmem:[#allocation32_spill] sm:$0xff] %v12802_v26  ;;  %v8709_v21 = vadd.f32 %v8708_v38, %v8707_v46  ;;  %v10804_v40 = vld [vmem:[%s13531_s22 + $0x5e8] sm:$0xff]  }
 0x2ff   :  { %v5001_v49 = vmax.f32 %v3755_v27, 0.0  ;;  %9686 = vmatmul.mubr.msk.bf16.gmra.mrb[116].mxu0 %vm1880_vm0, %v10802_v53  ;;  %v8711_v39 = vpop.f32.mrb[115].mxu1 }
 0x300   :  { %v4999_v1 = vmax.f32 %v3747_v33, 0.0  ;;  %9689 = vmatprep.mubr.msk.bf16.mxu0 %vm1880_vm0, %v10803_v48  ;;  %v8745_v31 = vpop.f32.mrb[116].mxu1  ;;  %v8712_v27 = vadd.f32 %v8711_v39, %v8710_v18 }
 0x301   :  { %v12804_v19 = vpack.c.bf16 %v5001_v49, %v5000_v61  ;;  %v8746_v53 = vpop.f32.mrb[117].mxu1  ;;  %v5452_v61 = vadd.f32 %v8709_v21, %v8671_v51 }
 0x302   :  { %v12806_v56 = vpack.c.bf16 %v4999_v1, %v4998_v45  ;;  %v9583_v59 = vpop.f32.mrb[12].mxu0  ;;  %v8748_v10 = vpop.f32.mrb[118].mxu1  ;;  %v10805_v1 = vld [vmem:[%s13531_s22 + $0x5f0] sm:$0xff]   ;;  %v5457_v4 = vadd.f32 %v8712_v27, %v8674_v6  ;;  %v8747_v46 = vadd.f32 %v8746_v53, %v8745_v31 }
 0x303   :  { %v3768_v57 = vadd.f32 %v12641_v54, %v9583_v59  ;;  %v3759_v63 = vpop.f32.mrb[13].mxu0  ;;  %v8749_v35 = vpop.f32.mrb[119].mxu1 }
 0x304   :  { %v3760_v48 = vadd.f32 %v12641_v54, %v3759_v63  ;;  %v9584_v49 = vpop.f32.mrb[14].mxu0  ;;  %v8783_v33 = vpop.f32.mrb[120].mxu1  ;;  %v5527_v59 = vadd.f32 %v8747_v46, %v5452_v61  ;;  %v8750_v21 = vadd.f32 %v8749_v35, %v8748_v10 }
 0x305   :  { %v3771_v7 = vadd.f32 %v12641_v54, %v9584_v49  ;;  %v3762_v29 = vpop.f32.mrb[15].mxu0  ;;  %v8784_v18 = vpop.f32.mrb[121].mxu1  ;;  %v5004_v45 = vmax.f32 %v3768_v57, 0.0 }
 0x306   :  { %v3763_v38 = vadd.f32 %v12641_v54, %v3762_v29  ;;  %v8786_v63 = vpop.f32.mrb[122].mxu1  ;;  %v5002_v13 = vmax.f32 %v3760_v48, 0.0  ;;  %v8785_v49 = vadd.f32 %v8784_v18, %v8783_v33  ;;  %v10806_v48 = vld [vmem:[%s13531_s22 + $0x5f8] sm:$0xff]   ;;  %v5532_v61 = vadd.f32 %v8750_v21, %v5457_v4 }
 0x307   :  { %v5005_v39 = vmax.f32 %v3771_v7, 0.0  ;;  %9690 = vmatmul.mubr.msk.bf16.gmra.mrb[120].mxu0 %vm1880_vm0, %v10804_v40  ;;  %v8787_v51 = vpop.f32.mrb[123].mxu1 }
 0x308   :  { %v5003_v26 = vmax.f32 %v3763_v38, 0.0  ;;  %9693 = vmatprep.mubr.msk.bf16.mxu0 %vm1880_vm0, %v10805_v1  ;;  %v8821_v27 = vpop.f32.mrb[124].mxu1  ;;  %v8788_v29 = vadd.f32 %v8787_v51, %v8786_v63 }
 0x309   :  { %v12820_v6 = vpack.c.bf16 %v5005_v39, %v5004_v45  ;;  %v8822_v57 = vpop.f32.mrb[125].mxu1 }
 0x30a   :  { %v12822_v31 = vpack.c.bf16 %v5003_v26, %v5002_v13  ;;  %v9587_v53 = vpop.f32.mrb[16].mxu0  ;;  %v10807_v13 = vld [vmem:[%s13531_s22 + $0x600] sm:$0xff]   ;;  %v5602_v26 = vadd.f32 %v8785_v49, %v5527_v59  ;;  %v5607_v18 = vadd.f32 %v8788_v29, %v5532_v61  ;;  %v8823_v45 = vadd.f32 %v8822_v57, %v8821_v27  ;;  %v10808_v27 = vld [vmem:[%s13531_s22 + $0x608] sm:$0xff]   ;;  %v10809_v61 = vld [vmem:[%s13531_s22 + $0x610] sm:$0xff]  }
 0x30b   :  { %v3784_v7 = vadd.f32 %v12641_v54, %v9587_v53  ;;  %v3775_v40 = vpop.f32.mrb[17].mxu0  ;;  %v8824_v1 = vpop.f32.mrb[126].mxu1 }
 0x30c   :  { %v3776_v46 = vadd.f32 %v12641_v54, %v3775_v40  ;;  %v9588_v38 = vpop.f32.mrb[18].mxu0  ;;  %v8825_v10 = vpop.f32.mrb[127].mxu1  ;;  %v12835_v4 = vadd.f32 %v8823_v45, %v5602_v26 }
 0x30d   :  { %v3787_v35 = vadd.f32 %v12641_v54, %v9588_v38  ;;  %v3778_v33 = vpop.f32.mrb[19].mxu0  ;;  %v5008_v63 = vmax.f32 %v3784_v7, 0.0  ;;  %v8826_v59 = vadd.f32 %v8825_v10, %v8824_v1 }
 0x30e   :  { %v3779_v39 = vadd.f32 %v12641_v54, %v3778_v33  ;;  %v5006_v21 = vmax.f32 %v3776_v46, 0.0 }
 0x30f   :  { %v5009_v51 = vmax.f32 %v3787_v35, 0.0  ;;  %9694 = vmatmul.mubr.msk.bf16.gmra.mrb[124].mxu0 %vm1880_vm0, %v10806_v48  ;;  %v12842_v57 = vadd.f32 %v8826_v59, %v5607_v18 }
 0x310   :  { %v5007_v53 = vmax.f32 %v3779_v39, 0.0  ;;  %9697 = vmatprep.mubr.msk.bf16.mxu0 %vm1880_vm0, %v10807_v13 }
 0x311   :  { %v10218_v40 = vpack.c.bf16 %v5009_v51, %v5008_v63 }
 0x312   :  { %v10214_v49 = vpack.c.bf16 %v5007_v53, %v5006_v21  ;;  %v9591_v0 = vpop.f32.mrb[20].mxu0  ;;  %v10811_v53 = vld [vmem:[%s13531_s22 + $0x620] sm:$0xff]  }
 0x313   :  { %v3800_v38 = vadd.f32 %v12641_v54, %v9591_v0  ;;  %v3791_v29 = vpop.f32.mrb[21].mxu0 }
 0x314   :  { %v3792_v7 = vadd.f32 %v12641_v54, %v3791_v29  ;;  %v9592_v48 = vpop.f32.mrb[22].mxu0  ;;  %10215 = vmatprep.subr.bf16.mxu1 %v10214_v49 }
 0x315   :  { %v3803_v1 = vadd.f32 %v12641_v54, %v9592_v48  ;;  %v3794_v46 = vpop.f32.mrb[23].mxu0  ;;  %10217 = vmatpush3.bf16.msra.mxu1 %v12744_v37  ;;  %v5012_v13 = vmax.f32 %v3800_v38, 0.0  ;;  %v10810_v37 = vld [vmem:[%s13531_s22 + $0x618] sm:$0xff]  }
 0x316   :  { %v3795_v0 = vadd.f32 %v12641_v54, %v3794_v46  ;;  %10219 = vmatprep.subr.bf16.mxu1 %v10218_v40  ;;  %v5010_v10 = vmax.f32 %v3792_v7, 0.0 }
 0x317   :  { %v5013_v26 = vmax.f32 %v3803_v1, 0.0  ;;  %9698 = vmatmul.mubr.msk.bf16.gmra.mrb[128].mxu0 %vm1880_vm0, %v10808_v27 }
 0x318   :  { %v5011_v35 = vmax.f32 %v3795_v0, 0.0  ;;  %9701 = vmatprep.mubr.msk.bf16.mxu0 %vm1880_vm0, %v10809_v61 }
 0x319   :  { %v10226_v33 = vpack.c.bf16 %v5013_v26, %v5012_v13  ;;  %10221 = vmatpush3.bf16.msra.mxu1 %v12735_v50  ;;  %v10813_v26 = vld [vmem:[%s13531_s22 + $0x630] sm:$0xff]  }
 0x31a   :  { %v10222_v18 = vpack.c.bf16 %v5011_v35, %v5010_v10  ;;  %v9595_v45 = vpop.f32.mrb[24].mxu0 }
 0x31b   :  { %v3816_v39 = vadd.f32 %v12641_v54, %v9595_v45  ;;  %v3807_v63 = vpop.f32.mrb[25].mxu0 }
 0x31c   :  { %v3808_v51 = vadd.f32 %v12641_v54, %v3807_v63  ;;  %v9596_v21 = vpop.f32.mrb[26].mxu0  ;;  %10223 = vmatprep.subr.bf16.mxu1 %v10222_v18 }
 0x31d   :  { %v3819_v40 = vadd.f32 %v12641_v54, %v9596_v21  ;;  %v3810_v50 = vpop.f32.mrb[27].mxu0  ;;  %10225 = vmatpush3.bf16.msra.mxu1 %v12778_v30  ;;  %v5016_v49 = vmax.f32 %v3816_v39, 0.0  ;;  %v10812_v30 = vld [vmem:[%s13531_s22 + $0x628] sm:$0xff]  }
 0x31e   :  { %v3811_v59 = vadd.f32 %v12641_v54, %v3810_v50  ;;  %10227 = vmatprep.subr.bf16.mxu1 %v10226_v33  ;;  %v5014_v29 = vmax.f32 %v3808_v51, 0.0 }
 0x31f   :  { %v5017_v38 = vmax.f32 %v3819_v40, 0.0  ;;  %9702 = vmatmul.mubr.msk.bf16.gmra.mrb[132].mxu0 %vm1880_vm0, %v10810_v37 }
 0x320   :  { %v5015_v27 = vmax.f32 %v3811_v59, 0.0  ;;  %9705 = vmatprep.mubr.msk.bf16.mxu0 %vm1880_vm0, %v10811_v53  ;;  %v10815_v59 = vld [vmem:[%s13531_s22 + $0x640] sm:$0xff]  }
 0x321   :  { %v10234_v7 = vpack.c.bf16 %v5017_v38, %v5016_v49  ;;  %10229 = vmatpush3.bf16.msra.mxu1 %v12775_v28 }
 0x322   :  { %v10230_v48 = vpack.c.bf16 %v5015_v27, %v5014_v29  ;;  %v9599_v61 = vpop.f32.mrb[28].mxu0 }
 0x323   :  { %v3832_v1 = vadd.f32 %v12641_v54, %v9599_v61  ;;  %v3823_v46 = vpop.f32.mrb[29].mxu0 }
 0x324   :  { %v3824_v0 = vadd.f32 %v12641_v54, %v3823_v46  ;;  %v9600_v13 = vpop.f32.mrb[30].mxu0  ;;  %10231 = vmatprep.subr.bf16.mxu1 %v10230_v48 }
 0x325   :  { %v3835_v10 = vadd.f32 %v12641_v54, %v9600_v13  ;;  %v3826_v28 = vpop.f32.mrb[31].mxu0  ;;  %10233 = vmatpush3.bf16.msra.mxu1 %v12806_v56  ;;  %v5020_v33 = vmax.f32 %v3832_v1, 0.0  ;;  %v10814_v56 = vld [vmem:[%s13531_s22 + $0x638] sm:$0xff]   ;;  %v5262_v1 = vld [vmem:[%s13508_s3 + $0x80] sm:$0xff] }
 0x326   :  { %v3827_v35 = vadd.f32 %v12641_v54, %v3826_v28  ;;  %10235 = vmatprep.subr.bf16.mxu1 %v10234_v7  ;;  %v5018_v45 = vmax.f32 %v3824_v0, 0.0 }
 0x327   :  { %v5021_v18 = vmax.f32 %v3835_v10, 0.0  ;;  %9706 = vmatmul.mubr.msk.bf16.gmra.mrb[136].mxu0 %vm1880_vm0, %v10812_v30  ;;  %v5295_v30 = vld [vmem:[%s13508_s3 + $0x188] sm:$0xff] }
 0x328   :  { %v5019_v39 = vmax.f32 %v3827_v35, 0.0  ;;  %9709 = vmatprep.mubr.msk.bf16.mxu0 %vm1880_vm0, %v10813_v26  ;;  %v10816_v26 = vld [vmem:[%s13531_s22 + $0x648] sm:$0xff]  }
 0x329   :  { %v10242_v63 = vpack.c.bf16 %v5021_v18, %v5020_v33  ;;  %10237 = vmatpush3.bf16.msra.mxu1 %v12804_v19  ;;  %v5294_v33 = vld [vmem:[%s13508_s3 + $0x180] sm:$0xff] }
 0x32a   :  { %v10238_v37 = vpack.c.bf16 %v5019_v39, %v5018_v45  ;;  %v9603_v51 = vpop.f32.mrb[32].mxu0  ;;  %v5265_v45 = vld [vmem:[%s13508_s3 + $0x98] sm:$0xff] }
 0x32b   :  { %v3848_v21 = vadd.f32 %v12641_v54, %v9603_v51  ;;  %v3839_v53 = vpop.f32.mrb[33].mxu0 }
 0x32c   :  { %v3840_v40 = vadd.f32 %v12641_v54, %v3839_v53  ;;  %v9604_v50 = vpop.f32.mrb[34].mxu0  ;;  %10239 = vmatprep.subr.bf16.mxu1 %v10238_v37 }
 0x32d   :  { %v3851_v49 = vadd.f32 %v12641_v54, %v9604_v50  ;;  %v3842_v19 = vpop.f32.mrb[35].mxu0  ;;  %10241 = vmatpush3.bf16.msra.mxu1 %v12822_v31  ;;  %v5024_v29 = vmax.f32 %v3848_v21, 0.0 }
 0x32e   :  { %v3843_v38 = vadd.f32 %v12641_v54, %v3842_v19  ;;  %10243 = vmatprep.subr.bf16.mxu1 %v10242_v63  ;;  %v5022_v7 = vmax.f32 %v3840_v40, 0.0 }
 0x32f   :  { %v5025_v27 = vmax.f32 %v3851_v49, 0.0  ;;  %9710 = vmatmul.mubr.msk.bf16.gmra.mrb[140].mxu0 %vm1880_vm0, %v10814_v56 }
 0x330   :  { %v5023_v48 = vmax.f32 %v3843_v38, 0.0  ;;  %9713 = vmatprep.mubr.msk.bf16.mxu0 %vm1880_vm0, %v10815_v59 }
 0x331   :  { %v12895_v61 = vpack.c.bf16 %v5025_v27, %v5024_v29  ;;  %10245 = vmatpush3.bf16.msra.mxu1 %v12820_v6 }
 0x332   :  { %v12901_v31 = vpack.c.bf16 %v5023_v48, %v5022_v7  ;;  %v9607_v46 = vpop.f32.mrb[36].mxu0 }
 0x333   :  { %v3864_v0 = vadd.f32 %v12641_v54, %v9607_v46  ;;  %v3855_v13 = vpop.f32.mrb[37].mxu0 }
 0x334   :  { %v3856_v6 = vadd.f32 %v12641_v54, %v3855_v13  ;;  %v9608_v10 = vpop.f32.mrb[38].mxu0  ;;  %5975 = vmatmul.mubr.f32.vlgmr.msra.gmra.mrb[140].mxu1 %v5262_v1 }
 0x335   :  { %v3867_v28 = vadd.f32 %v12641_v54, %v9608_v10  ;;  %v3858_v35 = vpop.f32.mrb[39].mxu0  ;;  %5979 = vmatprep.mubr.f32.mxu1 %v5295_v30  ;;  %v5028_v39 = vmax.f32 %v3864_v0, 0.0 }
 0x336   :  { %v3859_v18 = vadd.f32 %v12641_v54, %v3858_v35  ;;  %v5026_v37 = vmax.f32 %v3856_v6, 0.0 }
 0x337   :  { %v5029_v63 = vmax.f32 %v3867_v28, 0.0  ;;  %9714 = vmatmul.mubr.msk.bf16.gmra.mrb[144].mxu0 %vm1880_vm0, %v10816_v26 }
 0x338   :  { %v5027_v51 = vmax.f32 %v3859_v18, 0.0  ;;  %5980 = vmatmul.mubr.f32.gmra.mrb[142].mxu1 %v5294_v33 }
 0x339   :  { %v12920_v21 = vpack.c.bf16 %v5029_v63, %v5028_v39  ;;  %6049 = vmatprep.mubr.f32.mxu1 %v5265_v45 }
 0x33a   :  { %v12922_v53 = vpack.c.bf16 %v5027_v51, %v5026_v37  ;;  %v9611_v56 = vpop.f32.mrb[40].mxu0 }
 0x33b   :  { %v3880_v40 = vadd.f32 %v12641_v54, %v9611_v56  ;;  %v3871_v50 = vpop.f32.mrb[41].mxu0 }
 0x33c   :  { %v3872_v59 = vadd.f32 %v12641_v54, %v3871_v50  ;;  %v9612_v49 = vpop.f32.mrb[42].mxu0 }
 0x33d   :  { %v3883_v19 = vadd.f32 %v12641_v54, %v9612_v49  ;;  %v3874_v38 = vpop.f32.mrb[43].mxu0  ;;  %v5032_v27 = vmax.f32 %v3880_v40, 0.0 }
 0x33e   :  { %v3875_v29 = vadd.f32 %v12641_v54, %v3874_v38  ;;  %v5030_v48 = vmax.f32 %v3872_v59, 0.0 }
 0x33f   :  { %v5033_v7 = vmax.f32 %v3883_v19, 0.0 }
 0x340   :  { %v5031_v1 = vmax.f32 %v3875_v29, 0.0 }
 0x341   :  { %v12928_v46 = vpack.c.bf16 %v5033_v7, %v5032_v27 }
 0x342   :  { %v12930_v30 = vpack.c.bf16 %v5031_v1, %v5030_v48  ;;  %v9615_v0 = vpop.f32.mrb[44].mxu0 }
 0x343   :  { %v3896_v13 = vadd.f32 %v12641_v54, %v9615_v0  ;;  %v3887_v26 = vpop.f32.mrb[45].mxu0 }
 0x344   :  { %v3888_v6 = vadd.f32 %v12641_v54, %v3887_v26  ;;  %v9616_v10 = vpop.f32.mrb[46].mxu0 }
 0x345   :  { %v3899_v28 = vadd.f32 %v12641_v54, %v9616_v10  ;;  %v3890_v35 = vpop.f32.mrb[47].mxu0  ;;  %v5036_v18 = vmax.f32 %v3896_v13, 0.0 }
 0x346   :  { %v3891_v33 = vadd.f32 %v12641_v54, %v3890_v35  ;;  %v5034_v63 = vmax.f32 %v3888_v6, 0.0 }
 0x347   :  { %v5037_v45 = vmax.f32 %v3899_v28, 0.0  ;;  %v8859_v39 = vpop.f32.mrb[128].mxu1 }
 0x348   :  { %v5035_v37 = vmax.f32 %v3891_v33, 0.0  ;;  %v8860_v51 = vpop.f32.mrb[129].mxu1 }
 0x349   :  { %v12936_v56 = vpack.c.bf16 %v5037_v45, %v5036_v18  ;;  %v8861_v40 = vadd.f32 %v8860_v51, %v8859_v39 }
 0x34a   :  { %v12938_v50 = vpack.c.bf16 %v5035_v37, %v5034_v63  ;;  %v9619_v59 = vpop.f32.mrb[48].mxu0 }
 0x34b   :  { %v3912_v49 = vadd.f32 %v12641_v54, %v9619_v59  ;;  %v3903_v19 = vpop.f32.mrb[49].mxu0  ;;  %v12942_v38 = vadd.f32 %v8861_v40, %v12835_v4  ;;  %v8862_v29 = vpop.f32.mrb[130].mxu1 }
 0x34c   :  { %v3904_v27 = vadd.f32 %v12641_v54, %v3903_v19  ;;  %v9620_v7 = vpop.f32.mrb[50].mxu0  ;;  %v8863_v48 = vpop.f32.mrb[131].mxu1 }
 0x34d   :  { %v3915_v1 = vadd.f32 %v12641_v54, %v9620_v7  ;;  %v3906_v0 = vpop.f32.mrb[51].mxu0  ;;  %v8864_v13 = vadd.f32 %v8863_v48, %v8862_v29  ;;  %v5040_v6 = vmax.f32 %v3912_v49, 0.0 }
 0x34e   :  { %v3907_v26 = vadd.f32 %v12641_v54, %v3906_v0  ;;  %v5038_v35 = vmax.f32 %v3904_v27, 0.0 }
 0x34f   :  { %v5041_v10 = vmax.f32 %v3915_v1, 0.0  ;;  %v12948_v28 = vadd.f32 %v8864_v13, %v12842_v57 }
 0x350   :  { %v5039_v33 = vmax.f32 %v3907_v26, 0.0 }
 0x351   :  { %v10250_v4 = vpack.c.bf16 %v5041_v10, %v5040_v6 }
 0x352   :  { %v10246_v18 = vpack.c.bf16 %v5039_v33, %v5038_v35  ;;  %v9623_v45 = vpop.f32.mrb[52].mxu0 }
 0x353   :  { %v3928_v39 = vadd.f32 %v12641_v54, %v9623_v45  ;;  %v3919_v63 = vpop.f32.mrb[53].mxu0 }
 0x354   :  { %v3920_v37 = vadd.f32 %v12641_v54, %v3919_v63  ;;  %v9624_v51 = vpop.f32.mrb[54].mxu0  ;;  %10247 = vmatprep.subr.bf16.mxu1 %v10246_v18 }
 0x355   :  { %v3931_v40 = vadd.f32 %v12641_v54, %v9624_v51  ;;  %v3922_v59 = vpop.f32.mrb[55].mxu0  ;;  %10249 = vmatpush3.bf16.msra.mxu1 %v12901_v31  ;;  %v5044_v49 = vmax.f32 %v3928_v39, 0.0 }
 0x356   :  { %v3923_v57 = vadd.f32 %v12641_v54, %v3922_v59  ;;  %10251 = vmatprep.subr.bf16.mxu1 %v10250_v4  ;;  %v5042_v29 = vmax.f32 %v3920_v37, 0.0  ;;  %v12965_v37 = vld [vmem:[%s13532_s24] ss:$0 sm:$0xff]  ;;  %s7822_s24 = sshll.u32 %s10923_s28, 4  ;;  %s7823_s24 = int_to_ptr.vmem [resolvable:$true] %s7822_s24 }
 0x357   :  { %v5045_v19 = vmax.f32 %v3931_v40, 0.0  ;;  %s10869_s29 = scalar_lea.vmem %s7823_s24, 32  ;;  %p10874_p1 = scmp.lt.s32.totalorder %s7823_s24, %s7823_s24 }
 0x358   :  { %v5043_v27 = vmax.f32 %v3923_v57, 0.0  ;;  %p10870_p0 = scmp.ne.s32.totalorder %s7823_s24, %s10869_s29  ;;  %p10875_p2 = scmp.lt.s32.totalorder %s10869_s29, %s10869_s29 }
 0x359   :  { %v10258_v7 = vpack.c.bf16 %v5045_v19, %v5044_v49  ;;  %10253 = vmatpush3.bf16.msra.mxu1 %v12895_v61 }
 0x35a   :  { %v10254_v48 = vpack.c.bf16 %v5043_v27, %v5042_v29  ;;  %v9627_v1 = vpop.f32.mrb[56].mxu0  ;;  %p10876_p3 = por %p10875_p2, %p10874_p1 }
 0x35b   :  { %v3944_v0 = vadd.f32 %v12641_v54, %v9627_v1  ;;  %v3935_v13 = vpop.f32.mrb[57].mxu0 }
 0x35c   :  { %v3936_v26 = vadd.f32 %v12641_v54, %v3935_v13  ;;  %v9628_v6 = vpop.f32.mrb[58].mxu0  ;;  %10255 = vmatprep.subr.bf16.mxu1 %v10254_v48  ;;  %p10877_p4 = pnand %p10876_p3, %p10870_p0 }
 0x35d   :  { %v3947_v31 = vadd.f32 %v12641_v54, %v9628_v6  ;;  %v3938_v10 = vpop.f32.mrb[59].mxu0  ;;  %10257 = vmatpush3.bf16.msra.mxu1 %v12922_v53  ;;  %v5048_v33 = vmax.f32 %v3944_v0, 0.0 }
 0x35e   :  { %v3939_v35 = vadd.f32 %v12641_v54, %v3938_v10  ;;  %10259 = vmatprep.subr.bf16.mxu1 %v10258_v7  ;;  %v5046_v61 = vmax.f32 %v3936_v26, 0.0 }
 0x35f   :  { %v5049_v4 = vmax.f32 %v3947_v31, 0.0 }
 0x360   :  { %v5047_v18 = vmax.f32 %v3939_v35, 0.0 }
 0x361   :  { %v10266_v45 = vpack.c.bf16 %v5049_v4, %v5048_v33  ;;  %10261 = vmatpush3.bf16.msra.mxu1 %v12920_v21 }
 0x362   :  { %v10262_v39 = vpack.c.bf16 %v5047_v18, %v5046_v61  ;;  %v9631_v63 = vpop.f32.mrb[60].mxu0  ;;  %v5264_v18 = vld [vmem:[%s13508_s3 + $0x90] sm:$0xff] }
 0x363   :  { %v3960_v51 = vadd.f32 %v12965_v37, %v9631_v63  ;;  %v3951_v53 = vpop.f32.mrb[61].mxu0 }
 0x364   :  { %v3952_v54 = vadd.f32 %v12965_v37, %v3951_v53  ;;  %v9632_v40 = vpop.f32.mrb[62].mxu0  ;;  %10263 = vmatprep.subr.bf16.mxu1 %v10262_v39 }
 0x365   :  { %v3963_v59 = vadd.f32 %v12965_v37, %v9632_v40  ;;  %v3954_v57 = vpop.f32.mrb[63].mxu0  ;;  %10265 = vmatpush3.bf16.msra.mxu1 %v12930_v30  ;;  %v5052_v49 = vmax.f32 %v3960_v51, 0.0 }
 0x366   :  { %v3955_v21 = vadd.f32 %v12965_v37, %v3954_v57  ;;  %10267 = vmatprep.subr.bf16.mxu1 %v10266_v45  ;;  %v5050_v29 = vmax.f32 %v3952_v54, 0.0 }
 0x367   :  { %v5053_v19 = vmax.f32 %v3963_v59, 0.0  ;;  %v5296_v59 = vld [vmem:[%s13508_s3 + $0x190] sm:$0xff] }
 0x368   :  { %v5051_v27 = vmax.f32 %v3955_v21, 0.0  ;;  %v5267_v21 = vld [vmem:[%s13508_s3 + $0xa8] sm:$0xff] }
 0x369   :  { %v10274_v7 = vpack.c.bf16 %v5053_v19, %v5052_v49  ;;  %10269 = vmatpush3.bf16.msra.mxu1 %v12928_v46 }
 0x36a   :  { %v10270_v48 = vpack.c.bf16 %v5051_v27, %v5050_v29  ;;  %v9635_v1 = vpop.f32.mrb[64].mxu0 }
 0x36b   :  { %v3976_v0 = vadd.f32 %v12965_v37, %v9635_v1  ;;  %v3967_v13 = vpop.f32.mrb[65].mxu0 }
 0x36c   :  { %v3968_v26 = vadd.f32 %v12965_v37, %v3967_v13  ;;  %v9636_v6 = vpop.f32.mrb[66].mxu0  ;;  %10271 = vmatprep.subr.bf16.mxu1 %v10270_v48 }
 0x36d   :  { %v3979_v30 = vadd.f32 %v12965_v37, %v9636_v6  ;;  %v3970_v31 = vpop.f32.mrb[67].mxu0  ;;  %10273 = vmatpush3.bf16.msra.mxu1 %v12938_v50  ;;  %v5056_v35 = vmax.f32 %v3976_v0, 0.0  ;;  %v5297_v50 = vld [vmem:[%s13508_s3 + $0x198] sm:$0xff] }
 0x36e   :  { %v3971_v10 = vadd.f32 %v12965_v37, %v3970_v31  ;;  %10275 = vmatprep.subr.bf16.mxu1 %v10274_v7  ;;  %v5054_v46 = vmax.f32 %v3968_v26, 0.0 }
 0x36f   :  { %v5057_v33 = vmax.f32 %v3979_v30, 0.0 }
 0x370   :  { %v5055_v4 = vmax.f32 %v3971_v10, 0.0 }
 0x371   :  { %v12978_v61 = vpack.c.bf16 %v5057_v33, %v5056_v35  ;;  %10277 = vmatpush3.bf16.msra.mxu1 %v12936_v56 }
 0x372   :  { %v12984_v45 = vpack.c.bf16 %v5055_v4, %v5054_v46  ;;  %v9639_v39 = vpop.f32.mrb[68].mxu0 }
 0x373   :  { %v3992_v63 = vadd.f32 %v12965_v37, %v9639_v39  ;;  %v3983_v51 = vpop.f32.mrb[69].mxu0 }
 0x374   :  { %v3984_v53 = vadd.f32 %v12965_v37, %v3983_v51  ;;  %v9640_v54 = vpop.f32.mrb[70].mxu0  ;;  %6050 = vmatmul.mubr.f32.vlgmr.msra.gmra.mrb[144].mxu1 %v5264_v18 }
 0x375   :  { %v3995_v56 = vadd.f32 %v12965_v37, %v9640_v54  ;;  %v3986_v40 = vpop.f32.mrb[71].mxu0  ;;  %6054 = vmatprep.mubr.f32.mxu1 %v5297_v50  ;;  %v5060_v49 = vmax.f32 %v3992_v63, 0.0 }
 0x376   :  { %v3987_v57 = vadd.f32 %v12965_v37, %v3986_v40  ;;  %v5058_v29 = vmax.f32 %v3984_v53, 0.0 }
 0x377   :  { %v5061_v19 = vmax.f32 %v3995_v56, 0.0 }
 0x378   :  { %v5059_v27 = vmax.f32 %v3987_v57, 0.0  ;;  %6055 = vmatmul.mubr.f32.gmra.mrb[146].mxu1 %v5296_v59 }
 0x379   :  { %v12999_v7 = vpack.c.bf16 %v5061_v19, %v5060_v49  ;;  %6124 = vmatprep.mubr.f32.mxu1 %v5267_v21 }
 0x37a   :  { %v13001_v48 = vpack.c.bf16 %v5059_v27, %v5058_v29  ;;  %v9643_v1 = vpop.f32.mrb[72].mxu0 }
 0x37b   :  { %v4008_v0 = vadd.f32 %v12965_v37, %v9643_v1  ;;  %v3999_v13 = vpop.f32.mrb[73].mxu0 }
 0x37c   :  { %v4000_v26 = vadd.f32 %v12965_v37, %v3999_v13  ;;  %v9644_v6 = vpop.f32.mrb[74].mxu0 }
 0x37d   :  { %v4011_v30 = vadd.f32 %v12965_v37, %v9644_v6  ;;  %v4002_v31 = vpop.f32.mrb[75].mxu0  ;;  %v5064_v35 = vmax.f32 %v4008_v0, 0.0 }
 0x37e   :  { %v4003_v10 = vadd.f32 %v12965_v37, %v4002_v31  ;;  %v5062_v46 = vmax.f32 %v4000_v26, 0.0 }
 0x37f   :  { %v5065_v33 = vmax.f32 %v4011_v30, 0.0 }
 0x380   :  { %v5063_v4 = vmax.f32 %v4003_v10, 0.0 }
 0x381   :  { %v13007_v18 = vpack.c.bf16 %v5065_v33, %v5064_v35 }
 0x382   :  { %v13009_v39 = vpack.c.bf16 %v5063_v4, %v5062_v46  ;;  %v9647_v50 = vpop.f32.mrb[76].mxu0 }
 0x383   :  { %v4024_v63 = vadd.f32 %v12965_v37, %v9647_v50  ;;  %v4015_v51 = vpop.f32.mrb[77].mxu0 }
 0x384   :  { %v4016_v53 = vadd.f32 %v12965_v37, %v4015_v51  ;;  %v9648_v54 = vpop.f32.mrb[78].mxu0 }
 0x385   :  { %v4027_v56 = vadd.f32 %v12965_v37, %v9648_v54  ;;  %v4018_v40 = vpop.f32.mrb[79].mxu0  ;;  %v5068_v57 = vmax.f32 %v4024_v63, 0.0 }
 0x386   :  { %v4019_v59 = vadd.f32 %v12965_v37, %v4018_v40  ;;  %v5066_v19 = vmax.f32 %v4016_v53, 0.0 }
 0x387   :  { %v5069_v21 = vmax.f32 %v4027_v56, 0.0  ;;  %v8897_v49 = vpop.f32.mrb[132].mxu1 }
 0x388   :  { %v5067_v29 = vmax.f32 %v4019_v59, 0.0  ;;  %v8898_v27 = vpop.f32.mrb[133].mxu1 }
 0x389   :  { %v13015_v1 = vpack.c.bf16 %v5069_v21, %v5068_v57  ;;  %v8899_v0 = vadd.f32 %v8898_v27, %v8897_v49 }
 0x38a   :  { %v13017_v13 = vpack.c.bf16 %v5067_v29, %v5066_v19  ;;  %v9651_v26 = vpop.f32.mrb[80].mxu0 }
 0x38b   :  { %v4040_v6 = vadd.f32 %v12965_v37, %v9651_v26  ;;  %v4031_v30 = vpop.f32.mrb[81].mxu0  ;;  %v13021_v31 = vadd.f32 %v8899_v0, %v12942_v38  ;;  %v8900_v10 = vpop.f32.mrb[134].mxu1 }
 0x38c   :  { %v4032_v35 = vadd.f32 %v12965_v37, %v4031_v30  ;;  %v9652_v33 = vpop.f32.mrb[82].mxu0  ;;  %v8901_v46 = vpop.f32.mrb[135].mxu1 }
 0x38d   :  { %v4043_v4 = vadd.f32 %v12965_v37, %v9652_v33  ;;  %v4034_v50 = vpop.f32.mrb[83].mxu0  ;;  %v8902_v63 = vadd.f32 %v8901_v46, %v8900_v10  ;;  %v5072_v53 = vmax.f32 %v4040_v6, 0.0 }
 0x38e   :  { %v4035_v51 = vadd.f32 %v12965_v37, %v4034_v50  ;;  %v5070_v40 = vmax.f32 %v4032_v35, 0.0 }
 0x38f   :  { %v5073_v54 = vmax.f32 %v4043_v4, 0.0  ;;  %v13027_v56 = vadd.f32 %v8902_v63, %v12948_v28 }
 0x390   :  { %v5071_v59 = vmax.f32 %v4035_v51, 0.0 }
 0x391   :  { %v10282_v38 = vpack.c.bf16 %v5073_v54, %v5072_v53 }
 0x392   :  { %v10278_v57 = vpack.c.bf16 %v5071_v59, %v5070_v40  ;;  %v9655_v21 = vpop.f32.mrb[84].mxu0 }
 0x393   :  { %v4056_v49 = vadd.f32 %v12965_v37, %v9655_v21  ;;  %v4047_v19 = vpop.f32.mrb[85].mxu0 }
 0x394   :  { %v4048_v29 = vadd.f32 %v12965_v37, %v4047_v19  ;;  %v9656_v27 = vpop.f32.mrb[86].mxu0  ;;  %10279 = vmatprep.subr.bf16.mxu1 %v10278_v57 }
 0x395   :  { %v4059_v0 = vadd.f32 %v12965_v37, %v9656_v27  ;;  %v4050_v26 = vpop.f32.mrb[87].mxu0  ;;  %10281 = vmatpush3.bf16.msra.mxu1 %v12984_v45  ;;  %v5076_v6 = vmax.f32 %v4056_v49, 0.0 }
 0x396   :  { %v4051_v28 = vadd.f32 %v12965_v37, %v4050_v26  ;;  %10283 = vmatprep.subr.bf16.mxu1 %v10282_v38  ;;  %v5074_v10 = vmax.f32 %v4048_v29, 0.0 }
 0x397   :  { %v5077_v30 = vmax.f32 %v4059_v0, 0.0 }
 0x398   :  { %v5075_v35 = vmax.f32 %v4051_v28, 0.0 }
 0x399   :  { %v10290_v33 = vpack.c.bf16 %v5077_v30, %v5076_v6  ;;  %10285 = vmatpush3.bf16.msra.mxu1 %v12978_v61 }
 0x39a   :  { %v10286_v46 = vpack.c.bf16 %v5075_v35, %v5074_v10  ;;  %v9659_v4 = vpop.f32.mrb[88].mxu0 }
 0x39b   :  { %v4072_v50 = vadd.f32 %v12965_v37, %v9659_v4  ;;  %v4063_v63 = vpop.f32.mrb[89].mxu0 }
 0x39c   :  { %v4064_v51 = vadd.f32 %v12965_v37, %v4063_v63  ;;  %v9660_v53 = vpop.f32.mrb[90].mxu0  ;;  %10287 = vmatprep.subr.bf16.mxu1 %v10286_v46 }
 0x39d   :  { %v4075_v45 = vadd.f32 %v12965_v37, %v9660_v53  ;;  %v4066_v54 = vpop.f32.mrb[91].mxu0  ;;  %10289 = vmatpush3.bf16.msra.mxu1 %v13001_v48  ;;  %v5080_v59 = vmax.f32 %v4072_v50, 0.0 }
 0x39e   :  { %v4067_v40 = vadd.f32 %v12965_v37, %v4066_v54  ;;  %10291 = vmatprep.subr.bf16.mxu1 %v10290_v33  ;;  %v5078_v61 = vmax.f32 %v4064_v51, 0.0 }
 0x39f   :  { %v5081_v38 = vmax.f32 %v4075_v45, 0.0 }
 0x3a0   :  { %v5079_v57 = vmax.f32 %v4067_v40, 0.0 }
 0x3a1   :  { %v10298_v21 = vpack.c.bf16 %v5081_v38, %v5080_v59  ;;  %10293 = vmatpush3.bf16.msra.mxu1 %v12999_v7 }
 0x3a2   :  { %v10294_v49 = vpack.c.bf16 %v5079_v57, %v5078_v61  ;;  %v9663_v19 = vpop.f32.mrb[92].mxu0  ;;  %v5266_v57 = vld [vmem:[%s13508_s3 + $0xa0] sm:$0xff] }
 0x3a3   :  { %v4088_v29 = vadd.f32 %v12965_v37, %v9663_v19  ;;  %v4079_v27 = vpop.f32.mrb[93].mxu0 }
 0x3a4   :  { %v4080_v0 = vadd.f32 %v12965_v37, %v4079_v27  ;;  %v9664_v26 = vpop.f32.mrb[94].mxu0  ;;  %10295 = vmatprep.subr.bf16.mxu1 %v10294_v49 }
 0x3a5   :  { %v4091_v48 = vadd.f32 %v12965_v37, %v9664_v26  ;;  %v4082_v28 = vpop.f32.mrb[95].mxu0  ;;  %10297 = vmatpush3.bf16.msra.mxu1 %v13009_v39  ;;  %v5084_v30 = vmax.f32 %v4088_v29, 0.0 }
 0x3a6   :  { %v4083_v6 = vadd.f32 %v12965_v37, %v4082_v28  ;;  %10299 = vmatprep.subr.bf16.mxu1 %v10298_v21  ;;  %v5082_v7 = vmax.f32 %v4080_v0, 0.0 }
 0x3a7   :  { %v5085_v10 = vmax.f32 %v4091_v48, 0.0  ;;  %v5298_v48 = vld [vmem:[%s13508_s3 + $0x1a0] sm:$0xff] }
 0x3a8   :  { %v5083_v35 = vmax.f32 %v4083_v6, 0.0  ;;  %v5269_v6 = vld [vmem:[%s13508_s3 + $0xb8] sm:$0xff] }
 0x3a9   :  { %v10306_v33 = vpack.c.bf16 %v5085_v10, %v5084_v30  ;;  %10301 = vmatpush3.bf16.msra.mxu1 %v13007_v18 }
 0x3aa   :  { %v10302_v46 = vpack.c.bf16 %v5083_v35, %v5082_v7  ;;  %v9667_v4 = vpop.f32.mrb[96].mxu0 }
 0x3ab   :  { %v4104_v50 = vadd.f32 %v12965_v37, %v9667_v4  ;;  %v4095_v63 = vpop.f32.mrb[97].mxu0 }
 0x3ac   :  { %v4096_v51 = vadd.f32 %v12965_v37, %v4095_v63  ;;  %v9668_v53 = vpop.f32.mrb[98].mxu0  ;;  %10303 = vmatprep.subr.bf16.mxu1 %v10302_v46 }
 0x3ad   :  { %v4107_v39 = vadd.f32 %v12965_v37, %v9668_v53  ;;  %v4098_v45 = vpop.f32.mrb[99].mxu0  ;;  %10305 = vmatpush3.bf16.msra.mxu1 %v13017_v13  ;;  %v5088_v40 = vmax.f32 %v4104_v50, 0.0  ;;  %v5299_v13 = vld [vmem:[%s13508_s3 + $0x1a8] sm:$0xff] }
 0x3ae   :  { %v4099_v54 = vadd.f32 %v12965_v37, %v4098_v45  ;;  %10307 = vmatprep.subr.bf16.mxu1 %v10306_v33  ;;  %v5086_v18 = vmax.f32 %v4096_v51, 0.0 }
 0x3af   :  { %v5089_v59 = vmax.f32 %v4107_v39, 0.0 }
 0x3b0   :  { %v5087_v38 = vmax.f32 %v4099_v54, 0.0 }
 0x3b1   :  { %v13052_v61 = vpack.c.bf16 %v5089_v59, %v5088_v40  ;;  %10309 = vmatpush3.bf16.msra.mxu1 %v13015_v1 }
 0x3b2   :  { %v13058_v21 = vpack.c.bf16 %v5087_v38, %v5086_v18  ;;  %v9671_v49 = vpop.f32.mrb[100].mxu0 }
 0x3b3   :  { %v4120_v19 = vadd.f32 %v12965_v37, %v9671_v49  ;;  %v4111_v29 = vpop.f32.mrb[101].mxu0 }
 0x3b4   :  { %v4112_v27 = vadd.f32 %v12965_v37, %v4111_v29  ;;  %v9672_v0 = vpop.f32.mrb[102].mxu0  ;;  %6125 = vmatmul.mubr.f32.vlgmr.msra.gmra.mrb[148].mxu1 %v5266_v57 }
 0x3b5   :  { %v4123_v1 = vadd.f32 %v12965_v37, %v9672_v0  ;;  %v4114_v26 = vpop.f32.mrb[103].mxu0  ;;  %6129 = vmatprep.mubr.f32.mxu1 %v5299_v13  ;;  %v5092_v30 = vmax.f32 %v4120_v19, 0.0 }
 0x3b6   :  { %v4115_v28 = vadd.f32 %v12965_v37, %v4114_v26  ;;  %v5090_v7 = vmax.f32 %v4112_v27, 0.0 }
 0x3b7   :  { %v5093_v10 = vmax.f32 %v4123_v1, 0.0 }
 0x3b8   :  { %v5091_v35 = vmax.f32 %v4115_v28, 0.0  ;;  %6130 = vmatmul.mubr.f32.gmra.mrb[150].mxu1 %v5298_v48 }
 0x3b9   :  { %v13073_v33 = vpack.c.bf16 %v5093_v10, %v5092_v30  ;;  %6199 = vmatprep.mubr.f32.mxu1 %v5269_v6 }
 0x3ba   :  { %v13075_v46 = vpack.c.bf16 %v5091_v35, %v5090_v7  ;;  %v9675_v4 = vpop.f32.mrb[104].mxu0 }
 0x3bb   :  { %v4136_v50 = vadd.f32 %v12965_v37, %v9675_v4  ;;  %v4127_v63 = vpop.f32.mrb[105].mxu0 }
 0x3bc   :  { %v4128_v51 = vadd.f32 %v12965_v37, %v4127_v63  ;;  %v9676_v53 = vpop.f32.mrb[106].mxu0 }
 0x3bd   :  { %v4139_v39 = vadd.f32 %v12965_v37, %v9676_v53  ;;  %v4130_v45 = vpop.f32.mrb[107].mxu0  ;;  %v5096_v40 = vmax.f32 %v4136_v50, 0.0 }
 0x3be   :  { %v4131_v54 = vadd.f32 %v12965_v37, %v4130_v45  ;;  %v5094_v18 = vmax.f32 %v4128_v51, 0.0 }
 0x3bf   :  { %v5097_v59 = vmax.f32 %v4139_v39, 0.0 }
 0x3c0   :  { %v5095_v38 = vmax.f32 %v4131_v54, 0.0 }
 0x3c1   :  { %v13081_v57 = vpack.c.bf16 %v5097_v59, %v5096_v40 }
 0x3c2   :  { %v13083_v49 = vpack.c.bf16 %v5095_v38, %v5094_v18  ;;  %v9679_v13 = vpop.f32.mrb[108].mxu0 }
 0x3c3   :  { %v4152_v19 = vadd.f32 %v12965_v37, %v9679_v13  ;;  %v4143_v29 = vpop.f32.mrb[109].mxu0 }
 0x3c4   :  { %v4144_v27 = vadd.f32 %v12965_v37, %v4143_v29  ;;  %v9680_v0 = vpop.f32.mrb[110].mxu0 }
 0x3c5   :  { %v4155_v1 = vadd.f32 %v12965_v37, %v9680_v0  ;;  %v4146_v26 = vpop.f32.mrb[111].mxu0  ;;  %v5100_v28 = vmax.f32 %v4152_v19, 0.0 }
 0x3c6   :  { %v4147_v48 = vadd.f32 %v12965_v37, %v4146_v26  ;;  %v5098_v10 = vmax.f32 %v4144_v27, 0.0 }
 0x3c7   :  { %v5101_v6 = vmax.f32 %v4155_v1, 0.0  ;;  %v8935_v30 = vpop.f32.mrb[136].mxu1 }
 0x3c8   :  { %v5099_v7 = vmax.f32 %v4147_v48, 0.0  ;;  %v8936_v35 = vpop.f32.mrb[137].mxu1 }
 0x3c9   :  { %v13089_v4 = vpack.c.bf16 %v5101_v6, %v5100_v28  ;;  %v8937_v50 = vadd.f32 %v8936_v35, %v8935_v30 }
 0x3ca   :  { %v13091_v63 = vpack.c.bf16 %v5099_v7, %v5098_v10  ;;  %v9683_v51 = vpop.f32.mrb[112].mxu0 }
 0x3cb   :  { %v13094_v53 = vadd.f32 %v8937_v50, %v13021_v31  ;;  %v4168_v39 = vadd.f32 %v12965_v37, %v9683_v51  ;;  %v4159_v45 = vpop.f32.mrb[113].mxu0  ;;  %v8938_v54 = vpop.f32.mrb[138].mxu1 }
 0x3cc   :  { %v4160_v40 = vadd.f32 %v12965_v37, %v4159_v45  ;;  %v9684_v59 = vpop.f32.mrb[114].mxu0  ;;  %v8939_v18 = vpop.f32.mrb[139].mxu1 }
 0x3cd   :  { %v4171_v38 = vadd.f32 %v12965_v37, %v9684_v59  ;;  %v8940_v13 = vadd.f32 %v8939_v18, %v8938_v54  ;;  %v4162_v19 = vpop.f32.mrb[115].mxu0  ;;  %v5104_v27 = vmax.f32 %v4168_v39, 0.0 }
 0x3ce   :  { %v4163_v29 = vadd.f32 %v12965_v37, %v4162_v19  ;;  %v5102_v31 = vmax.f32 %v4160_v40, 0.0 }
 0x3cf   :  { %v5105_v0 = vmax.f32 %v4171_v38, 0.0  ;;  %v13101_v1 = vadd.f32 %v8940_v13, %v13027_v56 }
 0x3d0   :  { %v5103_v26 = vmax.f32 %v4163_v29, 0.0 }
 0x3d1   :  { %v10314_v48 = vpack.c.bf16 %v5105_v0, %v5104_v27 }
 0x3d2   :  { %v10310_v28 = vpack.c.bf16 %v5103_v26, %v5102_v31  ;;  %v9687_v6 = vpop.f32.mrb[116].mxu0 }
 0x3d3   :  { %v4184_v30 = vadd.f32 %v12965_v37, %v9687_v6  ;;  %v4175_v10 = vpop.f32.mrb[117].mxu0 }
 0x3d4   :  { %v4176_v7 = vadd.f32 %v12965_v37, %v4175_v10  ;;  %v9688_v35 = vpop.f32.mrb[118].mxu0  ;;  %10311 = vmatprep.subr.bf16.mxu1 %v10310_v28 }
 0x3d5   :  { %v4187_v50 = vadd.f32 %v12965_v37, %v9688_v35  ;;  %v4178_v51 = vpop.f32.mrb[119].mxu0  ;;  %10313 = vmatpush3.bf16.msra.mxu1 %v13058_v21  ;;  %v5108_v39 = vmax.f32 %v4184_v30, 0.0 }
 0x3d6   :  { %v4179_v56 = vadd.f32 %v12965_v37, %v4178_v51  ;;  %10315 = vmatprep.subr.bf16.mxu1 %v10314_v48  ;;  %v5106_v54 = vmax.f32 %v4176_v7, 0.0 }
 0x3d7   :  { %v5109_v45 = vmax.f32 %v4187_v50, 0.0 }
 0x3d8   :  { %v5107_v40 = vmax.f32 %v4179_v56, 0.0 }
 0x3d9   :  { %v10322_v59 = vpack.c.bf16 %v5109_v45, %v5108_v39  ;;  %10317 = vmatpush3.bf16.msra.mxu1 %v13052_v61 }
 0x3da   :  { %v10318_v18 = vpack.c.bf16 %v5107_v40, %v5106_v54  ;;  %v9691_v38 = vpop.f32.mrb[120].mxu0 }
 0x3db   :  { %v4200_v13 = vadd.f32 %v12965_v37, %v9691_v38  ;;  %v4191_v19 = vpop.f32.mrb[121].mxu0 }
 0x3dc   :  { %v4192_v29 = vadd.f32 %v12965_v37, %v4191_v19  ;;  %v9692_v27 = vpop.f32.mrb[122].mxu0  ;;  %10319 = vmatprep.subr.bf16.mxu1 %v10318_v18 }
 0x3dd   :  { %v4203_v21 = vadd.f32 %v12965_v37, %v9692_v27  ;;  %v4194_v0 = vpop.f32.mrb[123].mxu0  ;;  %10321 = vmatpush3.bf16.msra.mxu1 %v13075_v46  ;;  %v5112_v26 = vmax.f32 %v4200_v13, 0.0 }
 0x3de   :  { %v4195_v31 = vadd.f32 %v12965_v37, %v4194_v0  ;;  %10323 = vmatprep.subr.bf16.mxu1 %v10322_v59  ;;  %v5110_v61 = vmax.f32 %v4192_v29, 0.0 }
 0x3df   :  { %v5113_v48 = vmax.f32 %v4203_v21, 0.0 }
 0x3e0   :  { %v5111_v28 = vmax.f32 %v4195_v31, 0.0 }
 0x3e1   :  { %v10330_v6 = vpack.c.bf16 %v5113_v48, %v5112_v26  ;;  %10325 = vmatpush3.bf16.msra.mxu1 %v13073_v33 }
 0x3e2   :  { %v10326_v30 = vpack.c.bf16 %v5111_v28, %v5110_v61  ;;  %v9695_v10 = vpop.f32.mrb[124].mxu0  ;;  %v5268_v28 = vld [vmem:[%s13508_s3 + $0xb0] sm:$0xff] }
 0x3e3   :  { %v4216_v7 = vadd.f32 %v12965_v37, %v9695_v10  ;;  %v4207_v35 = vpop.f32.mrb[125].mxu0 }
 0x3e4   :  { %v4208_v50 = vadd.f32 %v12965_v37, %v4207_v35  ;;  %v9696_v51 = vpop.f32.mrb[126].mxu0  ;;  %10327 = vmatprep.subr.bf16.mxu1 %v10326_v30 }
 0x3e5   :  { %v4219_v46 = vadd.f32 %v12965_v37, %v9696_v51  ;;  %v4210_v56 = vpop.f32.mrb[127].mxu0  ;;  %10329 = vmatpush3.bf16.msra.mxu1 %v13083_v49  ;;  %v5116_v45 = vmax.f32 %v4216_v7, 0.0 }
 0x3e6   :  { %v4211_v39 = vadd.f32 %v12965_v37, %v4210_v56  ;;  %10331 = vmatprep.subr.bf16.mxu1 %v10330_v6  ;;  %v5114_v33 = vmax.f32 %v4208_v50, 0.0 }
 0x3e7   :  { %v5117_v54 = vmax.f32 %v4219_v46, 0.0  ;;  %v5300_v46 = vld [vmem:[%s13508_s3 + $0x1b0] sm:$0xff] }
 0x3e8   :  { %v5115_v40 = vmax.f32 %v4211_v39, 0.0  ;;  %v5271_v39 = vld [vmem:[%s13508_s3 + $0xc8] sm:$0xff] }
 0x3e9   :  { %v10338_v59 = vpack.c.bf16 %v5117_v54, %v5116_v45  ;;  %10333 = vmatpush3.bf16.msra.mxu1 %v13081_v57 }
 0x3ea   :  { %v10334_v18 = vpack.c.bf16 %v5115_v40, %v5114_v33  ;;  %v9699_v38 = vpop.f32.mrb[128].mxu0 }
 0x3eb   :  { %v4232_v13 = vadd.f32 %v12965_v37, %v9699_v38  ;;  %v4223_v19 = vpop.f32.mrb[129].mxu0 }
 0x3ec   :  { %v4224_v29 = vadd.f32 %v12965_v37, %v4223_v19  ;;  %v9700_v27 = vpop.f32.mrb[130].mxu0  ;;  %10335 = vmatprep.subr.bf16.mxu1 %v10334_v18 }
 0x3ed   :  { %v4235_v49 = vadd.f32 %v12965_v37, %v9700_v27  ;;  %v4226_v21 = vpop.f32.mrb[131].mxu0  ;;  %10337 = vmatpush3.bf16.msra.mxu1 %v13091_v63  ;;  %v5120_v31 = vmax.f32 %v4232_v13, 0.0  ;;  %v5301_v63 = vld [vmem:[%s13508_s3 + $0x1b8] sm:$0xff] }
 0x3ee   :  { %v4227_v0 = vadd.f32 %v12965_v37, %v4226_v21  ;;  %10339 = vmatprep.subr.bf16.mxu1 %v10338_v59  ;;  %v5118_v57 = vmax.f32 %v4224_v29, 0.0 }
 0x3ef   :  { %v5121_v26 = vmax.f32 %v4235_v49, 0.0 }
 0x3f0   :  { %v5119_v48 = vmax.f32 %v4227_v0, 0.0 }
 0x3f1   :  { %v13126_v61 = vpack.c.bf16 %v5121_v26, %v5120_v31  ;;  %10341 = vmatpush3.bf16.msra.mxu1 %v13089_v4 }
 0x3f2   :  { %v13132_v6 = vpack.c.bf16 %v5119_v48, %v5118_v57  ;;  %v9703_v30 = vpop.f32.mrb[132].mxu0 }
 0x3f3   :  { %v4248_v10 = vadd.f32 %v12965_v37, %v9703_v30  ;;  %v4239_v7 = vpop.f32.mrb[133].mxu0 }
 0x3f4   :  { %v4240_v35 = vadd.f32 %v12965_v37, %v4239_v7  ;;  %v9704_v50 = vpop.f32.mrb[134].mxu0  ;;  %6200 = vmatmul.mubr.f32.vlgmr.msra.gmra.mrb[152].mxu1 %v5268_v28 }
 0x3f5   :  { %v4251_v4 = vadd.f32 %v12965_v37, %v9704_v50  ;;  %v4242_v51 = vpop.f32.mrb[135].mxu0  ;;  %6204 = vmatprep.mubr.f32.mxu1 %v5301_v63  ;;  %v5124_v45 = vmax.f32 %v4248_v10, 0.0 }
 0x3f6   :  { %v4243_v56 = vadd.f32 %v12965_v37, %v4242_v51  ;;  %v5122_v33 = vmax.f32 %v4240_v35, 0.0 }
 0x3f7   :  { %v5125_v54 = vmax.f32 %v4251_v4, 0.0 }
 0x3f8   :  { %v5123_v40 = vmax.f32 %v4243_v56, 0.0  ;;  %6205 = vmatmul.mubr.f32.gmra.mrb[154].mxu1 %v5300_v46 }
 0x3f9   :  { %v10356_v59 = vpack.c.bf16 %v5125_v54, %v5124_v45  ;;  %6274 = vmatprep.mubr.f32.mxu1 %v5271_v39 }
 0x3fa   :  { %v10352_v18 = vpack.c.bf16 %v5123_v40, %v5122_v33  ;;  %v9707_v38 = vpop.f32.mrb[136].mxu0 }
 0x3fb   :  { %v4264_v13 = vadd.f32 %v12965_v37, %v9707_v38  ;;  %v4255_v19 = vpop.f32.mrb[137].mxu0 }
 0x3fc   :  { %v4256_v29 = vadd.f32 %v12965_v37, %v4255_v19  ;;  %v9708_v27 = vpop.f32.mrb[138].mxu0 }
 0x3fd   :  { %v4267_v49 = vadd.f32 %v12965_v37, %v9708_v27  ;;  %v4258_v21 = vpop.f32.mrb[139].mxu0  ;;  %v5128_v31 = vmax.f32 %v4264_v13, 0.0 }
 0x3fe   :  { %v4259_v0 = vadd.f32 %v12965_v37, %v4258_v21  ;;  %v5126_v57 = vmax.f32 %v4256_v29, 0.0 }
 0x3ff   :  { %v5129_v26 = vmax.f32 %v4267_v49, 0.0 }
 0x400   :  { %v5127_v48 = vmax.f32 %v4259_v0, 0.0 }
 0x401   :  { %v10364_v28 = vpack.c.bf16 %v5129_v26, %v5128_v31 }
 0x402   :  { %v10360_v30 = vpack.c.bf16 %v5127_v48, %v5126_v57  ;;  %v9711_v63 = vpop.f32.mrb[140].mxu0 }
 0x403   :  { %v4280_v10 = vadd.f32 %v12965_v37, %v9711_v63  ;;  %v4271_v7 = vpop.f32.mrb[141].mxu0 }
 0x404   :  { %v4272_v35 = vadd.f32 %v12965_v37, %v4271_v7  ;;  %v9712_v50 = vpop.f32.mrb[142].mxu0 }
 0x405   :  { %v4283_v4 = vadd.f32 %v12965_v37, %v9712_v50  ;;  %v4274_v51 = vpop.f32.mrb[143].mxu0  ;;  %v5132_v56 = vmax.f32 %v4280_v10, 0.0 }
 0x406   :  { %v4275_v46 = vadd.f32 %v12965_v37, %v4274_v51  ;;  %v5130_v54 = vmax.f32 %v4272_v35, 0.0 }
 0x407   :  { %v5133_v39 = vmax.f32 %v4283_v4, 0.0  ;;  %v8973_v45 = vpop.f32.mrb[140].mxu1 }
 0x408   :  { %v5131_v33 = vmax.f32 %v4275_v46, 0.0  ;;  %v8974_v40 = vpop.f32.mrb[141].mxu1 }
 0x409   :  { %v10372_v38 = vpack.c.bf16 %v5133_v39, %v5132_v56  ;;  %v8975_v13 = vadd.f32 %v8974_v40, %v8973_v45  ;;  %v13575_v39 = vld [vmem:[#allocation30_spill] sm:$0xff] }
 0x40a   :  { %v10368_v19 = vpack.c.bf16 %v5131_v33, %v5130_v54  ;;  %v9715_v29 = vpop.f32.mrb[144].mxu0  ;;  %v13576_v45 = vld [vmem:[#allocation22_spill] sm:$0xff]  ;;  %v13577_v54 = vld [vmem:[#allocation29_spill] sm:$0xff] }
 0x40b   :  { %v5977_v27 = vadd.f32 %v8975_v13, %v13094_v53  ;;  %v4296_v49 = vadd.f32 %v12965_v37, %v9715_v29  ;;  %v4287_v21 = vpop.f32.mrb[145].mxu0  ;;  %v8976_v0 = vpop.f32.mrb[142].mxu1  ;;  %v13578_v13 = vld [vmem:[#allocation21_spill] sm:$0xff] }
 0x40c   :  { %v4288_v31 = vadd.f32 %v12965_v37, %v4287_v21  ;;  %v9716_v26 = vpop.f32.mrb[146].mxu0  ;;  %v8977_v57 = vpop.f32.mrb[143].mxu1 }
 0x40d   :  { %v4299_v48 = vadd.f32 %v12965_v37, %v9716_v26  ;;  %v8978_v63 = vadd.f32 %v8977_v57, %v8976_v0  ;;  %v4290_v10 = vpop.f32.mrb[147].mxu0  ;;  %v5136_v35 = vmax.f32 %v4296_v49, 0.0  ;;  %v13580_v0 = vld [vmem:[#allocation24_spill] sm:$0xff]  ;;  %v13582_v57 = vld [vmem:[#allocation23_spill] sm:$0xff] }
 0x40e   :  { %v4291_v7 = vadd.f32 %v12965_v37, %v4290_v10  ;;  %v5134_v51 = vmax.f32 %v4288_v31, 0.0  ;;  %v5306_v37 = vld [vmem:[%s13508_s3 + $0x1e0] sm:$0xff]  ;;  %v5308_v10 = vld [vmem:[%s13508_s3 + $0x1f0] sm:$0xff] }
 0x40f   :  { %v5137_v50 = vmax.f32 %v4299_v48, 0.0  ;;  %v5982_v4 = vadd.f32 %v8978_v63, %v13101_v1  ;;  %v13569_v1 = vld [vmem:[#allocation25_spill] sm:$0xff]  ;;  %v13581_v31 = vld [vmem:[#allocation31_spill] sm:$0xff] }
 0x410   :  { %v5135_v53 = vmax.f32 %v4291_v7, 0.0  ;;  %v5276_v48 = vld [vmem:[%s13508_s3 + $0xf0] sm:$0xff]  ;;  %v5309_v63 = vld [vmem:[%s13508_s3 + $0x1f8] sm:$0xff] }
 0x411   :  { %v10346_v46 = vpack.c.bf16 %v5137_v50, %v5136_v35 }
 0x412   :  { %v10342_v56 = vpack.c.bf16 %v5135_v53, %v5134_v51 }
 0x414   :  { %10343 = vmatprep.subr.bf16.mxu1 %v10342_v56 }
 0x415   :  { %10345 = vmatpush3.bf16.msra.mxu1 %v13132_v6  ;;  %v13570_v6 = vld [vmem:[#allocation17_spill] sm:$0xff] }
 0x416   :  { %10347 = vmatprep.subr.bf16.mxu1 %v10346_v46 }
 0x419   :  { %10349 = vmatpush3.bf16.msra.mxu1 %v13126_v61  ;;  %v5277_v61 = vld [vmem:[%s13508_s3 + $0xf8] sm:$0xff] }
 0x41a   :  { %10351 = vmatprep.subr.bf16.mxu1 %v12170_v60  ;;  %v5270_v60 = vld [vmem:[%s13508_s3 + $0xc0] sm:$0xff] }
 0x41d   :  { %10353 = vmatpush3.bf16.msra.mxu1 %v10352_v18  ;;  %v13572_v18 = vld [vmem:[#allocation20_spill] sm:$0xff] }
 0x41e   :  { %10355 = vmatprep.subr.bf16.mxu1 %v12164_v8  ;;  %v5303_v8 = vld [vmem:[%s13508_s3 + $0x1c8] sm:$0xff] }
 0x421   :  { %10357 = vmatpush3.bf16.msra.mxu1 %v10356_v59  ;;  %v13571_v59 = vld [vmem:[#allocation28_spill] sm:$0xff] }
 0x422   :  { %10359 = vmatprep.subr.bf16.mxu1 %v12194_v41  ;;  %v5273_v41 = vld [vmem:[%s13508_s3 + $0xd8] sm:$0xff] }
 0x425   :  { %10361 = vmatpush3.bf16.msra.mxu1 %v10360_v30  ;;  %v13574_v30 = vld [vmem:[#allocation19_spill] sm:$0xff] }
 0x426   :  { %10363 = vmatprep.subr.bf16.mxu1 %v12191_v17  ;;  %v5302_v17 = vld [vmem:[%s13508_s3 + $0x1c0] sm:$0xff] }
 0x429   :  { %10365 = vmatpush3.bf16.msra.mxu1 %v10364_v28  ;;  %v13573_v28 = vld [vmem:[#allocation27_spill] sm:$0xff] }
 0x42a   :  { %10367 = vmatprep.subr.bf16.mxu1 %v12218_v12 }
 0x42d   :  { %10369 = vmatpush3.bf16.msra.mxu1 %v10368_v19  ;;  %v13579_v19 = vld [vmem:[#allocation32_spill] sm:$0xff] }
 0x42e   :  { %10371 = vmatprep.subr.bf16.mxu1 %v12215_v9 }
 0x431   :  { %10373 = vmatpush3.bf16.msra.mxu1 %v10372_v38 }
 0x432   :  { %10375 = vmatprep.subr.bf16.mxu1 %v12334_v11 }
 0x434   :  { %6275 = vmatmul.mubr.f32.vlgmr.msra.gmra.mrb[156].mxu1 %v5270_v60  ;;  %v6514_v60 = vld [vmem:[%s13512_s7] sm:$0xff] }
 0x435   :  { %10377 = vmatpush3.bf16.msra.mxu1 %v12242_v47  ;;  %6279 = vmatprep.mubr.f32.mxu1 %v5303_v8  ;;  %v6512_v8 = vld [vmem:[%s13511_s6] sm:$0xff] }
 0x436   :  { %10379 = vmatprep.subr.bf16.mxu1 %v12331_v23 }
 0x438   :  { %6280 = vmatmul.mubr.f32.gmra.mrb[158].mxu1 %v5302_v17  ;;  %v6513_v17 = vld [vmem:[%s13511_s6 + $0x8] sm:$0xff] }
 0x439   :  { %10381 = vmatpush3.bf16.msra.mxu1 %v12239_v42  ;;  %6349 = vmatprep.mubr.f32.mxu1 %v5273_v41  ;;  %v6510_v41 = vld [vmem:[%s13509_s4] sm:$0xff] }
 0x43a   :  { %10383 = vmatprep.subr.bf16.mxu1 %v12371_v58  ;;  %v13559_v58 = vld [vmem:[#allocation14_spill] sm:$0xff] }
 0x43d   :  { %10385 = vmatpush3.bf16.msra.mxu1 %v12263_v34 }
 0x43e   :  { %10387 = vmatprep.subr.bf16.mxu1 %v12365_v24  ;;  %v13558_v24 = vld [vmem:[#allocation8_spill] sm:$0xff] }
 0x441   :  { %10389 = vmatpush3.bf16.msra.mxu1 %v12260_v20 }
 0x442   :  { %10391 = vmatprep.subr.bf16.mxu1 %v12395_v32  ;;  %v13561_v32 = vld [vmem:[#allocation13_spill] sm:$0xff] }
 0x445   :  { %10393 = vmatpush3.bf16.msra.mxu1 %v12290_v62  ;;  %v5272_v62 = vld [vmem:[%s13508_s3 + $0xd0] sm:$0xff] }
 0x446   :  { %10395 = vmatprep.subr.bf16.mxu1 %v12392_v43  ;;  %v13560_v43 = vld [vmem:[#allocation10_spill] sm:$0xff] }
 0x447   :  { %v9011_v9 = vpop.f32.mrb[144].mxu1 }
 0x448   :  { %v9012_v12 = vpop.f32.mrb[145].mxu1 }
 0x449   :  { %v9013_v47 = vadd.f32 %v9012_v12, %v9011_v9  ;;  %10397 = vmatpush3.bf16.msra.mxu1 %v12287_v25  ;;  %v5305_v25 = vld [vmem:[%s13508_s3 + $0x1d8] sm:$0xff]  ;;  %v6511_v9 = vld [vmem:[%s13509_s4 + $0x8] sm:$0xff] }
 0x44a   :  { %10399 = vmatprep.subr.bf16.mxu1 %v12419_v22  ;;  %v13563_v22 = vld [vmem:[#allocation16_spill] sm:$0xff]  ;;  %v10470_v12 = vpack.c.bf16 %v6511_v9, %v6510_v41 }
 0x44b   :  { %v6052_v42 = vadd.f32 %v9013_v47, %v5977_v27  ;;  %v9014_v23 = vpop.f32.mrb[146].mxu1  ;;  %v10917_v47 = vmov 0.0|0.0  }
 0x44c   :  { %v9015_v34 = vpop.f32.mrb[147].mxu1 }
 0x44d   :  { %v9016_v11 = vadd.f32 %v9015_v34, %v9014_v23  ;;  %10401 = vmatpush3.bf16.msra.mxu1 %v12312_v36  ;;  %v5304_v36 = vld [vmem:[%s13508_s3 + $0x1d0] sm:$0xff] }
 0x44e   :  { %10403 = vmatprep.subr.bf16.mxu1 %v12416_v16  ;;  %v13562_v16 = vld [vmem:[#allocation9_spill] sm:$0xff] }
 0x44f   :  { %v6057_v20 = vadd.f32 %v9016_v11, %v5982_v4 }
 0x451   :  { %10405 = vmatpush3.bf16.msra.mxu1 %v12309_v55  ;;  %v5275_v55 = vld [vmem:[%s13508_s3 + $0xe8] sm:$0xff] }
 0x452   :  { %10407 = vmatprep.subr.bf16.mxu1 %v12530_v52  ;;  %v13567_v52 = vld [vmem:[#allocation26_spill] sm:$0xff] }
 0x454   :  { %6350 = vmatmul.mubr.f32.vlgmr.msra.gmra.mrb[160].mxu1 %v5272_v62 }
 0x455   :  { %10409 = vmatpush3.bf16.msra.mxu1 %v12443_v5  ;;  %6354 = vmatprep.mubr.f32.mxu1 %v5305_v25  ;;  %v13565_v5 = vld [vmem:[#allocation15_spill] sm:$0xff] }
 0x456   :  { %10411 = vmatprep.subr.bf16.mxu1 %v12527_v15  ;;  %v13566_v15 = vld [vmem:[#allocation11_spill] sm:$0xff] }
 0x458   :  { %6355 = vmatmul.mubr.f32.gmra.mrb[162].mxu1 %v5304_v36 }
 0x459   :  { %10413 = vmatpush3.bf16.msra.mxu1 %v12440_v14  ;;  %6424 = vmatprep.mubr.f32.mxu1 %v5275_v55  ;;  %v13564_v14 = vld [vmem:[#allocation12_spill] sm:$0xff] }
 0x45a   :  { %10415 = vmatprep.subr.bf16.mxu1 %v12567_v2  ;;  %v13568_v2 = vld [vmem:[#allocation18_spill] sm:$0xff] }
 0x45d   :  { %10417 = vmatpush3.bf16.msra.mxu1 %v12464_v3  ;;  %v5274_v3 = vld [vmem:[%s13508_s3 + $0xe0] sm:$0xff] }
 0x45e   :  { %10419 = vmatprep.subr.bf16.mxu1 %v12561_v44  ;;  %v5307_v44 = vld [vmem:[%s13508_s3 + $0x1e8] sm:$0xff] }
 0x461   :  { %10421 = vmatpush3.bf16.msra.mxu1 %v13558_v24 }
 0x462   :  { %10423 = vmatprep.subr.bf16.mxu1 %v13559_v58 }
 0x465   :  { %10425 = vmatpush3.bf16.msra.mxu1 %v13560_v43 }
 0x466   :  { %10427 = vmatprep.subr.bf16.mxu1 %v13561_v32 }
 0x469   :  { %10429 = vmatpush3.bf16.msra.mxu1 %v13562_v16 }
 0x46a   :  { %10431 = vmatprep.subr.bf16.mxu1 %v13563_v22 }
 0x46d   :  { %10433 = vmatpush3.bf16.msra.mxu1 %v13564_v14 }
 0x46e   :  { %10435 = vmatprep.subr.bf16.mxu1 %v13565_v5 }
 0x471   :  { %10437 = vmatpush3.bf16.msra.mxu1 %v13566_v15 }
 0x472   :  { %10439 = vmatprep.subr.bf16.mxu1 %v13567_v52 }
 0x474   :  { %6425 = vmatmul.mubr.f32.vlgmr.msra.gmra.mrb[164].mxu1 %v5274_v3 }
 0x475   :  { %10441 = vmatpush3.bf16.msra.mxu1 %v13568_v2  ;;  %6429 = vmatprep.mubr.f32.mxu1 %v5307_v44 }
 0x476   :  { %10443 = vmatprep.subr.bf16.mxu1 %v13569_v1 }
 0x478   :  { %6430 = vmatmul.mubr.f32.gmra.mrb[166].mxu1 %v5306_v37 }
 0x479   :  { %10445 = vmatpush3.bf16.msra.mxu1 %v13570_v6  ;;  %6499 = vmatprep.mubr.f32.mxu1 %v5277_v61 }
 0x47a   :  { %10447 = vmatprep.subr.bf16.mxu1 %v13571_v59 }
 0x47d   :  { %10449 = vmatpush3.bf16.msra.mxu1 %v13572_v18 }
 0x47e   :  { %10451 = vmatprep.subr.bf16.mxu1 %v13573_v28 }
 0x481   :  { %10453 = vmatpush3.bf16.msra.mxu1 %v13574_v30  ;;  %v6688_v30 = vld [vmem:[%s13514_s9] sm:$0xff] }
 0x482   :  { %10455 = vmatprep.subr.bf16.mxu1 %v13575_v39  ;;  %v6689_v39 = vld [vmem:[%s13514_s9 + $0x8] sm:$0xff] }
 0x485   :  { %10457 = vmatpush3.bf16.msra.mxu1 %v13576_v45 }
 0x486   :  { %10459 = vmatprep.subr.bf16.mxu1 %v13577_v54 }
 0x487   :  { %v9049_v33 = vpop.f32.mrb[148].mxu1 }
 0x488   :  { %v9050_v40 = vpop.f32.mrb[149].mxu1 }
 0x489   :  { %v9051_v38 = vadd.f32 %v9050_v40, %v9049_v33  ;;  %10461 = vmatpush3.bf16.msra.mxu1 %v13578_v13  ;;  %v13284_v33 = vpack.c.bf16 %v6689_v39, %v6688_v30  ;;  %v6691_v13 = vld [vmem:[%s13514_s9 + $0x18] sm:$0xff] }
 0x48a   :  { %10463 = vmatprep.subr.bf16.mxu1 %v13579_v19 }
 0x48b   :  { %v6127_v29 = vadd.f32 %v9051_v38, %v6052_v42  ;;  %v9052_v27 = vpop.f32.mrb[150].mxu1  ;;  %v6690_v38 = vld [vmem:[%s13514_s9 + $0x10] sm:$0xff] }
 0x48c   :  { %v9053_v49 = vpop.f32.mrb[151].mxu1  ;;  %v13293_v19 = vpack.c.bf16 %v6691_v13, %v6690_v38 }
 0x48d   :  { %v9054_v21 = vadd.f32 %v9053_v49, %v9052_v27  ;;  %10465 = vmatpush3.bf16.msra.mxu1 %v13580_v0  ;;  %v6693_v27 = vld [vmem:[%s13513_s8] sm:$0x3] }
 0x48e   :  { %10467 = vmatprep.subr.bf16.mxu1 %v13581_v31  ;;  %v8354_v49 = vld [vmem:[%s13510_s5] ss:$0 sm:$0xff]  ;;  %s10921_s5 = smov 96  }
 0x48f   :  { %v6132_v26 = vadd.f32 %v9054_v21, %v6057_v20 }
 0x491   :  { %10469 = vmatpush3.bf16.msra.mxu1 %v13582_v57 }
 0x492   :  { %9825 = vmatprep.subr.mxu1 %v6514_v60 }
 0x494   :  { %6500 = vmatmul.mubr.f32.vlgmr.msra.gmra.mrb[168].mxu1 %v5276_v48 }
 0x495   :  { %6504 = vmatprep.mubr.f32.mxu1 %v5309_v63  ;;  %9826 = vmatpush3.msra.mxu1 %v6514_v60 }
 0x496   :  { %10471 = vmatprep.subr.bf16.mxu1 %v10470_v12 }
 0x498   :  { %6505 = vmatmul.mubr.f32.gmra.mrb[170].mxu1 %v5308_v10 }
 0x499   :  { %9827 = vmatprep.mubr.msk.f32.mxu1 %vm6515_vm2, %v6512_v8 }
 0x49c   :  { %9828 = vmatmul.mubr.msk.f32.vlgmr.msra.gmra.mrb[172].mxu1 %vm6515_vm2, %v6513_v17 }
 0x49d   :  { %10473 = vmatpush3.bf16.msra.mxu1 %v10470_v12 }
 0x49e   :  { %10474 = vmatprep.subr.bf16.mxu1 %v10917_v47 }
 0x4c7   :  { %v9087_v7 = vpop.f32.mrb[152].mxu1 }
 0x4c8   :  { %v9088_v35 = vpop.f32.mrb[153].mxu1 }
 0x4c9   :  { %v9089_v50 = vadd.f32 %v9088_v35, %v9087_v7 }
 0x4cb   :  { %v6202_v4 = vadd.f32 %v9089_v50, %v6127_v29  ;;  %v9090_v51 = vpop.f32.mrb[154].mxu1  ;;  %v10919_v29 = vmov 0.0  }
 0x4cc   :  { %v9091_v53 = vpop.f32.mrb[155].mxu1 }
 0x4cd   :  { %v9092_v46 = vadd.f32 %v9091_v53, %v9090_v51 }
 0x4cf   :  { %v6207_v56 = vadd.f32 %v9092_v46, %v6132_v26  ;;  %v13318_v26 = vld [vmem:[%s13515_s10] ss:$0 sm:$0xff]  ;;  %s10922_s10 = smov 32  }
 0x507   :  { %v9125_v42 = vpop.f32.mrb[156].mxu1 }
 0x508   :  { %v9126_v23 = vpop.f32.mrb[157].mxu1 }
 0x509   :  { %v9127_v34 = vadd.f32 %v9126_v23, %v9125_v42 }
 0x50b   :  { %v6277_v11 = vadd.f32 %v9127_v34, %v6202_v4  ;;  %v9128_v20 = vpop.f32.mrb[158].mxu1 }
 0x50c   :  { %v9129_v62 = vpop.f32.mrb[159].mxu1 }
 0x50d   :  { %v9130_v25 = vadd.f32 %v9129_v62, %v9128_v20 }
 0x50f   :  { %v6282_v36 = vadd.f32 %v9130_v25, %v6207_v56 }
 0x527   :  { %v9163_v55 = vpop.f32.mrb[160].mxu1 }
 0x528   :  { %v9164_v24 = vpop.f32.mrb[161].mxu1 }
 0x529   :  { %v9165_v58 = vadd.f32 %v9164_v24, %v9163_v55 }
 0x52b   :  { %v6352_v43 = vadd.f32 %v9165_v58, %v6277_v11  ;;  %v9166_v32 = vpop.f32.mrb[162].mxu1 }
 0x52c   :  { %v9167_v16 = vpop.f32.mrb[163].mxu1 }
 0x52d   :  { %v9168_v22 = vadd.f32 %v9167_v16, %v9166_v32 }
 0x52f   :  { %v6357_v14 = vadd.f32 %v9168_v22, %v6282_v36 }
 0x547   :  { %v9201_v5 = vpop.f32.mrb[164].mxu1 }
 0x548   :  { %v9202_v15 = vpop.f32.mrb[165].mxu1 }
 0x549   :  { %v9203_v3 = vadd.f32 %v9202_v15, %v9201_v5 }
 0x54b   :  { %v6427_v52 = vadd.f32 %v9203_v3, %v6352_v43  ;;  %v9204_v44 = vpop.f32.mrb[166].mxu1 }
 0x54c   :  { %v9205_v2 = vpop.f32.mrb[167].mxu1 }
 0x54d   :  { %v9206_v37 = vadd.f32 %v9205_v2, %v9204_v44 }
 0x54f   :  { %v6432_v1 = vadd.f32 %v9206_v37, %v6357_v14 }
 0x567   :  { %v9239_v61 = vpop.f32.mrb[168].mxu1 }
 0x568   :  { %v9240_v6 = vpop.f32.mrb[169].mxu1 }
 0x569   :  { %v9241_v59 = vadd.f32 %v9240_v6, %v9239_v61 }
 0x56b   :  { %v6502_v18 = vadd.f32 %v9241_v59, %v6427_v52  ;;  %v9242_v28 = vpop.f32.mrb[170].mxu1 }
 0x56c   :  { %v9243_v45 = vpop.f32.mrb[171].mxu1 }
 0x56d   :  { %v9244_v54 = vadd.f32 %v9243_v45, %v9242_v28  ;;  %9834 = vmatprep.mubr.msk.f32.mxu1 %vm6597_vm3, %v6502_v18 }
 0x56f   :  { %v6507_v40 = vadd.f32 %v9244_v54, %v6432_v1 }
 0x571   :  { %9835 = vmatmul.mubr.msk.f32.vlgmr.msra.gmra.mrb[172].mxu1 %vm6597_vm3, %v6507_v40 }
 0x572   :  { %10476 = vmatpush3.bf16.msra.mxu1 %v13284_v33  ;;  %9845 = vmatprep.mubr.msk.f32.mxu1 %vm10918_vm4, %v10919_v29 }
 0x573   :  { %10477 = vmatprep.subr.bf16.mxu1 %v10917_v47 }
 0x576   :  { %10479 = vmatpush3.bf16.msra.mxu1 %v13293_v19 }
 0x577   :  { %10480 = vmatprep.subr.bf16.mxu1 %v10917_v47 }
 0x579   :  { %9846 = vmatmul.mubr.msk.f32.vlgmr.msra.gmra.mrb[174].mxu1 %vm6700_vm5, %v6693_v27 }
 0x57a   :  { %10482 = vmatpush3.bf16.msra.mxu1 %v13284_v33  ;;  %9856 = vmatprep.mubr.msk.f32.mxu1 %vm10918_vm4, %v10919_v29 }
 0x57b   :  { %10483 = vmatprep.subr.bf16.mxu1 %v10917_v47 }
 0x57e   :  { %10485 = vmatpush3.bf16.msra.mxu1 %v13293_v19 }
 0x57f   :  { %10486 = vmatprep.subr.bf16.mxu1 %v10917_v47 }
 0x644   :  { %v9836_v21 = vpop.f32.mrb[172].mxu1 }
 0x645   :  { %v13313_v0 = vadd.f32 %v9836_v21, %v8354_v49  ;;  %v6670_v31 = vpop.f32.mrb[173].mxu1 }
 0x646   :  { %v13322_v10 = vadd.f32 %v8354_v49, %v6670_v31 }
 0x64c   :  { %v6770_v57 = vpop.f32.mrb[174].mxu1 }
 0x64d   :  { %v6771_v48 = vadd.f32 %v13318_v26, %v6770_v57  ;;  %v9847_v63 = vpop.f32.mrb[175].mxu1 }
 0x64f   :  { %6782 = vrot.lane.b32.xlu0 %v6771_v48, %s10920_s27  ;;  %v6774_v7 = vadd.f32 %v6771_v48, %v13322_v10 }
 0x651   :  { %v8357_v35 = vmul.f32 -1.442695, %v6774_v7 }
 0x653   :  { %10817 = vpow2.f32 %v8357_v35 }
 0x65d   :  { %v10818_v50 = vpop.eup %10817 }
 0x65e   :  { %v6778_v4 = vadd.f32 1.0, %v10818_v50 }
 0x660   :  { %10819 = vrcp.f32 %v6778_v4 }
 0x66a   :  { %v10820_v51 = vpop.eup %10819 }
 0x66b   :  { %v6792_v41 = vsub.f32 1.0, %v10820_v51 }
 0x6c1   :  { %v6783_v53 = vpop.permute.xlu0 %6782 }
 0x6c2   :  { %v6785_v46 = vmul.f32 %v10820_v51, %v6783_v53 }
 0x6c4   :  { %6787 = vrot.lane.b32.xlu0 %v6785_v46, %s10920_s27 }
 0x736   :  { %v6788_v56 = vpop.permute.xlu0 %6787 }
 0x737   :  { %v6790_v60 = vadd.f32 %v6788_v56, %v13322_v10 }
 0x739   :  { %10821 = vtanh.f32 %v6790_v60 }
 0x743   :  { %v10822_v8 = vpop.eup %10821 }
 0x744   :  { %6794 = vrot.lane.b32.xlu1 %v10822_v8, %s10921_s5 }
 0x748   :  { %6798 = vrot.lane.b32.xlu1 %v6693_v27, %s10922_s10 }
 0x7b6   :  { %v6795_v17 = vpop.permute.xlu1 %6794 }
 0x7b7   :  { %v6797_v12 = vmul.f32 %v6795_v17, %v6792_v41 }
 0x7ba   :  { %v6799_v9 = vpop.permute.xlu1 %6798 }
 0x7bb   :  { %v6801_v42 = vmul.f32 %v10820_v51, %v6799_v9 }
 0x7bd   :  { %v6802_v23 = vadd.f32 %v6801_v42, %v6797_v12 }
 0x7bf   :  { %6804 = vrot.lane.b32.xlu0 %v6802_v23, %s10921_s5  ;;  %v6904_v15 = vrot.slane %v6802_v23, 6 }
 0x831   :  { %v6805_v34 = vpop.permute.xlu0 %6804 }
 0x832   :  { %9857 = vmatmul.mubr.msk.f32.vlgmr.msra.gmra.mrb[176].mxu1 %vm6700_vm5, %v6805_v34 }
 0x833   :  { %10488 = vmatpush3.bf16.msra.mxu1 %v13284_v33  ;;  %9867 = vmatprep.mubr.msk.f32.mxu1 %vm10918_vm4, %v10919_v29 }
 0x834   :  { %10489 = vmatprep.subr.bf16.mxu1 %v10917_v47 }
 0x837   :  { %10491 = vmatpush3.bf16.msra.mxu1 %v13293_v19 }
 0x838   :  { %10492 = vmatprep.subr.bf16.mxu1 %v10917_v47 }
 0x905   :  { %v6874_v11 = vpop.f32.mrb[176].mxu1 }
 0x906   :  { %v6875_v20 = vadd.f32 %v13318_v26, %v6874_v11  ;;  %v9858_v62 = vpop.f32.mrb[177].mxu1 }
 0x908   :  { %v6879_v25 = vrot.slane %v6875_v20, 6 }
 0x90a   :  { %6888 = vrot.lane.b32.xlu1 %v6879_v25, %s10920_s27  ;;  %v6881_v36 = vadd.f32 %v6879_v25, %v13322_v10 }
 0x90c   :  { %v8359_v55 = vmul.f32 -1.442695, %v6881_v36 }
 0x90e   :  { %10823 = vpow2.f32 %v8359_v55 }
 0x918   :  { %v10824_v24 = vpop.eup %10823 }
 0x919   :  { %v6885_v58 = vadd.f32 1.0, %v10824_v24 }
 0x91b   :  { %10825 = vrcp.f32 %v6885_v58 }
 0x925   :  { %v10826_v43 = vpop.eup %10825 }
 0x926   :  { %v6898_v3 = vsub.f32 1.0, %v10826_v43  ;;  %v6906_v2 = vmul.f32 %v10826_v43, %v6904_v15 }
 0x97c   :  { %v6889_v32 = vpop.permute.xlu1 %6888 }
 0x97d   :  { %v6891_v16 = vmul.f32 %v10826_v43, %v6889_v32 }
 0x97f   :  { %6893 = vrot.lane.b32.xlu0 %v6891_v16, %s10920_s27 }
 0x9f1   :  { %v6894_v22 = vpop.permute.xlu0 %6893 }
 0x9f2   :  { %v6896_v14 = vadd.f32 %v6894_v22, %v13322_v10 }
 0x9f4   :  { %10827 = vtanh.f32 %v6896_v14 }
 0x9fe   :  { %v10828_v5 = vpop.eup %10827 }
 0x9ff   :  { %6900 = vrot.lane.b32.xlu1 %v10828_v5, %s10921_s5 }
 0xa71   :  { %v6901_v52 = vpop.permute.xlu1 %6900 }
 0xa72   :  { %v6903_v44 = vmul.f32 %v6901_v52, %v6898_v3 }
 0xa74   :  { %v6907_v37 = vadd.f32 %v6906_v2, %v6903_v44 }
 0xa76   :  { %v6909_v1 = vrot.slane %v6907_v37, 2  ;;  %v7010_v31 = vrot.slane %v6907_v37, 6 }
 0xa78   :  { %6910 = vrot.lane.b32.xlu0 %v6909_v1, %s10921_s5 }
 0xaea   :  { %v6911_v61 = vpop.permute.xlu0 %6910 }
 0xaeb   :  { %9868 = vmatmul.mubr.msk.f32.vlgmr.msra.gmra.mrb[178].mxu1 %vm6700_vm5, %v6911_v61 }
 0xaec   :  { %10494 = vmatpush3.bf16.msra.mxu1 %v13284_v33  ;;  %9878 = vmatprep.mubr.msk.f32.mxu1 %vm10918_vm4, %v10919_v29 }
 0xaed   :  { %10495 = vmatprep.subr.bf16.mxu1 %v10917_v47 }
 0xaf0   :  { %10497 = vmatpush3.bf16.msra.mxu1 %v13293_v19 }
 0xaf1   :  { %10498 = vmatprep.subr.bf16.mxu1 %v10917_v47 }
 0xbbe   :  { %v6980_v6 = vpop.f32.mrb[178].mxu1 }
 0xbbf   :  { %v6981_v59 = vadd.f32 %v13318_v26, %v6980_v6  ;;  %v9869_v18 = vpop.f32.mrb[179].mxu1 }
 0xbc1   :  { %v6985_v28 = vrot.slane %v6981_v59, 4 }
 0xbc3   :  { %6994 = vrot.lane.b32.xlu1 %v6985_v28, %s10920_s27  ;;  %v6987_v30 = vadd.f32 %v6985_v28, %v13322_v10 }
 0xbc5   :  { %v8361_v39 = vmul.f32 -1.442695, %v6987_v30 }
 0xbc7   :  { %10829 = vpow2.f32 %v8361_v39 }
 0xbd1   :  { %v10830_v45 = vpop.eup %10829 }
 0xbd2   :  { %v6991_v54 = vadd.f32 1.0, %v10830_v45 }
 0xbd4   :  { %10831 = vrcp.f32 %v6991_v54 }
 0xbde   :  { %v10832_v40 = vpop.eup %10831 }
 0xbdf   :  { %v7004_v57 = vsub.f32 1.0, %v10832_v40  ;;  %v7012_v63 = vmul.f32 %v10832_v40, %v7010_v31 }
 0xc35   :  { %v6995_v38 = vpop.permute.xlu1 %6994 }
 0xc36   :  { %v6997_v13 = vmul.f32 %v10832_v40, %v6995_v38 }
 0xc38   :  { %6999 = vrot.lane.b32.xlu0 %v6997_v13, %s10920_s27 }
 0xcaa   :  { %v7000_v27 = vpop.permute.xlu0 %6999 }
 0xcab   :  { %v7002_v49 = vadd.f32 %v7000_v27, %v13322_v10 }
 0xcad   :  { %10833 = vtanh.f32 %v7002_v49 }
 0xcb7   :  { %v10834_v21 = vpop.eup %10833 }
 0xcb8   :  { %7006 = vrot.lane.b32.xlu1 %v10834_v21, %s10921_s5 }
 0xd2a   :  { %v7007_v48 = vpop.permute.xlu1 %7006 }
 0xd2b   :  { %v7009_v7 = vmul.f32 %v7007_v48, %v7004_v57 }
 0xd2d   :  { %v7013_v35 = vadd.f32 %v7012_v63, %v7009_v7 }
 0xd2f   :  { %v7015_v50 = vrot.slane %v7013_v35, 4  ;;  %v7116_v20 = vrot.slane %v7013_v35, 6 }
 0xd31   :  { %7016 = vrot.lane.b32.xlu0 %v7015_v50, %s10921_s5 }
 0xda3   :  { %v7017_v4 = vpop.permute.xlu0 %7016 }
 0xda4   :  { %9879 = vmatmul.mubr.msk.f32.vlgmr.msra.gmra.mrb[180].mxu1 %vm6700_vm5, %v7017_v4 }
 0xda5   :  { %10500 = vmatpush3.bf16.msra.mxu1 %v13284_v33  ;;  %9889 = vmatprep.mubr.msk.f32.mxu1 %vm10918_vm4, %v10919_v29 }
 0xda6   :  { %10501 = vmatprep.subr.bf16.mxu1 %v10917_v47 }
 0xda9   :  { %10503 = vmatpush3.bf16.msra.mxu1 %v13293_v19 }
 0xdaa   :  { %10504 = vmatprep.subr.bf16.mxu1 %v10917_v47 }
 0xe77   :  { %v7086_v51 = vpop.f32.mrb[180].mxu1 }
 0xe78   :  { %v7087_v53 = vadd.f32 %v13318_v26, %v7086_v51  ;;  %v9880_v46 = vpop.f32.mrb[181].mxu1 }
 0xe7a   :  { %v7091_v56 = vrot.slane %v7087_v53, 2 }
 0xe7c   :  { %7100 = vrot.lane.b32.xlu1 %v7091_v56, %s10920_s27  ;;  %v7093_v60 = vadd.f32 %v7091_v56, %v13322_v10 }
 0xe7e   :  { %v8363_v8 = vmul.f32 -1.442695, %v7093_v60 }
 0xe80   :  { %10835 = vpow2.f32 %v8363_v8 }
 0xe8a   :  { %v10836_v17 = vpop.eup %10835 }
 0xe8b   :  { %v7097_v41 = vadd.f32 1.0, %v10836_v17 }
 0xe8d   :  { %10837 = vrcp.f32 %v7097_v41 }
 0xe97   :  { %v10838_v9 = vpop.eup %10837 }
 0xe98   :  { %v7110_v62 = vsub.f32 1.0, %v10838_v9  ;;  %v7118_v36 = vmul.f32 %v10838_v9, %v7116_v20 }
 0xeee   :  { %v7101_v12 = vpop.permute.xlu1 %7100 }
 0xeef   :  { %v7103_v42 = vmul.f32 %v10838_v9, %v7101_v12 }
 0xef1   :  { %7105 = vrot.lane.b32.xlu0 %v7103_v42, %s10920_s27 }
 0xf63   :  { %v7106_v23 = vpop.permute.xlu0 %7105 }
 0xf64   :  { %v7108_v34 = vadd.f32 %v7106_v23, %v13322_v10 }
 0xf66   :  { %10839 = vtanh.f32 %v7108_v34 }
 0xf70   :  { %v10840_v11 = vpop.eup %10839 }
 0xf71   :  { %7112 = vrot.lane.b32.xlu1 %v10840_v11, %s10921_s5 }
 0xfe3   :  { %v7113_v25 = vpop.permute.xlu1 %7112 }
 0xfe4   :  { %v7115_v55 = vmul.f32 %v7113_v25, %v7110_v62 }
 0xfe6   :  { %v7119_v24 = vadd.f32 %v7118_v36, %v7115_v55 }
 0xfe8   :  { %v7121_v58 = vrot.slane %v7119_v24, 6 }
 0xfea   :  { %7122 = vrot.lane.b32.xlu0 %v7121_v58, %s10921_s5 }
0x105c   :  { %v7123_v43 = vpop.permute.xlu0 %7122 }
0x105d   :  { %9890 = vmatmul.mubr.msk.f32.vlgmr.msra.gmra.mrb[182].mxu1 %vm6700_vm5, %v7123_v43 }
0x105e   :  { %10506 = vmatpush3.bf16.msra.mxu1 %v13284_v33  ;;  %9900 = vmatprep.mubr.msk.f32.mxu1 %vm10918_vm4, %v10919_v29 }
0x105f   :  { %10507 = vmatprep.subr.bf16.mxu1 %v10917_v47 }
0x1062   :  { %10509 = vmatpush3.bf16.msra.mxu1 %v13293_v19 }
0x1063   :  { %10510 = vmatprep.subr.bf16.mxu1 %v10917_v47 }
0x1130   :  { %v7192_v10 = vpop.f32.mrb[182].mxu1 }
0x1131   :  { %v7193_v32 = vadd.f32 %v13318_v26, %v7192_v10  ;;  %v9891_v16 = vpop.f32.mrb[183].mxu1 }
0x1133   :  { %7204 = vrot.lane.b32.xlu1 %v7193_v32, %s10920_s27  ;;  %v7196_v22 = vadd.f32 %v7193_v32, %v13313_v0 }
0x1135   :  { %v8365_v14 = vmul.f32 -1.442695, %v7196_v22 }
0x1137   :  { %10841 = vpow2.f32 %v8365_v14 }
0x1141   :  { %v10842_v5 = vpop.eup %10841 }
0x1142   :  { %v7200_v15 = vadd.f32 1.0, %v10842_v5 }
0x1144   :  { %10843 = vrcp.f32 %v7200_v15 }
0x114e   :  { %v10844_v3 = vpop.eup %10843 }
0x114f   :  { %v7214_v61 = vsub.f32 1.0, %v10844_v3  ;;  %v7221_v59 = vmul.f32 %v10844_v3, %v7121_v58 }
0x11a5   :  { %v7205_v52 = vpop.permute.xlu1 %7204 }
0x11a6   :  { %v7207_v44 = vmul.f32 %v10844_v3, %v7205_v52 }
0x11a8   :  { %7209 = vrot.lane.b32.xlu0 %v7207_v44, %s10920_s27 }
0x121a   :  { %v7210_v2 = vpop.permute.xlu0 %7209 }
0x121b   :  { %v7212_v37 = vadd.f32 %v7210_v2, %v13313_v0 }
0x121d   :  { %10845 = vtanh.f32 %v7212_v37 }
0x1227   :  { %v10846_v1 = vpop.eup %10845 }
0x1228   :  { %7216 = vrot.lane.b32.xlu1 %v10846_v1, %s10921_s5 }
0x129a   :  { %v7217_v6 = vpop.permute.xlu1 %7216 }
0x129b   :  { %v7219_v18 = vmul.f32 %v7217_v6, %v7214_v61 }
0x129d   :  { %v7222_v28 = vadd.f32 %v7221_v59, %v7219_v18  ;;  %v7548_v18 = vld [vmem:[%s13516_s11 + $0x8] sm:$0xff] }
0x129f   :  { %7224 = vrot.lane.b32.xlu0 %v7222_v28, %s10921_s5  ;;  %v7324_v35 = vrot.slane %v7222_v28, 6 }
0x1311   :  { %v7225_v30 = vpop.permute.xlu0 %7224 }
0x1312   :  { %9901 = vmatmul.mubr.msk.f32.vlgmr.msra.gmra.mrb[184].mxu1 %vm6700_vm5, %v7225_v30 }
0x1313   :  { %10512 = vmatpush3.bf16.msra.mxu1 %v13284_v33  ;;  %9911 = vmatprep.mubr.msk.f32.mxu1 %vm10918_vm4, %v10919_v29 }
0x1314   :  { %10513 = vmatprep.subr.bf16.mxu1 %v10917_v47 }
0x1317   :  { %10515 = vmatpush3.bf16.msra.mxu1 %v13293_v19 }
0x1318   :  { %10516 = vmatprep.subr.bf16.mxu1 %v10917_v47 }
0x13e5   :  { %v7294_v39 = vpop.f32.mrb[184].mxu1 }
0x13e6   :  { %v7295_v45 = vadd.f32 %v13318_v26, %v7294_v39  ;;  %v9902_v54 = vpop.f32.mrb[185].mxu1  ;;  %v7550_v39 = vld [vmem:[%s13516_s11 + $0x18] sm:$0xff] }
0x13e8   :  { %v7299_v40 = vrot.slane %v7295_v45, 6 }
0x13ea   :  { %7308 = vrot.lane.b32.xlu1 %v7299_v40, %s10920_s27  ;;  %v7301_v38 = vadd.f32 %v7299_v40, %v13313_v0 }
0x13ec   :  { %v8367_v13 = vmul.f32 -1.442695, %v7301_v38 }
0x13ee   :  { %10847 = vpow2.f32 %v8367_v13 }
0x13f8   :  { %v10848_v27 = vpop.eup %10847 }
0x13f9   :  { %v7305_v49 = vadd.f32 1.0, %v10848_v27 }
0x13fb   :  { %10849 = vrcp.f32 %v7305_v49 }
0x1405   :  { %v10850_v21 = vpop.eup %10849 }
0x1406   :  { %v7318_v50 = vsub.f32 1.0, %v10850_v21  ;;  %v7326_v51 = vmul.f32 %v10850_v21, %v7324_v35 }
0x145c   :  { %v7309_v31 = vpop.permute.xlu1 %7308 }
0x145d   :  { %v7311_v57 = vmul.f32 %v10850_v21, %v7309_v31 }
0x145f   :  { %7313 = vrot.lane.b32.xlu0 %v7311_v57, %s10920_s27  ;;  %v7635_v57 = vld [vmem:[%s13518_s13] sm:$0xff] }
0x14d1   :  { %v7314_v48 = vpop.permute.xlu0 %7313 }
0x14d2   :  { %v7316_v63 = vadd.f32 %v7314_v48, %v13313_v0  ;;  %v7636_v48 = vld [vmem:[%s13518_s13 + $0x8] sm:$0xff] }
0x14d4   :  { %10851 = vtanh.f32 %v7316_v63 }
0x14de   :  { %v10852_v7 = vpop.eup %10851 }
0x14df   :  { %7320 = vrot.lane.b32.xlu1 %v10852_v7, %s10921_s5  ;;  %v10529_v7 = vpack.c.bf16 %v7636_v48, %v7635_v57 }
0x1551   :  { %v7321_v4 = vpop.permute.xlu1 %7320 }
0x1552   :  { %v7323_v53 = vmul.f32 %v7321_v4, %v7318_v50  ;;  %v7637_v50 = vld [vmem:[%s13518_s13 + $0x10] sm:$0xff]  ;;  %v7638_v4 = vld [vmem:[%s13518_s13 + $0x18] sm:$0xff] }
0x1554   :  { %v7327_v46 = vadd.f32 %v7326_v51, %v7323_v53  ;;  %v10532_v51 = vpack.c.bf16 %v7638_v4, %v7637_v50  ;;  %v8372_v53 = vld [vmem:[%s13517_s12] ss:$0 sm:$0xff] }
0x1556   :  { %v7329_v56 = vrot.slane %v7327_v46, 2  ;;  %v7430_v36 = vrot.slane %v7327_v46, 6  ;;  %v7720_v46 = vld [vmem:[%s13520_s15] sm:$0xff] }
0x1558   :  { %7330 = vrot.lane.b32.xlu0 %v7329_v56, %s10921_s5  ;;  %v7721_v56 = vld [vmem:[%s13520_s15 + $0x8] sm:$0xff] }
0x15ca   :  { %v7331_v60 = vpop.permute.xlu0 %7330 }
0x15cb   :  { %9912 = vmatmul.mubr.msk.f32.vlgmr.msra.gmra.mrb[186].mxu1 %vm6700_vm5, %v7331_v60 }
0x15cc   :  { %10518 = vmatpush3.bf16.msra.mxu1 %v13284_v33  ;;  %9922 = vmatprep.mubr.msk.f32.mxu1 %vm10918_vm4, %v10919_v29 }
0x15cd   :  { %10519 = vmatprep.subr.bf16.mxu1 %v10917_v47 }
0x15d0   :  { %10521 = vmatpush3.bf16.msra.mxu1 %v13293_v19 }
0x15d1   :  { %10522 = vmatprep.subr.bf16.mxu1 %v10917_v47 }
0x169e   :  { %v7400_v8 = vpop.f32.mrb[186].mxu1 }
0x169f   :  { %v7401_v17 = vadd.f32 %v13318_v26, %v7400_v8  ;;  %v9913_v41 = vpop.f32.mrb[187].mxu1 }
0x16a0   :  { %v10535_v41 = vpack.c.bf16 %v7721_v56, %v7720_v46 }
0x16a1   :  { %v7405_v9 = vrot.slane %v7401_v17, 4 }
0x16a3   :  { %7414 = vrot.lane.b32.xlu1 %v7405_v9, %s10920_s27  ;;  %v7407_v12 = vadd.f32 %v7405_v9, %v13313_v0 }
0x16a5   :  { %v8369_v42 = vmul.f32 -1.442695, %v7407_v12  ;;  %v7722_v12 = vld [vmem:[%s13520_s15 + $0x10] sm:$0xff] }
0x16a7   :  { %10853 = vpow2.f32 %v8369_v42  ;;  %v7723_v42 = vld [vmem:[%s13520_s15 + $0x18] sm:$0xff] }
0x16b1   :  { %v10854_v33 = vpop.eup %10853 }
0x16b2   :  { %v7411_v23 = vadd.f32 1.0, %v10854_v33  ;;  %v10538_v33 = vpack.c.bf16 %v7723_v42, %v7722_v12 }
0x16b4   :  { %10855 = vrcp.f32 %v7411_v23  ;;  %v8374_v23 = vld [vmem:[%s13519_s14] ss:$0 sm:$0xff] }
0x16be   :  { %v10856_v34 = vpop.eup %10855 }
0x16bf   :  { %v7424_v55 = vsub.f32 1.0, %v10856_v34  ;;  %v7432_v58 = vmul.f32 %v10856_v34, %v7430_v36 }
0x1715   :  { %v7415_v11 = vpop.permute.xlu1 %7414 }
0x1716   :  { %v7417_v20 = vmul.f32 %v10856_v34, %v7415_v11 }
0x1718   :  { %7419 = vrot.lane.b32.xlu0 %v7417_v20, %s10920_s27 }
0x178a   :  { %v7420_v19 = vpop.permute.xlu0 %7419 }
0x178b   :  { %v7422_v62 = vadd.f32 %v7420_v19, %v13313_v0 }
0x178d   :  { %10857 = vtanh.f32 %v7422_v62 }
0x1797   :  { %v10858_v25 = vpop.eup %10857 }
0x1798   :  { %7426 = vrot.lane.b32.xlu1 %v10858_v25, %s10921_s5 }
0x180a   :  { %v7427_v24 = vpop.permute.xlu1 %7426 }
0x180b   :  { %v7429_v43 = vmul.f32 %v7427_v24, %v7424_v55 }
0x180d   :  { %v7433_v10 = vadd.f32 %v7432_v58, %v7429_v43 }
0x180f   :  { %v7435_v32 = vrot.slane %v7433_v10, 4  ;;  %v7536_v54 = vrot.slane %v7433_v10, 6 }
0x1811   :  { %7436 = vrot.lane.b32.xlu0 %v7435_v32, %s10921_s5 }
0x1883   :  { %v7437_v16 = vpop.permute.xlu0 %7436 }
0x1884   :  { %9923 = vmatmul.mubr.msk.f32.vlgmr.msra.gmra.mrb[188].mxu1 %vm6700_vm5, %v7437_v16 }
0x1885   :  { %9933 = vmatprep.mubr.msk.f32.mxu1 %vm10918_vm4, %v10919_v29 }
0x1957   :  { %v7506_v22 = vpop.f32.mrb[188].mxu1 }
0x1958   :  { %v7507_v14 = vadd.f32 %v13318_v26, %v7506_v22  ;;  %v9924_v5 = vpop.f32.mrb[189].mxu1  ;;  %v7547_v26 = vld [vmem:[%s13516_s11] sm:$0xff] }
0x1959   :  { %v10523_v28 = vpack.c.bf16 %v7548_v18, %v7547_v26 }
0x195a   :  { %v7511_v15 = vrot.slane %v7507_v14, 2 }
0x195b   :  { %10524 = vmatpush3.bf16.msra.mxu1 %v10523_v28 }
0x195c   :  { %7520 = vrot.lane.b32.xlu1 %v7511_v15, %s10920_s27  ;;  %v7513_v3 = vadd.f32 %v7511_v15, %v13313_v0  ;;  %10525 = vmatprep.subr.bf16.mxu1 %v10917_v47 }
0x195e   :  { %v8371_v52 = vmul.f32 -1.442695, %v7513_v3 }
0x1960   :  { %10859 = vpow2.f32 %v8371_v52 }
0x196a   :  { %v10860_v44 = vpop.eup %10859 }
0x196b   :  { %v7517_v2 = vadd.f32 1.0, %v10860_v44 }
0x196d   :  { %10861 = vrcp.f32 %v7517_v2 }
0x1977   :  { %v10862_v37 = vpop.eup %10861 }
0x1978   :  { %v7530_v40 = vsub.f32 1.0, %v10862_v37  ;;  %v7538_v13 = vmul.f32 %v10862_v37, %v7536_v54 }
0x19ce   :  { %v7521_v1 = vpop.permute.xlu1 %7520 }
0x19cf   :  { %v7523_v61 = vmul.f32 %v10862_v37, %v7521_v1 }
0x19d1   :  { %7525 = vrot.lane.b32.xlu0 %v7523_v61, %s10920_s27 }
0x1a43   :  { %v7526_v6 = vpop.permute.xlu0 %7525 }
0x1a44   :  { %v7528_v59 = vadd.f32 %v7526_v6, %v13313_v0  ;;  %v7549_v0 = vld [vmem:[%s13516_s11 + $0x10] sm:$0xff] }
0x1a45   :  { %v10526_v45 = vpack.c.bf16 %v7550_v39, %v7549_v0 }
0x1a46   :  { %10863 = vtanh.f32 %v7528_v59 }
0x1a47   :  { %10527 = vmatpush3.bf16.msra.mxu1 %v10526_v45 }
0x1a48   :  { %10528 = vmatprep.subr.bf16.mxu1 %v10917_v47 }
0x1a50   :  { %v10864_v30 = vpop.eup %10863 }
0x1a51   :  { %7532 = vrot.lane.b32.xlu1 %v10864_v30, %s10921_s5 }
0x1ac3   :  { %v7533_v38 = vpop.permute.xlu1 %7532 }
0x1ac4   :  { %v7535_v27 = vmul.f32 %v7533_v38, %v7530_v40 }
0x1ac6   :  { %v7539_v49 = vadd.f32 %v7538_v13, %v7535_v27 }
0x1ac8   :  { %7541 = vrot.lane.b32.xlu1 %v7539_v49, %s10921_s5  ;;  %v7546_v21 = vmax.f32 %v7539_v49, 0.0 }
0x1aca   :  { %v7559_v31 = vrot.slane %v7546_v21, 6 }
0x1acc   :  { %7560 = vrot.lane.b32.xlu0 %v7559_v31, %s10921_s5 }
0x1b3a   :  { %v7542_v63 = vpop.permute.xlu1 %7541 }
0x1b3b   :  { %7545 = vst.msk [vmem:[#allocation4 - $0x6] sm:$0xc0] %vm7544_vm6, %v7542_v63 }
0x1b3e   :  { %v7561_v35 = vpop.permute.xlu0 %7560 }
0x1b3f   :  { %9934 = vmatmul.mubr.msk.f32.vlgmr.msra.gmra.mrb[190].mxu1 %vm6700_vm5, %v7561_v35 }
0x1b40   :  { %10530 = vmatpush3.bf16.msra.mxu1 %v10529_v7  ;;  %9944 = vmatprep.mubr.msk.f32.mxu1 %vm10918_vm4, %v10919_v29 }
0x1b41   :  { %10531 = vmatprep.subr.bf16.mxu1 %v10917_v47 }
0x1b44   :  { %10533 = vmatpush3.bf16.msra.mxu1 %v10532_v51 }
0x1b45   :  { %10534 = vmatprep.subr.bf16.mxu1 %v10917_v47 }
0x1c12   :  { %v7630_v60 = vpop.f32.mrb[190].mxu1 }
0x1c13   :  { %v7631_v8 = vadd.f32 %v8372_v53, %v7630_v60  ;;  %v9935_v17 = vpop.f32.mrb[191].mxu1 }
0x1c15   :  { %v7634_v9 = vmax.f32 %v7631_v8, 0.0 }
0x1c17   :  { %9945 = vmatmul.mubr.msk.f32.vlgmr.msra.gmra.mrb[192].mxu1 %vm6700_vm5, %v7634_v9 }
0x1c18   :  { %10536 = vmatpush3.bf16.msra.mxu1 %v10535_v41  ;;  %9955 = vmatprep.mubr.msk.f32.mxu1 %vm10918_vm4, %v10919_v29 }
0x1c19   :  { %10537 = vmatprep.subr.bf16.mxu1 %v10917_v47 }
0x1c1c   :  { %10539 = vmatpush3.bf16.msra.mxu1 %v10538_v33 }
0x1cea   :  { %v7715_v34 = vpop.f32.mrb[192].mxu1 }
0x1ceb   :  { %v7716_v11 = vadd.f32 %v8374_v23, %v7715_v34  ;;  %v9946_v20 = vpop.f32.mrb[193].mxu1 }
0x1ced   :  { %v7719_v29 = vmax.f32 %v7716_v11, 0.0 }
0x1cef   :  { %9956 = vmatmul.mubr.msk.f32.vlgmr.msra.gmra.mrb[194].mxu1 %vm6700_vm5, %v7719_v29 }
0x1cf0   :  { %10880 = shalt.err (!%p10877_p4)
}
0x1cf1   :  { %s10881_s14 = scalar_lea.hbm %s13523_s18, 32 }
0x1cf2   :  { %p10882_p5 = scmp.ne.s32.totalorder %s13523_s18, %s10881_s14  ;;  %p10885_p6 = scmp.lt.u32.totalorder %s10881_s14, %s13523_s18 }
0x1cf4   :  { %p10887_p7 = pnand %p10885_p6, %p10882_p5 }
0x1cf6   :  { %10890 = shalt.err (!%p10887_p7)
}
0x1cf7   :  { %7825 = dma.vmem_to_hbm [thread:$0]  %s7823_s24, 32, %s13523_s18, [#allocation5]   ;;  %v8376_v47 = vld [vmem:[%s13521_s16] ss:$0 sm:$0xff]  ;;  %vm7804_vm7 = vcmask 25600  }
0x1cf8   :  { %s10924_s21 = smov [#allocation2]  }
0x1cf9   :  { %s7812_s2 = sshll.u32 %s10924_s21, 4  ;;  %s7813_s2 = int_to_ptr.vmem [resolvable:$true] %s7812_s2 }
0x1cfa   :  { %s10891_s23 = scalar_lea.vmem %s7813_s2, 32  ;;  %p10896_p9 = scmp.lt.s32.totalorder %s7813_s2, %s7813_s2 }
0x1cfb   :  { %p10892_p8 = scmp.ne.s32.totalorder %s7813_s2, %s10891_s23  ;;  %p10897_p10 = scmp.lt.s32.totalorder %s10891_s23, %s10891_s23 }
0x1cfd   :  { %p10898_p11 = por %p10897_p10, %p10896_p9 }
0x1cff   :  { %p10899_p12 = pnand %p10898_p11, %p10892_p8 }
0x1dc2   :  { %v7800_v19 = vpop.f32.mrb[194].mxu1 }
0x1dc3   :  { %v7801_v62 = vadd.f32 %v8376_v47, %v7800_v19  ;;  %v9957_v25 = vpop.f32.mrb[195].mxu1 }
0x1dc5   :  { %7805 = vst.msk [vmem:[#allocation2] sm:$0x3] %vm7804_vm7, %v7801_v62 }
0x1dc6   :  { %10902 = shalt.err (!%p10899_p12)
}
0x1dc7   :  { %s10903_s25 = scalar_lea.hbm %s13522_s17, 32 }
0x1dc8   :  { %p10904_p13 = scmp.ne.s32.totalorder %s13522_s17, %s10903_s25  ;;  %p10907_p0 = scmp.lt.u32.totalorder %s10903_s25, %s13522_s17 }
0x1dca   :  { %p10909_p1 = pnand %p10907_p0, %p10904_p13 }
0x1dcc   :  { %10912 = shalt.err (!%p10909_p1)
}
0x1dcd   :  { %7815 = dma.vmem_to_hbm [thread:$0]  %s7813_s2, 32, %s13522_s17, [#allocation3]  }
0x1dce   :  { %10913 = dma.done.wait [#allocation3], 32  }
0x1dcf   :  { %10914 = vsyncadd [#allocation3], 4294967264 }
0x1dd0   :  { %10915 = dma.done.wait [#allocation5], 32  }
0x1dd1   :  { %10916 = vsyncadd [#allocation5], 4294967264 }
0x1dd2   :  { %7832 = vsyncpa [#allocation3], 1 }
0x1dd3   :  { %7833 = vsyncpa [#allocation5], 1 }

</bundles_post_ra>
